<compile_context>
chip_gen: v7x
topology: tpu7x:2x2x1
jax: 0.10.0
libtpu: 0.0.40
codegen_flags: <defaults>
</compile_context>

<pallas_src>
import functools

import jax
import jax.numpy as jnp
from jax.experimental import pallas as pl
from jax.experimental.pallas import tpu as pltpu

KERNEL_SIZE = 4          # ConvTranspose2d kernel_size
OUT_CHANNELS = 64 * 8    # fixed by the module: 512
EPS = 1e-5               # BatchNorm2d default eps
TILE_OC = 256            # output-channel tile (2 lane-tiles; grid=(2,) for OC=512)


def _generator_kernel(z_ref, w_ref, gamma_ref, beta_ref, o_ref, *, hw, eps):
    """Fused ConvTranspose2d(1x1 input) -> BatchNorm2d(training stats) -> ReLU
    for one tile of output channels, with a streaming finalize.

    z_ref:     (N, Cin)            bf16
    w_ref:     (HW, Cin, tile_oc)  bf16   w[p, ic, c] = W[ic, c, i, j], p = i*KW + j
    gamma_ref: (1, tile_oc)        f32
    beta_ref:  (1, tile_oc)        f32
    o_ref:     (HW, N, tile_oc)    f32
    """
    n = z_ref.shape[0]
    tile_oc = o_ref.shape[-1]
    z_bf = z_ref[...]
    inv_count = 1.0 / float(n * hw)

    # Pass 1: one small MXU matmul per spatial position (relayout-free
    # leading-dim weight slab).  Raw y goes straight to the output VMEM block
    # (streaming -> O(1) live tiles) while the per-channel sum is accumulated.
    total = jnp.zeros((1, tile_oc), jnp.float32)
    for p in range(hw):
        y = jnp.dot(z_bf, w_ref[p], preferred_element_type=jnp.float32)
        o_ref[p] = y
        total = total + y.sum(axis=0, keepdims=True)
    mean = total * inv_count                              # (1, tile_oc)

    # Pass 2: centered sum-of-squares, re-reading raw y from VMEM.
    # (Two-pass biased variance matches the PyTorch BatchNorm training forward.)
    mean_b = jnp.broadcast_to(mean, (n, tile_oc))         # hoisted broadcast
    sq = jnp.zeros((1, tile_oc), jnp.float32)
    for p in range(hw):
        sq = sq + jnp.square(o_ref[p] - mean_b).sum(axis=0, keepdims=True)
    var = sq * inv_count                                  # (1, tile_oc)

    # Fold the BN affine into one per-channel scale/shift (EUP rsqrt), then a
    # single FMA + ReLU per output element.  Broadcasts hoisted out of the loop.
    scale = gamma_ref[...] * jax.lax.rsqrt(var + eps)     # (1, tile_oc)
    shift = beta_ref[...] - mean * scale                  # (1, tile_oc)
    scale_b = jnp.broadcast_to(scale, (n, tile_oc))
    shift_b = jnp.broadcast_to(shift, (n, tile_oc))

    # Pass 3: normalize + ReLU in place.
    for p in range(hw):
        o_ref[p] = jnp.maximum(o_ref[p] * scale_b + shift_b, 0.0)


def prepare_generator_params(weight, gamma, beta):
    """One-time parameter transform (do this at init, NOT per forward call).

    weight: (Cin, OC, KH, KW) float  -- PyTorch ConvTranspose2d layout
    gamma, beta: (OC,)

    Returns:
      w_kernel: (KH*KW, Cin, OC) bfloat16, w_kernel[i*KW+j, ic, c] = weight[ic, c, i, j]
      gamma2:   (1, OC) float32
      beta2:    (1, OC) float32
    """
    cin, oc, kh, kw = weight.shape
    w_kernel = jnp.transpose(weight, (2, 3, 0, 1)).reshape(kh * kw, cin, oc)
    return (
        w_kernel.astype(jnp.bfloat16),
        gamma.reshape(1, oc).astype(jnp.float32),
        beta.reshape(1, oc).astype(jnp.float32),
    )


def generator_forward(z, w_kernel, gamma2, beta2, *, eps=EPS, nchw=True,
                      tile_oc=TILE_OC):
    """z: (N, Cin, 1, 1); w_kernel/gamma2/beta2 from prepare_generator_params.

    Returns (N, OC, KH, KW) float32 (PyTorch NCHW) if nchw=True, else the
    lane-dense channels-last layout (KH*KW, N, OC) with no wrapper transpose.

    tile_oc: 256 (default, grid=(2,) -> both v7x TensorCores busy) or 512
             (grid=(1,), best on single-core v5e/v6e).
    """
    n, cin = z.shape[0], z.shape[1]
    hw, cin_w, oc = w_kernel.shape
    assert cin_w == cin
    kh = kw = int(round(hw ** 0.5))
    assert kh * kw == hw

    if oc % tile_oc != 0:
        tile_oc = oc
    grid = (oc // tile_oc,)

    # Cast z once here (not per grid step in the kernel).
    z2 = z.reshape(n, cin).astype(jnp.bfloat16)

    out = pl.pallas_call(
        functools.partial(_generator_kernel, hw=hw, eps=eps),
        out_shape=jax.ShapeDtypeStruct((hw, n, oc), jnp.float32),
        grid=grid,
        in_specs=[
            pl.BlockSpec((n, cin), lambda j: (0, 0)),
            pl.BlockSpec((hw, cin, tile_oc), lambda j: (0, 0, j)),
            pl.BlockSpec((1, tile_oc), lambda j: (0, j)),
            pl.BlockSpec((1, tile_oc), lambda j: (0, j)),
        ],
        out_specs=pl.BlockSpec((hw, n, tile_oc), lambda j: (0, 0, j)),
        compiler_params=pltpu.CompilerParams(
            dimension_semantics=("parallel",),
        ),
    )(z2, w_kernel, gamma2, beta2)

    if not nchw:
        return out                                      # (HW, N, OC), lane-dense
    # (HW, N, OC) -> (KH, KW, N, OC) -> NCHW (N, OC, KH, KW) to match PyTorch.
    return jnp.transpose(out.reshape(kh, kw, n, oc), (2, 3, 0, 1))


def _reference_forward(z, weight, gamma, beta, eps=EPS):
    """Plain-JAX f32 reference mirroring the PyTorch training-mode forward."""
    n, cin = z.shape[0], z.shape[1]
    _, oc, kh, kw = weight.shape
    y = jnp.einsum("nc,cohw->nohw", z.reshape(n, cin), weight)   # conv-transpose on 1x1
    mean = jnp.mean(y, axis=(0, 2, 3), keepdims=True)
    var = jnp.mean(jnp.square(y - mean), axis=(0, 2, 3), keepdims=True)
    y_hat = (y - mean) * jax.lax.rsqrt(var + eps)
    y_hat = y_hat * gamma.reshape(1, oc, 1, 1) + beta.reshape(1, oc, 1, 1)
    return jnp.maximum(y_hat, 0.0)


if __name__ == "__main__":
    # Small, deterministic example consistent with the module / gen_z().
    batch = 8
    feature_length = 100          # gen_z default
    out_channels = OUT_CHANNELS   # fixed by the module: 512

    key = jax.random.PRNGKey(0)
    kz, kw_key = jax.random.split(key)

    # gen_z(): z ~ N(0, 1), shape (N, feature_length, 1, 1)
    z = jax.random.normal(kz, (batch, feature_length, 1, 1), dtype=jnp.float32)

    # ConvTranspose2d weight: (in_channels, out_channels, kH, kW), bias=False.
    weight = 0.02 * jax.random.normal(
        kw_key, (feature_length, out_channels, KERNEL_SIZE, KERNEL_SIZE),
        dtype=jnp.float32,
    )
    # BatchNorm2d affine params at PyTorch init: weight=1, bias=0.
    gamma = jnp.ones((out_channels,), dtype=jnp.float32)
    beta = jnp.zeros((out_channels,), dtype=jnp.float32)

    # One-time parameter preparation (transpose + bf16 cast done once, not per call).
    w_kernel, gamma2, beta2 = prepare_generator_params(weight, gamma, beta)
    w_kernel, gamma2, beta2 = jax.block_until_ready((w_kernel, gamma2, beta2))

    out = jax.block_until_ready(generator_forward(z, w_kernel, gamma2, beta2))
    ref = jax.block_until_ready(_reference_forward(z, weight, gamma, beta))

    assert out.shape == (batch, out_channels, KERNEL_SIZE, KERNEL_SIZE), out.shape
    # bf16 weights/z -> tolerance looser than a pure-f32 path (stats/accumulation in f32).
    max_err = float(jnp.max(jnp.abs(out - ref)))
    assert jnp.allclose(out, ref, atol=5e-2, rtol=5e-2), max_err

    print("KERNEL_OK")
</pallas_src>

<mosaic_0001>
module attributes {stable_mosaic.version = 11 : i64} {
  func.func @_generator_kernel(%arg0: i32, %arg1: memref<8x100xbf16, #tpu.memory_space<vmem>>, %arg2: memref<16x100x256xbf16, #tpu.memory_space<vmem>>, %arg3: memref<1x256xf32, #tpu.memory_space<vmem>>, %arg4: memref<1x256xf32, #tpu.memory_space<vmem>>, %arg5: memref<16x8x256xf32, #tpu.memory_space<vmem>>) attributes {dimension_semantics = [#tpu.dimension_semantics<parallel>], iteration_bounds = array<i64: 2>, scalar_prefetch = 0 : i64, scratch_operands = 0 : i64, tpu.core_type = #tpu.core_type<tc>, window_params = [{pipeline_mode = #tpu.pipeline_mode<synchronous>, transform_indices = @transform_0, window_bounds = array<i64: 8, 100>}, {transform_indices = @transform_1, window_bounds = array<i64: 16, 100, 256>}, {transform_indices = @transform_2, window_bounds = array<i64: 1, 256>}, {transform_indices = @transform_3, window_bounds = array<i64: 1, 256>}, {transform_indices = @transform_4, window_bounds = array<i64: 16, 8, 256>}]} {
    %c0 = arith.constant 0 : index
    %c0_0 = arith.constant 0 : index
    %0 = vector.load %arg1[%c0, %c0_0] : memref<8x100xbf16, #tpu.memory_space<vmem>>, vector<8x100xbf16>
    %cst = arith.constant 0.000000e+00 : f32
    %1 = vector.broadcast %cst : f32 to vector<1x256xf32>
    %c0_1 = arith.constant 0 : index
    %c0_2 = arith.constant 0 : index
    %c0_3 = arith.constant 0 : index
    %2 = vector.load %arg2[%c0_1, %c0_2, %c0_3] : memref<16x100x256xbf16, #tpu.memory_space<vmem>>, vector<1x100x256xbf16>
    %3 = vector.shape_cast %2 : vector<1x100x256xbf16> to vector<100x256xbf16>
    %cst_4 = arith.constant dense<0.000000e+00> : vector<8x256xf32>
    %4 = tpu.matmul %0, %3, %cst_4 {dimension_numbers = #tpu.dot_dimension_numbers<[1], [0], [0], [1], [0, 0, 1, 1], [], []>} : vector<8x100xbf16>, vector<100x256xbf16>, vector<8x256xf32> -> vector<8x256xf32>
    %c0_5 = arith.constant 0 : index
    %c0_6 = arith.constant 0 : index
    %c0_7 = arith.constant 0 : index
    %5 = vector.load %arg5[%c0_5, %c0_6, %c0_7] : memref<16x8x256xf32, #tpu.memory_space<vmem>>, vector<1x8x256xf32>
    %6 = vector.shape_cast %5 : vector<1x8x256xf32> to vector<8x256xf32>
    %7 = vector.shape_cast %4 : vector<8x256xf32> to vector<1x8x256xf32>
    tpu.vector_store %arg5[%c0_5, %c0_6, %c0_7], %7 {strides = array<i32>} : memref<16x8x256xf32, #tpu.memory_space<vmem>>, vector<1x8x256xf32>,
    %cst_8 = arith.constant dense<0.000000e+00> : vector<256xf32>
    %8 = vector.multi_reduction <add>, %4, %cst_8 [0] : vector<8x256xf32> to vector<256xf32>
    %9 = vector.shape_cast %8 : vector<256xf32> to vector<1x256xf32>
    %10 = arith.addf %1, %9 : vector<1x256xf32>
    %c1 = arith.constant 1 : index
    %c0_9 = arith.constant 0 : index
    %c0_10 = arith.constant 0 : index
    %11 = vector.load %arg2[%c1, %c0_9, %c0_10] : memref<16x100x256xbf16, #tpu.memory_space<vmem>>, vector<1x100x256xbf16>
    %12 = vector.shape_cast %11 : vector<1x100x256xbf16> to vector<100x256xbf16>
    %cst_11 = arith.constant dense<0.000000e+00> : vector<8x256xf32>
    %13 = tpu.matmul %0, %12, %cst_11 {dimension_numbers = #tpu.dot_dimension_numbers<[1], [0], [0], [1], [0, 0, 1, 1], [], []>} : vector<8x100xbf16>, vector<100x256xbf16>, vector<8x256xf32> -> vector<8x256xf32>
    %c1_12 = arith.constant 1 : index
    %c0_13 = arith.constant 0 : index
    %c0_14 = arith.constant 0 : index
    %14 = vector.load %arg5[%c1_12, %c0_13, %c0_14] : memref<16x8x256xf32, #tpu.memory_space<vmem>>, vector<1x8x256xf32>
    %15 = vector.shape_cast %14 : vector<1x8x256xf32> to vector<8x256xf32>
    %16 = vector.shape_cast %13 : vector<8x256xf32> to vector<1x8x256xf32>
    tpu.vector_store %arg5[%c1_12, %c0_13, %c0_14], %16 {strides = array<i32>} : memref<16x8x256xf32, #tpu.memory_space<vmem>>, vector<1x8x256xf32>,
    %cst_15 = arith.constant dense<0.000000e+00> : vector<256xf32>
    %17 = vector.multi_reduction <add>, %13, %cst_15 [0] : vector<8x256xf32> to vector<256xf32>
    %18 = vector.shape_cast %17 : vector<256xf32> to vector<1x256xf32>
    %19 = arith.addf %10, %18 : vector<1x256xf32>
    %c2 = arith.constant 2 : index
    %c0_16 = arith.constant 0 : index
    %c0_17 = arith.constant 0 : index
    %20 = vector.load %arg2[%c2, %c0_16, %c0_17] : memref<16x100x256xbf16, #tpu.memory_space<vmem>>, vector<1x100x256xbf16>
    %21 = vector.shape_cast %20 : vector<1x100x256xbf16> to vector<100x256xbf16>
    %cst_18 = arith.constant dense<0.000000e+00> : vector<8x256xf32>
    %22 = tpu.matmul %0, %21, %cst_18 {dimension_numbers = #tpu.dot_dimension_numbers<[1], [0], [0], [1], [0, 0, 1, 1], [], []>} : vector<8x100xbf16>, vector<100x256xbf16>, vector<8x256xf32> -> vector<8x256xf32>
    %c2_19 = arith.constant 2 : index
    %c0_20 = arith.constant 0 : index
    %c0_21 = arith.constant 0 : index
    %23 = vector.load %arg5[%c2_19, %c0_20, %c0_21] : memref<16x8x256xf32, #tpu.memory_space<vmem>>, vector<1x8x256xf32>
    %24 = vector.shape_cast %23 : vector<1x8x256xf32> to vector<8x256xf32>
    %25 = vector.shape_cast %22 : vector<8x256xf32> to vector<1x8x256xf32>
    tpu.vector_store %arg5[%c2_19, %c0_20, %c0_21], %25 {strides = array<i32>} : memref<16x8x256xf32, #tpu.memory_space<vmem>>, vector<1x8x256xf32>,
    %cst_22 = arith.constant dense<0.000000e+00> : vector<256xf32>
    %26 = vector.multi_reduction <add>, %22, %cst_22 [0] : vector<8x256xf32> to vector<256xf32>
    %27 = vector.shape_cast %26 : vector<256xf32> to vector<1x256xf32>
    %28 = arith.addf %19, %27 : vector<1x256xf32>
    %c3 = arith.constant 3 : index
    %c0_23 = arith.constant 0 : index
    %c0_24 = arith.constant 0 : index
    %29 = vector.load %arg2[%c3, %c0_23, %c0_24] : memref<16x100x256xbf16, #tpu.memory_space<vmem>>, vector<1x100x256xbf16>
    %30 = vector.shape_cast %29 : vector<1x100x256xbf16> to vector<100x256xbf16>
    %cst_25 = arith.constant dense<0.000000e+00> : vector<8x256xf32>
    %31 = tpu.matmul %0, %30, %cst_25 {dimension_numbers = #tpu.dot_dimension_numbers<[1], [0], [0], [1], [0, 0, 1, 1], [], []>} : vector<8x100xbf16>, vector<100x256xbf16>, vector<8x256xf32> -> vector<8x256xf32>
    %c3_26 = arith.constant 3 : index
    %c0_27 = arith.constant 0 : index
    %c0_28 = arith.constant 0 : index
    %32 = vector.load %arg5[%c3_26, %c0_27, %c0_28] : memref<16x8x256xf32, #tpu.memory_space<vmem>>, vector<1x8x256xf32>
    %33 = vector.shape_cast %32 : vector<1x8x256xf32> to vector<8x256xf32>
    %34 = vector.shape_cast %31 : vector<8x256xf32> to vector<1x8x256xf32>
    tpu.vector_store %arg5[%c3_26, %c0_27, %c0_28], %34 {strides = array<i32>} : memref<16x8x256xf32, #tpu.memory_space<vmem>>, vector<1x8x256xf32>,
    %cst_29 = arith.constant dense<0.000000e+00> : vector<256xf32>
    %35 = vector.multi_reduction <add>, %31, %cst_29 [0] : vector<8x256xf32> to vector<256xf32>
    %36 = vector.shape_cast %35 : vector<256xf32> to vector<1x256xf32>
    %37 = arith.addf %28, %36 : vector<1x256xf32>
    %c4 = arith.constant 4 : index
    %c0_30 = arith.constant 0 : index
    %c0_31 = arith.constant 0 : index
    %38 = vector.load %arg2[%c4, %c0_30, %c0_31] : memref<16x100x256xbf16, #tpu.memory_space<vmem>>, vector<1x100x256xbf16>
    %39 = vector.shape_cast %38 : vector<1x100x256xbf16> to vector<100x256xbf16>
    %cst_32 = arith.constant dense<0.000000e+00> : vector<8x256xf32>
    %40 = tpu.matmul %0, %39, %cst_32 {dimension_numbers = #tpu.dot_dimension_numbers<[1], [0], [0], [1], [0, 0, 1, 1], [], []>} : vector<8x100xbf16>, vector<100x256xbf16>, vector<8x256xf32> -> vector<8x256xf32>
    %c4_33 = arith.constant 4 : index
    %c0_34 = arith.constant 0 : index
    %c0_35 = arith.constant 0 : index
    %41 = vector.load %arg5[%c4_33, %c0_34, %c0_35] : memref<16x8x256xf32, #tpu.memory_space<vmem>>, vector<1x8x256xf32>
    %42 = vector.shape_cast %41 : vector<1x8x256xf32> to vector<8x256xf32>
    %43 = vector.shape_cast %40 : vector<8x256xf32> to vector<1x8x256xf32>
    tpu.vector_store %arg5[%c4_33, %c0_34, %c0_35], %43 {strides = array<i32>} : memref<16x8x256xf32, #tpu.memory_space<vmem>>, vector<1x8x256xf32>,
    %cst_36 = arith.constant dense<0.000000e+00> : vector<256xf32>
    %44 = vector.multi_reduction <add>, %40, %cst_36 [0] : vector<8x256xf32> to vector<256xf32>
    %45 = vector.shape_cast %44 : vector<256xf32> to vector<1x256xf32>
    %46 = arith.addf %37, %45 : vector<1x256xf32>
    %c5 = arith.constant 5 : index
    %c0_37 = arith.constant 0 : index
    %c0_38 = arith.constant 0 : index
    %47 = vector.load %arg2[%c5, %c0_37, %c0_38] : memref<16x100x256xbf16, #tpu.memory_space<vmem>>, vector<1x100x256xbf16>
    %48 = vector.shape_cast %47 : vector<1x100x256xbf16> to vector<100x256xbf16>
    %cst_39 = arith.constant dense<0.000000e+00> : vector<8x256xf32>
    %49 = tpu.matmul %0, %48, %cst_39 {dimension_numbers = #tpu.dot_dimension_numbers<[1], [0], [0], [1], [0, 0, 1, 1], [], []>} : vector<8x100xbf16>, vector<100x256xbf16>, vector<8x256xf32> -> vector<8x256xf32>
    %c5_40 = arith.constant 5 : index
    %c0_41 = arith.constant 0 : index
    %c0_42 = arith.constant 0 : index
    %50 = vector.load %arg5[%c5_40, %c0_41, %c0_42] : memref<16x8x256xf32, #tpu.memory_space<vmem>>, vector<1x8x256xf32>
    %51 = vector.shape_cast %50 : vector<1x8x256xf32> to vector<8x256xf32>
    %52 = vector.shape_cast %49 : vector<8x256xf32> to vector<1x8x256xf32>
    tpu.vector_store %arg5[%c5_40, %c0_41, %c0_42], %52 {strides = array<i32>} : memref<16x8x256xf32, #tpu.memory_space<vmem>>, vector<1x8x256xf32>,
    %cst_43 = arith.constant dense<0.000000e+00> : vector<256xf32>
    %53 = vector.multi_reduction <add>, %49, %cst_43 [0] : vector<8x256xf32> to vector<256xf32>
    %54 = vector.shape_cast %53 : vector<256xf32> to vector<1x256xf32>
    %55 = arith.addf %46, %54 : vector<1x256xf32>
    %c6 = arith.constant 6 : index
    %c0_44 = arith.constant 0 : index
    %c0_45 = arith.constant 0 : index
    %56 = vector.load %arg2[%c6, %c0_44, %c0_45] : memref<16x100x256xbf16, #tpu.memory_space<vmem>>, vector<1x100x256xbf16>
    %57 = vector.shape_cast %56 : vector<1x100x256xbf16> to vector<100x256xbf16>
    %cst_46 = arith.constant dense<0.000000e+00> : vector<8x256xf32>
    %58 = tpu.matmul %0, %57, %cst_46 {dimension_numbers = #tpu.dot_dimension_numbers<[1], [0], [0], [1], [0, 0, 1, 1], [], []>} : vector<8x100xbf16>, vector<100x256xbf16>, vector<8x256xf32> -> vector<8x256xf32>
    %c6_47 = arith.constant 6 : index
    %c0_48 = arith.constant 0 : index
    %c0_49 = arith.constant 0 : index
    %59 = vector.load %arg5[%c6_47, %c0_48, %c0_49] : memref<16x8x256xf32, #tpu.memory_space<vmem>>, vector<1x8x256xf32>
    %60 = vector.shape_cast %59 : vector<1x8x256xf32> to vector<8x256xf32>
    %61 = vector.shape_cast %58 : vector<8x256xf32> to vector<1x8x256xf32>
    tpu.vector_store %arg5[%c6_47, %c0_48, %c0_49], %61 {strides = array<i32>} : memref<16x8x256xf32, #tpu.memory_space<vmem>>, vector<1x8x256xf32>,
    %cst_50 = arith.constant dense<0.000000e+00> : vector<256xf32>
    %62 = vector.multi_reduction <add>, %58, %cst_50 [0] : vector<8x256xf32> to vector<256xf32>
    %63 = vector.shape_cast %62 : vector<256xf32> to vector<1x256xf32>
    %64 = arith.addf %55, %63 : vector<1x256xf32>
    %c7 = arith.constant 7 : index
    %c0_51 = arith.constant 0 : index
    %c0_52 = arith.constant 0 : index
    %65 = vector.load %arg2[%c7, %c0_51, %c0_52] : memref<16x100x256xbf16, #tpu.memory_space<vmem>>, vector<1x100x256xbf16>
    %66 = vector.shape_cast %65 : vector<1x100x256xbf16> to vector<100x256xbf16>
    %cst_53 = arith.constant dense<0.000000e+00> : vector<8x256xf32>
    %67 = tpu.matmul %0, %66, %cst_53 {dimension_numbers = #tpu.dot_dimension_numbers<[1], [0], [0], [1], [0, 0, 1, 1], [], []>} : vector<8x100xbf16>, vector<100x256xbf16>, vector<8x256xf32> -> vector<8x256xf32>
    %c7_54 = arith.constant 7 : index
    %c0_55 = arith.constant 0 : index
    %c0_56 = arith.constant 0 : index
    %68 = vector.load %arg5[%c7_54, %c0_55, %c0_56] : memref<16x8x256xf32, #tpu.memory_space<vmem>>, vector<1x8x256xf32>
    %69 = vector.shape_cast %68 : vector<1x8x256xf32> to vector<8x256xf32>
    %70 = vector.shape_cast %67 : vector<8x256xf32> to vector<1x8x256xf32>
    tpu.vector_store %arg5[%c7_54, %c0_55, %c0_56], %70 {strides = array<i32>} : memref<16x8x256xf32, #tpu.memory_space<vmem>>, vector<1x8x256xf32>,
    %cst_57 = arith.constant dense<0.000000e+00> : vector<256xf32>
    %71 = vector.multi_reduction <add>, %67, %cst_57 [0] : vector<8x256xf32> to vector<256xf32>
    %72 = vector.shape_cast %71 : vector<256xf32> to vector<1x256xf32>
    %73 = arith.addf %64, %72 : vector<1x256xf32>
    %c8 = arith.constant 8 : index
    %c0_58 = arith.constant 0 : index
    %c0_59 = arith.constant 0 : index
    %74 = vector.load %arg2[%c8, %c0_58, %c0_59] : memref<16x100x256xbf16, #tpu.memory_space<vmem>>, vector<1x100x256xbf16>
    %75 = vector.shape_cast %74 : vector<1x100x256xbf16> to vector<100x256xbf16>
    %cst_60 = arith.constant dense<0.000000e+00> : vector<8x256xf32>
    %76 = tpu.matmul %0, %75, %cst_60 {dimension_numbers = #tpu.dot_dimension_numbers<[1], [0], [0], [1], [0, 0, 1, 1], [], []>} : vector<8x100xbf16>, vector<100x256xbf16>, vector<8x256xf32> -> vector<8x256xf32>
    %c8_61 = arith.constant 8 : index
    %c0_62 = arith.constant 0 : index
    %c0_63 = arith.constant 0 : index
    %77 = vector.load %arg5[%c8_61, %c0_62, %c0_63] : memref<16x8x256xf32, #tpu.memory_space<vmem>>, vector<1x8x256xf32>
    %78 = vector.shape_cast %77 : vector<1x8x256xf32> to vector<8x256xf32>
    %79 = vector.shape_cast %76 : vector<8x256xf32> to vector<1x8x256xf32>
    tpu.vector_store %arg5[%c8_61, %c0_62, %c0_63], %79 {strides = array<i32>} : memref<16x8x256xf32, #tpu.memory_space<vmem>>, vector<1x8x256xf32>,
    %cst_64 = arith.constant dense<0.000000e+00> : vector<256xf32>
    %80 = vector.multi_reduction <add>, %76, %cst_64 [0] : vector<8x256xf32> to vector<256xf32>
    %81 = vector.shape_cast %80 : vector<256xf32> to vector<1x256xf32>
    %82 = arith.addf %73, %81 : vector<1x256xf32>
    %c9 = arith.constant 9 : index
    %c0_65 = arith.constant 0 : index
    %c0_66 = arith.constant 0 : index
    %83 = vector.load %arg2[%c9, %c0_65, %c0_66] : memref<16x100x256xbf16, #tpu.memory_space<vmem>>, vector<1x100x256xbf16>
    %84 = vector.shape_cast %83 : vector<1x100x256xbf16> to vector<100x256xbf16>
    %cst_67 = arith.constant dense<0.000000e+00> : vector<8x256xf32>
    %85 = tpu.matmul %0, %84, %cst_67 {dimension_numbers = #tpu.dot_dimension_numbers<[1], [0], [0], [1], [0, 0, 1, 1], [], []>} : vector<8x100xbf16>, vector<100x256xbf16>, vector<8x256xf32> -> vector<8x256xf32>
    %c9_68 = arith.constant 9 : index
    %c0_69 = arith.constant 0 : index
    %c0_70 = arith.constant 0 : index
    %86 = vector.load %arg5[%c9_68, %c0_69, %c0_70] : memref<16x8x256xf32, #tpu.memory_space<vmem>>, vector<1x8x256xf32>
    %87 = vector.shape_cast %86 : vector<1x8x256xf32> to vector<8x256xf32>
    %88 = vector.shape_cast %85 : vector<8x256xf32> to vector<1x8x256xf32>
    tpu.vector_store %arg5[%c9_68, %c0_69, %c0_70], %88 {strides = array<i32>} : memref<16x8x256xf32, #tpu.memory_space<vmem>>, vector<1x8x256xf32>,
    %cst_71 = arith.constant dense<0.000000e+00> : vector<256xf32>
    %89 = vector.multi_reduction <add>, %85, %cst_71 [0] : vector<8x256xf32> to vector<256xf32>
    %90 = vector.shape_cast %89 : vector<256xf32> to vector<1x256xf32>
    %91 = arith.addf %82, %90 : vector<1x256xf32>
    %c10 = arith.constant 10 : index
    %c0_72 = arith.constant 0 : index
    %c0_73 = arith.constant 0 : index
    %92 = vector.load %arg2[%c10, %c0_72, %c0_73] : memref<16x100x256xbf16, #tpu.memory_space<vmem>>, vector<1x100x256xbf16>
    %93 = vector.shape_cast %92 : vector<1x100x256xbf16> to vector<100x256xbf16>
    %cst_74 = arith.constant dense<0.000000e+00> : vector<8x256xf32>
    %94 = tpu.matmul %0, %93, %cst_74 {dimension_numbers = #tpu.dot_dimension_numbers<[1], [0], [0], [1], [0, 0, 1, 1], [], []>} : vector<8x100xbf16>, vector<100x256xbf16>, vector<8x256xf32> -> vector<8x256xf32>
    %c10_75 = arith.constant 10 : index
    %c0_76 = arith.constant 0 : index
    %c0_77 = arith.constant 0 : index
    %95 = vector.load %arg5[%c10_75, %c0_76, %c0_77] : memref<16x8x256xf32, #tpu.memory_space<vmem>>, vector<1x8x256xf32>
    %96 = vector.shape_cast %95 : vector<1x8x256xf32> to vector<8x256xf32>
    %97 = vector.shape_cast %94 : vector<8x256xf32> to vector<1x8x256xf32>
    tpu.vector_store %arg5[%c10_75, %c0_76, %c0_77], %97 {strides = array<i32>} : memref<16x8x256xf32, #tpu.memory_space<vmem>>, vector<1x8x256xf32>,
    %cst_78 = arith.constant dense<0.000000e+00> : vector<256xf32>
    %98 = vector.multi_reduction <add>, %94, %cst_78 [0] : vector<8x256xf32> to vector<256xf32>
    %99 = vector.shape_cast %98 : vector<256xf32> to vector<1x256xf32>
    %100 = arith.addf %91, %99 : vector<1x256xf32>
    %c11 = arith.constant 11 : index
    %c0_79 = arith.constant 0 : index
    %c0_80 = arith.constant 0 : index
    %101 = vector.load %arg2[%c11, %c0_79, %c0_80] : memref<16x100x256xbf16, #tpu.memory_space<vmem>>, vector<1x100x256xbf16>
    %102 = vector.shape_cast %101 : vector<1x100x256xbf16> to vector<100x256xbf16>
    %cst_81 = arith.constant dense<0.000000e+00> : vector<8x256xf32>
    %103 = tpu.matmul %0, %102, %cst_81 {dimension_numbers = #tpu.dot_dimension_numbers<[1], [0], [0], [1], [0, 0, 1, 1], [], []>} : vector<8x100xbf16>, vector<100x256xbf16>, vector<8x256xf32> -> vector<8x256xf32>
    %c11_82 = arith.constant 11 : index
    %c0_83 = arith.constant 0 : index
    %c0_84 = arith.constant 0 : index
    %104 = vector.load %arg5[%c11_82, %c0_83, %c0_84] : memref<16x8x256xf32, #tpu.memory_space<vmem>>, vector<1x8x256xf32>
    %105 = vector.shape_cast %104 : vector<1x8x256xf32> to vector<8x256xf32>
    %106 = vector.shape_cast %103 : vector<8x256xf32> to vector<1x8x256xf32>
    tpu.vector_store %arg5[%c11_82, %c0_83, %c0_84], %106 {strides = array<i32>} : memref<16x8x256xf32, #tpu.memory_space<vmem>>, vector<1x8x256xf32>,
    %cst_85 = arith.constant dense<0.000000e+00> : vector<256xf32>
    %107 = vector.multi_reduction <add>, %103, %cst_85 [0] : vector<8x256xf32> to vector<256xf32>
    %108 = vector.shape_cast %107 : vector<256xf32> to vector<1x256xf32>
    %109 = arith.addf %100, %108 : vector<1x256xf32>
    %c12 = arith.constant 12 : index
    %c0_86 = arith.constant 0 : index
    %c0_87 = arith.constant 0 : index
    %110 = vector.load %arg2[%c12, %c0_86, %c0_87] : memref<16x100x256xbf16, #tpu.memory_space<vmem>>, vector<1x100x256xbf16>
    %111 = vector.shape_cast %110 : vector<1x100x256xbf16> to vector<100x256xbf16>
    %cst_88 = arith.constant dense<0.000000e+00> : vector<8x256xf32>
    %112 = tpu.matmul %0, %111, %cst_88 {dimension_numbers = #tpu.dot_dimension_numbers<[1], [0], [0], [1], [0, 0, 1, 1], [], []>} : vector<8x100xbf16>, vector<100x256xbf16>, vector<8x256xf32> -> vector<8x256xf32>
    %c12_89 = arith.constant 12 : index
    %c0_90 = arith.constant 0 : index
    %c0_91 = arith.constant 0 : index
    %113 = vector.load %arg5[%c12_89, %c0_90, %c0_91] : memref<16x8x256xf32, #tpu.memory_space<vmem>>, vector<1x8x256xf32>
    %114 = vector.shape_cast %113 : vector<1x8x256xf32> to vector<8x256xf32>
    %115 = vector.shape_cast %112 : vector<8x256xf32> to vector<1x8x256xf32>
    tpu.vector_store %arg5[%c12_89, %c0_90, %c0_91], %115 {strides = array<i32>} : memref<16x8x256xf32, #tpu.memory_space<vmem>>, vector<1x8x256xf32>,
    %cst_92 = arith.constant dense<0.000000e+00> : vector<256xf32>
    %116 = vector.multi_reduction <add>, %112, %cst_92 [0] : vector<8x256xf32> to vector<256xf32>
    %117 = vector.shape_cast %116 : vector<256xf32> to vector<1x256xf32>
    %118 = arith.addf %109, %117 : vector<1x256xf32>
    %c13 = arith.constant 13 : index
    %c0_93 = arith.constant 0 : index
    %c0_94 = arith.constant 0 : index
    %119 = vector.load %arg2[%c13, %c0_93, %c0_94] : memref<16x100x256xbf16, #tpu.memory_space<vmem>>, vector<1x100x256xbf16>
    %120 = vector.shape_cast %119 : vector<1x100x256xbf16> to vector<100x256xbf16>
    %cst_95 = arith.constant dense<0.000000e+00> : vector<8x256xf32>
    %121 = tpu.matmul %0, %120, %cst_95 {dimension_numbers = #tpu.dot_dimension_numbers<[1], [0], [0], [1], [0, 0, 1, 1], [], []>} : vector<8x100xbf16>, vector<100x256xbf16>, vector<8x256xf32> -> vector<8x256xf32>
    %c13_96 = arith.constant 13 : index
    %c0_97 = arith.constant 0 : index
    %c0_98 = arith.constant 0 : index
    %122 = vector.load %arg5[%c13_96, %c0_97, %c0_98] : memref<16x8x256xf32, #tpu.memory_space<vmem>>, vector<1x8x256xf32>
    %123 = vector.shape_cast %122 : vector<1x8x256xf32> to vector<8x256xf32>
    %124 = vector.shape_cast %121 : vector<8x256xf32> to vector<1x8x256xf32>
    tpu.vector_store %arg5[%c13_96, %c0_97, %c0_98], %124 {strides = array<i32>} : memref<16x8x256xf32, #tpu.memory_space<vmem>>, vector<1x8x256xf32>,
    %cst_99 = arith.constant dense<0.000000e+00> : vector<256xf32>
    %125 = vector.multi_reduction <add>, %121, %cst_99 [0] : vector<8x256xf32> to vector<256xf32>
    %126 = vector.shape_cast %125 : vector<256xf32> to vector<1x256xf32>
    %127 = arith.addf %118, %126 : vector<1x256xf32>
    %c14 = arith.constant 14 : index
    %c0_100 = arith.constant 0 : index
    %c0_101 = arith.constant 0 : index
    %128 = vector.load %arg2[%c14, %c0_100, %c0_101] : memref<16x100x256xbf16, #tpu.memory_space<vmem>>, vector<1x100x256xbf16>
    %129 = vector.shape_cast %128 : vector<1x100x256xbf16> to vector<100x256xbf16>
    %cst_102 = arith.constant dense<0.000000e+00> : vector<8x256xf32>
    %130 = tpu.matmul %0, %129, %cst_102 {dimension_numbers = #tpu.dot_dimension_numbers<[1], [0], [0], [1], [0, 0, 1, 1], [], []>} : vector<8x100xbf16>, vector<100x256xbf16>, vector<8x256xf32> -> vector<8x256xf32>
    %c14_103 = arith.constant 14 : index
    %c0_104 = arith.constant 0 : index
    %c0_105 = arith.constant 0 : index
    %131 = vector.load %arg5[%c14_103, %c0_104, %c0_105] : memref<16x8x256xf32, #tpu.memory_space<vmem>>, vector<1x8x256xf32>
    %132 = vector.shape_cast %131 : vector<1x8x256xf32> to vector<8x256xf32>
    %133 = vector.shape_cast %130 : vector<8x256xf32> to vector<1x8x256xf32>
    tpu.vector_store %arg5[%c14_103, %c0_104, %c0_105], %133 {strides = array<i32>} : memref<16x8x256xf32, #tpu.memory_space<vmem>>, vector<1x8x256xf32>,
    %cst_106 = arith.constant dense<0.000000e+00> : vector<256xf32>
    %134 = vector.multi_reduction <add>, %130, %cst_106 [0] : vector<8x256xf32> to vector<256xf32>
    %135 = vector.shape_cast %134 : vector<256xf32> to vector<1x256xf32>
    %136 = arith.addf %127, %135 : vector<1x256xf32>
    %c15 = arith.constant 15 : index
    %c0_107 = arith.constant 0 : index
    %c0_108 = arith.constant 0 : index
    %137 = vector.load %arg2[%c15, %c0_107, %c0_108] : memref<16x100x256xbf16, #tpu.memory_space<vmem>>, vector<1x100x256xbf16>
    %138 = vector.shape_cast %137 : vector<1x100x256xbf16> to vector<100x256xbf16>
    %cst_109 = arith.constant dense<0.000000e+00> : vector<8x256xf32>
    %139 = tpu.matmul %0, %138, %cst_109 {dimension_numbers = #tpu.dot_dimension_numbers<[1], [0], [0], [1], [0, 0, 1, 1], [], []>} : vector<8x100xbf16>, vector<100x256xbf16>, vector<8x256xf32> -> vector<8x256xf32>
    %c15_110 = arith.constant 15 : index
    %c0_111 = arith.constant 0 : index
    %c0_112 = arith.constant 0 : index
    %140 = vector.load %arg5[%c15_110, %c0_111, %c0_112] : memref<16x8x256xf32, #tpu.memory_space<vmem>>, vector<1x8x256xf32>
    %141 = vector.shape_cast %140 : vector<1x8x256xf32> to vector<8x256xf32>
    %142 = vector.shape_cast %139 : vector<8x256xf32> to vector<1x8x256xf32>
    tpu.vector_store %arg5[%c15_110, %c0_111, %c0_112], %142 {strides = array<i32>} : memref<16x8x256xf32, #tpu.memory_space<vmem>>, vector<1x8x256xf32>,
    %cst_113 = arith.constant dense<0.000000e+00> : vector<256xf32>
    %143 = vector.multi_reduction <add>, %139, %cst_113 [0] : vector<8x256xf32> to vector<256xf32>
    %144 = vector.shape_cast %143 : vector<256xf32> to vector<1x256xf32>
    %145 = arith.addf %136, %144 : vector<1x256xf32>
    %cst_114 = arith.constant 7.812500e-03 : f32
    %146 = vector.broadcast %cst_114 : f32 to vector<1x256xf32>
    %147 = arith.mulf %145, %146 : vector<1x256xf32>
    %148 = vector.shape_cast %147 : vector<1x256xf32> to vector<1x256xf32>
    %149 = vector.broadcast %148 : vector<1x256xf32> to vector<8x256xf32>
    %cst_115 = arith.constant 0.000000e+00 : f32
    %150 = vector.broadcast %cst_115 : f32 to vector<1x256xf32>
    %c0_116 = arith.constant 0 : index
    %c0_117 = arith.constant 0 : index
    %c0_118 = arith.constant 0 : index
    %151 = vector.load %arg5[%c0_116, %c0_117, %c0_118] : memref<16x8x256xf32, #tpu.memory_space<vmem>>, vector<1x8x256xf32>
    %152 = vector.shape_cast %151 : vector<1x8x256xf32> to vector<8x256xf32>
    %153 = arith.subf %152, %149 : vector<8x256xf32>
    %154 = arith.mulf %153, %153 : vector<8x256xf32>
    %cst_119 = arith.constant dense<0.000000e+00> : vector<256xf32>
    %155 = vector.multi_reduction <add>, %154, %cst_119 [0] : vector<8x256xf32> to vector<256xf32>
    %156 = vector.shape_cast %155 : vector<256xf32> to vector<1x256xf32>
    %157 = arith.addf %150, %156 : vector<1x256xf32>
    %c1_120 = arith.constant 1 : index
    %c0_121 = arith.constant 0 : index
    %c0_122 = arith.constant 0 : index
    %158 = vector.load %arg5[%c1_120, %c0_121, %c0_122] : memref<16x8x256xf32, #tpu.memory_space<vmem>>, vector<1x8x256xf32>
    %159 = vector.shape_cast %158 : vector<1x8x256xf32> to vector<8x256xf32>
    %160 = arith.subf %159, %149 : vector<8x256xf32>
    %161 = arith.mulf %160, %160 : vector<8x256xf32>
    %cst_123 = arith.constant dense<0.000000e+00> : vector<256xf32>
    %162 = vector.multi_reduction <add>, %161, %cst_123 [0] : vector<8x256xf32> to vector<256xf32>
    %163 = vector.shape_cast %162 : vector<256xf32> to vector<1x256xf32>
    %164 = arith.addf %157, %163 : vector<1x256xf32>
    %c2_124 = arith.constant 2 : index
    %c0_125 = arith.constant 0 : index
    %c0_126 = arith.constant 0 : index
    %165 = vector.load %arg5[%c2_124, %c0_125, %c0_126] : memref<16x8x256xf32, #tpu.memory_space<vmem>>, vector<1x8x256xf32>
    %166 = vector.shape_cast %165 : vector<1x8x256xf32> to vector<8x256xf32>
    %167 = arith.subf %166, %149 : vector<8x256xf32>
    %168 = arith.mulf %167, %167 : vector<8x256xf32>
    %cst_127 = arith.constant dense<0.000000e+00> : vector<256xf32>
    %169 = vector.multi_reduction <add>, %168, %cst_127 [0] : vector<8x256xf32> to vector<256xf32>
    %170 = vector.shape_cast %169 : vector<256xf32> to vector<1x256xf32>
    %171 = arith.addf %164, %170 : vector<1x256xf32>
    %c3_128 = arith.constant 3 : index
    %c0_129 = arith.constant 0 : index
    %c0_130 = arith.constant 0 : index
    %172 = vector.load %arg5[%c3_128, %c0_129, %c0_130] : memref<16x8x256xf32, #tpu.memory_space<vmem>>, vector<1x8x256xf32>
    %173 = vector.shape_cast %172 : vector<1x8x256xf32> to vector<8x256xf32>
    %174 = arith.subf %173, %149 : vector<8x256xf32>
    %175 = arith.mulf %174, %174 : vector<8x256xf32>
    %cst_131 = arith.constant dense<0.000000e+00> : vector<256xf32>
    %176 = vector.multi_reduction <add>, %175, %cst_131 [0] : vector<8x256xf32> to vector<256xf32>
    %177 = vector.shape_cast %176 : vector<256xf32> to vector<1x256xf32>
    %178 = arith.addf %171, %177 : vector<1x256xf32>
    %c4_132 = arith.constant 4 : index
    %c0_133 = arith.constant 0 : index
    %c0_134 = arith.constant 0 : index
    %179 = vector.load %arg5[%c4_132, %c0_133, %c0_134] : memref<16x8x256xf32, #tpu.memory_space<vmem>>, vector<1x8x256xf32>
    %180 = vector.shape_cast %179 : vector<1x8x256xf32> to vector<8x256xf32>
    %181 = arith.subf %180, %149 : vector<8x256xf32>
    %182 = arith.mulf %181, %181 : vector<8x256xf32>
    %cst_135 = arith.constant dense<0.000000e+00> : vector<256xf32>
    %183 = vector.multi_reduction <add>, %182, %cst_135 [0] : vector<8x256xf32> to vector<256xf32>
    %184 = vector.shape_cast %183 : vector<256xf32> to vector<1x256xf32>
    %185 = arith.addf %178, %184 : vector<1x256xf32>
    %c5_136 = arith.constant 5 : index
    %c0_137 = arith.constant 0 : index
    %c0_138 = arith.constant 0 : index
    %186 = vector.load %arg5[%c5_136, %c0_137, %c0_138] : memref<16x8x256xf32, #tpu.memory_space<vmem>>, vector<1x8x256xf32>
    %187 = vector.shape_cast %186 : vector<1x8x256xf32> to vector<8x256xf32>
    %188 = arith.subf %187, %149 : vector<8x256xf32>
    %189 = arith.mulf %188, %188 : vector<8x256xf32>
    %cst_139 = arith.constant dense<0.000000e+00> : vector<256xf32>
    %190 = vector.multi_reduction <add>, %189, %cst_139 [0] : vector<8x256xf32> to vector<256xf32>
    %191 = vector.shape_cast %190 : vector<256xf32> to vector<1x256xf32>
    %192 = arith.addf %185, %191 : vector<1x256xf32>
    %c6_140 = arith.constant 6 : index
    %c0_141 = arith.constant 0 : index
    %c0_142 = arith.constant 0 : index
    %193 = vector.load %arg5[%c6_140, %c0_141, %c0_142] : memref<16x8x256xf32, #tpu.memory_space<vmem>>, vector<1x8x256xf32>
    %194 = vector.shape_cast %193 : vector<1x8x256xf32> to vector<8x256xf32>
    %195 = arith.subf %194, %149 : vector<8x256xf32>
    %196 = arith.mulf %195, %195 : vector<8x256xf32>
    %cst_143 = arith.constant dense<0.000000e+00> : vector<256xf32>
    %197 = vector.multi_reduction <add>, %196, %cst_143 [0] : vector<8x256xf32> to vector<256xf32>
    %198 = vector.shape_cast %197 : vector<256xf32> to vector<1x256xf32>
    %199 = arith.addf %192, %198 : vector<1x256xf32>
    %c7_144 = arith.constant 7 : index
    %c0_145 = arith.constant 0 : index
    %c0_146 = arith.constant 0 : index
    %200 = vector.load %arg5[%c7_144, %c0_145, %c0_146] : memref<16x8x256xf32, #tpu.memory_space<vmem>>, vector<1x8x256xf32>
    %201 = vector.shape_cast %200 : vector<1x8x256xf32> to vector<8x256xf32>
    %202 = arith.subf %201, %149 : vector<8x256xf32>
    %203 = arith.mulf %202, %202 : vector<8x256xf32>
    %cst_147 = arith.constant dense<0.000000e+00> : vector<256xf32>
    %204 = vector.multi_reduction <add>, %203, %cst_147 [0] : vector<8x256xf32> to vector<256xf32>
    %205 = vector.shape_cast %204 : vector<256xf32> to vector<1x256xf32>
    %206 = arith.addf %199, %205 : vector<1x256xf32>
    %c8_148 = arith.constant 8 : index
    %c0_149 = arith.constant 0 : index
    %c0_150 = arith.constant 0 : index
    %207 = vector.load %arg5[%c8_148, %c0_149, %c0_150] : memref<16x8x256xf32, #tpu.memory_space<vmem>>, vector<1x8x256xf32>
    %208 = vector.shape_cast %207 : vector<1x8x256xf32> to vector<8x256xf32>
    %209 = arith.subf %208, %149 : vector<8x256xf32>
    %210 = arith.mulf %209, %209 : vector<8x256xf32>
    %cst_151 = arith.constant dense<0.000000e+00> : vector<256xf32>
    %211 = vector.multi_reduction <add>, %210, %cst_151 [0] : vector<8x256xf32> to vector<256xf32>
    %212 = vector.shape_cast %211 : vector<256xf32> to vector<1x256xf32>
    %213 = arith.addf %206, %212 : vector<1x256xf32>
    %c9_152 = arith.constant 9 : index
    %c0_153 = arith.constant 0 : index
    %c0_154 = arith.constant 0 : index
    %214 = vector.load %arg5[%c9_152, %c0_153, %c0_154] : memref<16x8x256xf32, #tpu.memory_space<vmem>>, vector<1x8x256xf32>
    %215 = vector.shape_cast %214 : vector<1x8x256xf32> to vector<8x256xf32>
    %216 = arith.subf %215, %149 : vector<8x256xf32>
    %217 = arith.mulf %216, %216 : vector<8x256xf32>
    %cst_155 = arith.constant dense<0.000000e+00> : vector<256xf32>
    %218 = vector.multi_reduction <add>, %217, %cst_155 [0] : vector<8x256xf32> to vector<256xf32>
    %219 = vector.shape_cast %218 : vector<256xf32> to vector<1x256xf32>
    %220 = arith.addf %213, %219 : vector<1x256xf32>
    %c10_156 = arith.constant 10 : index
    %c0_157 = arith.constant 0 : index
    %c0_158 = arith.constant 0 : index
    %221 = vector.load %arg5[%c10_156, %c0_157, %c0_158] : memref<16x8x256xf32, #tpu.memory_space<vmem>>, vector<1x8x256xf32>
    %222 = vector.shape_cast %221 : vector<1x8x256xf32> to vector<8x256xf32>
    %223 = arith.subf %222, %149 : vector<8x256xf32>
    %224 = arith.mulf %223, %223 : vector<8x256xf32>
    %cst_159 = arith.constant dense<0.000000e+00> : vector<256xf32>
    %225 = vector.multi_reduction <add>, %224, %cst_159 [0] : vector<8x256xf32> to vector<256xf32>
    %226 = vector.shape_cast %225 : vector<256xf32> to vector<1x256xf32>
    %227 = arith.addf %220, %226 : vector<1x256xf32>
    %c11_160 = arith.constant 11 : index
    %c0_161 = arith.constant 0 : index
    %c0_162 = arith.constant 0 : index
    %228 = vector.load %arg5[%c11_160, %c0_161, %c0_162] : memref<16x8x256xf32, #tpu.memory_space<vmem>>, vector<1x8x256xf32>
    %229 = vector.shape_cast %228 : vector<1x8x256xf32> to vector<8x256xf32>
    %230 = arith.subf %229, %149 : vector<8x256xf32>
    %231 = arith.mulf %230, %230 : vector<8x256xf32>
    %cst_163 = arith.constant dense<0.000000e+00> : vector<256xf32>
    %232 = vector.multi_reduction <add>, %231, %cst_163 [0] : vector<8x256xf32> to vector<256xf32>
    %233 = vector.shape_cast %232 : vector<256xf32> to vector<1x256xf32>
    %234 = arith.addf %227, %233 : vector<1x256xf32>
    %c12_164 = arith.constant 12 : index
    %c0_165 = arith.constant 0 : index
    %c0_166 = arith.constant 0 : index
    %235 = vector.load %arg5[%c12_164, %c0_165, %c0_166] : memref<16x8x256xf32, #tpu.memory_space<vmem>>, vector<1x8x256xf32>
    %236 = vector.shape_cast %235 : vector<1x8x256xf32> to vector<8x256xf32>
    %237 = arith.subf %236, %149 : vector<8x256xf32>
    %238 = arith.mulf %237, %237 : vector<8x256xf32>
    %cst_167 = arith.constant dense<0.000000e+00> : vector<256xf32>
    %239 = vector.multi_reduction <add>, %238, %cst_167 [0] : vector<8x256xf32> to vector<256xf32>
    %240 = vector.shape_cast %239 : vector<256xf32> to vector<1x256xf32>
    %241 = arith.addf %234, %240 : vector<1x256xf32>
    %c13_168 = arith.constant 13 : index
    %c0_169 = arith.constant 0 : index
    %c0_170 = arith.constant 0 : index
    %242 = vector.load %arg5[%c13_168, %c0_169, %c0_170] : memref<16x8x256xf32, #tpu.memory_space<vmem>>, vector<1x8x256xf32>
    %243 = vector.shape_cast %242 : vector<1x8x256xf32> to vector<8x256xf32>
    %244 = arith.subf %243, %149 : vector<8x256xf32>
    %245 = arith.mulf %244, %244 : vector<8x256xf32>
    %cst_171 = arith.constant dense<0.000000e+00> : vector<256xf32>
    %246 = vector.multi_reduction <add>, %245, %cst_171 [0] : vector<8x256xf32> to vector<256xf32>
    %247 = vector.shape_cast %246 : vector<256xf32> to vector<1x256xf32>
    %248 = arith.addf %241, %247 : vector<1x256xf32>
    %c14_172 = arith.constant 14 : index
    %c0_173 = arith.constant 0 : index
    %c0_174 = arith.constant 0 : index
    %249 = vector.load %arg5[%c14_172, %c0_173, %c0_174] : memref<16x8x256xf32, #tpu.memory_space<vmem>>, vector<1x8x256xf32>
    %250 = vector.shape_cast %249 : vector<1x8x256xf32> to vector<8x256xf32>
    %251 = arith.subf %250, %149 : vector<8x256xf32>
    %252 = arith.mulf %251, %251 : vector<8x256xf32>
    %cst_175 = arith.constant dense<0.000000e+00> : vector<256xf32>
    %253 = vector.multi_reduction <add>, %252, %cst_175 [0] : vector<8x256xf32> to vector<256xf32>
    %254 = vector.shape_cast %253 : vector<256xf32> to vector<1x256xf32>
    %255 = arith.addf %248, %254 : vector<1x256xf32>
    %c15_176 = arith.constant 15 : index
    %c0_177 = arith.constant 0 : index
    %c0_178 = arith.constant 0 : index
    %256 = vector.load %arg5[%c15_176, %c0_177, %c0_178] : memref<16x8x256xf32, #tpu.memory_space<vmem>>, vector<1x8x256xf32>
    %257 = vector.shape_cast %256 : vector<1x8x256xf32> to vector<8x256xf32>
    %258 = arith.subf %257, %149 : vector<8x256xf32>
    %259 = arith.mulf %258, %258 : vector<8x256xf32>
    %cst_179 = arith.constant dense<0.000000e+00> : vector<256xf32>
    %260 = vector.multi_reduction <add>, %259, %cst_179 [0] : vector<8x256xf32> to vector<256xf32>
    %261 = vector.shape_cast %260 : vector<256xf32> to vector<1x256xf32>
    %262 = arith.addf %255, %261 : vector<1x256xf32>
    %cst_180 = arith.constant 7.812500e-03 : f32
    %263 = vector.broadcast %cst_180 : f32 to vector<1x256xf32>
    %264 = arith.mulf %262, %263 : vector<1x256xf32>
    %c0_181 = arith.constant 0 : index
    %c0_182 = arith.constant 0 : index
    %265 = vector.load %arg3[%c0_181, %c0_182] : memref<1x256xf32, #tpu.memory_space<vmem>>, vector<1x256xf32>
    %cst_183 = arith.constant 9.99999974E-6 : f32
    %266 = vector.broadcast %cst_183 : f32 to vector<1x256xf32>
    %267 = arith.addf %264, %266 : vector<1x256xf32>
    %268 = math.rsqrt %267 : vector<1x256xf32>
    %269 = arith.mulf %265, %268 : vector<1x256xf32>
    %c0_184 = arith.constant 0 : index
    %c0_185 = arith.constant 0 : index
    %270 = vector.load %arg4[%c0_184, %c0_185] : memref<1x256xf32, #tpu.memory_space<vmem>>, vector<1x256xf32>
    %271 = arith.mulf %147, %269 : vector<1x256xf32>
    %272 = arith.subf %270, %271 : vector<1x256xf32>
    %273 = vector.shape_cast %269 : vector<1x256xf32> to vector<1x256xf32>
    %274 = vector.broadcast %273 : vector<1x256xf32> to vector<8x256xf32>
    %275 = vector.shape_cast %272 : vector<1x256xf32> to vector<1x256xf32>
    %276 = vector.broadcast %275 : vector<1x256xf32> to vector<8x256xf32>
    %c0_186 = arith.constant 0 : index
    %c0_187 = arith.constant 0 : index
    %c0_188 = arith.constant 0 : index
    %277 = vector.load %arg5[%c0_186, %c0_187, %c0_188] : memref<16x8x256xf32, #tpu.memory_space<vmem>>, vector<1x8x256xf32>
    %278 = vector.shape_cast %277 : vector<1x8x256xf32> to vector<8x256xf32>
    %279 = arith.mulf %278, %274 : vector<8x256xf32>
    %280 = arith.addf %279, %276 : vector<8x256xf32>
    %cst_189 = arith.constant 0.000000e+00 : f32
    %281 = vector.broadcast %cst_189 : f32 to vector<8x256xf32>
    %282 = arith.maximumf %280, %281 : vector<8x256xf32>
    %c0_190 = arith.constant 0 : index
    %c0_191 = arith.constant 0 : index
    %c0_192 = arith.constant 0 : index
    %283 = vector.load %arg5[%c0_190, %c0_191, %c0_192] : memref<16x8x256xf32, #tpu.memory_space<vmem>>, vector<1x8x256xf32>
    %284 = vector.shape_cast %283 : vector<1x8x256xf32> to vector<8x256xf32>
    %285 = vector.shape_cast %282 : vector<8x256xf32> to vector<1x8x256xf32>
    tpu.vector_store %arg5[%c0_190, %c0_191, %c0_192], %285 {strides = array<i32>} : memref<16x8x256xf32, #tpu.memory_space<vmem>>, vector<1x8x256xf32>,
    %c1_193 = arith.constant 1 : index
    %c0_194 = arith.constant 0 : index
    %c0_195 = arith.constant 0 : index
    %286 = vector.load %arg5[%c1_193, %c0_194, %c0_195] : memref<16x8x256xf32, #tpu.memory_space<vmem>>, vector<1x8x256xf32>
    %287 = vector.shape_cast %286 : vector<1x8x256xf32> to vector<8x256xf32>
    %288 = arith.mulf %287, %274 : vector<8x256xf32>
    %289 = arith.addf %288, %276 : vector<8x256xf32>
    %cst_196 = arith.constant 0.000000e+00 : f32
    %290 = vector.broadcast %cst_196 : f32 to vector<8x256xf32>
    %291 = arith.maximumf %289, %290 : vector<8x256xf32>
    %c1_197 = arith.constant 1 : index
    %c0_198 = arith.constant 0 : index
    %c0_199 = arith.constant 0 : index
    %292 = vector.load %arg5[%c1_197, %c0_198, %c0_199] : memref<16x8x256xf32, #tpu.memory_space<vmem>>, vector<1x8x256xf32>
    %293 = vector.shape_cast %292 : vector<1x8x256xf32> to vector<8x256xf32>
    %294 = vector.shape_cast %291 : vector<8x256xf32> to vector<1x8x256xf32>
    tpu.vector_store %arg5[%c1_197, %c0_198, %c0_199], %294 {strides = array<i32>} : memref<16x8x256xf32, #tpu.memory_space<vmem>>, vector<1x8x256xf32>,
    %c2_200 = arith.constant 2 : index
    %c0_201 = arith.constant 0 : index
    %c0_202 = arith.constant 0 : index
    %295 = vector.load %arg5[%c2_200, %c0_201, %c0_202] : memref<16x8x256xf32, #tpu.memory_space<vmem>>, vector<1x8x256xf32>
    %296 = vector.shape_cast %295 : vector<1x8x256xf32> to vector<8x256xf32>
    %297 = arith.mulf %296, %274 : vector<8x256xf32>
    %298 = arith.addf %297, %276 : vector<8x256xf32>
    %cst_203 = arith.constant 0.000000e+00 : f32
    %299 = vector.broadcast %cst_203 : f32 to vector<8x256xf32>
    %300 = arith.maximumf %298, %299 : vector<8x256xf32>
    %c2_204 = arith.constant 2 : index
    %c0_205 = arith.constant 0 : index
    %c0_206 = arith.constant 0 : index
    %301 = vector.load %arg5[%c2_204, %c0_205, %c0_206] : memref<16x8x256xf32, #tpu.memory_space<vmem>>, vector<1x8x256xf32>
    %302 = vector.shape_cast %301 : vector<1x8x256xf32> to vector<8x256xf32>
    %303 = vector.shape_cast %300 : vector<8x256xf32> to vector<1x8x256xf32>
    tpu.vector_store %arg5[%c2_204, %c0_205, %c0_206], %303 {strides = array<i32>} : memref<16x8x256xf32, #tpu.memory_space<vmem>>, vector<1x8x256xf32>,
    %c3_207 = arith.constant 3 : index
    %c0_208 = arith.constant 0 : index
    %c0_209 = arith.constant 0 : index
    %304 = vector.load %arg5[%c3_207, %c0_208, %c0_209] : memref<16x8x256xf32, #tpu.memory_space<vmem>>, vector<1x8x256xf32>
    %305 = vector.shape_cast %304 : vector<1x8x256xf32> to vector<8x256xf32>
    %306 = arith.mulf %305, %274 : vector<8x256xf32>
    %307 = arith.addf %306, %276 : vector<8x256xf32>
    %cst_210 = arith.constant 0.000000e+00 : f32
    %308 = vector.broadcast %cst_210 : f32 to vector<8x256xf32>
    %309 = arith.maximumf %307, %308 : vector<8x256xf32>
    %c3_211 = arith.constant 3 : index
    %c0_212 = arith.constant 0 : index
    %c0_213 = arith.constant 0 : index
    %310 = vector.load %arg5[%c3_211, %c0_212, %c0_213] : memref<16x8x256xf32, #tpu.memory_space<vmem>>, vector<1x8x256xf32>
    %311 = vector.shape_cast %310 : vector<1x8x256xf32> to vector<8x256xf32>
    %312 = vector.shape_cast %309 : vector<8x256xf32> to vector<1x8x256xf32>
    tpu.vector_store %arg5[%c3_211, %c0_212, %c0_213], %312 {strides = array<i32>} : memref<16x8x256xf32, #tpu.memory_space<vmem>>, vector<1x8x256xf32>,
    %c4_214 = arith.constant 4 : index
    %c0_215 = arith.constant 0 : index
    %c0_216 = arith.constant 0 : index
    %313 = vector.load %arg5[%c4_214, %c0_215, %c0_216] : memref<16x8x256xf32, #tpu.memory_space<vmem>>, vector<1x8x256xf32>
    %314 = vector.shape_cast %313 : vector<1x8x256xf32> to vector<8x256xf32>
    %315 = arith.mulf %314, %274 : vector<8x256xf32>
    %316 = arith.addf %315, %276 : vector<8x256xf32>
    %cst_217 = arith.constant 0.000000e+00 : f32
    %317 = vector.broadcast %cst_217 : f32 to vector<8x256xf32>
    %318 = arith.maximumf %316, %317 : vector<8x256xf32>
    %c4_218 = arith.constant 4 : index
    %c0_219 = arith.constant 0 : index
    %c0_220 = arith.constant 0 : index
    %319 = vector.load %arg5[%c4_218, %c0_219, %c0_220] : memref<16x8x256xf32, #tpu.memory_space<vmem>>, vector<1x8x256xf32>
    %320 = vector.shape_cast %319 : vector<1x8x256xf32> to vector<8x256xf32>
    %321 = vector.shape_cast %318 : vector<8x256xf32> to vector<1x8x256xf32>
    tpu.vector_store %arg5[%c4_218, %c0_219, %c0_220], %321 {strides = array<i32>} : memref<16x8x256xf32, #tpu.memory_space<vmem>>, vector<1x8x256xf32>,
    %c5_221 = arith.constant 5 : index
    %c0_222 = arith.constant 0 : index
    %c0_223 = arith.constant 0 : index
    %322 = vector.load %arg5[%c5_221, %c0_222, %c0_223] : memref<16x8x256xf32, #tpu.memory_space<vmem>>, vector<1x8x256xf32>
    %323 = vector.shape_cast %322 : vector<1x8x256xf32> to vector<8x256xf32>
    %324 = arith.mulf %323, %274 : vector<8x256xf32>
    %325 = arith.addf %324, %276 : vector<8x256xf32>
    %cst_224 = arith.constant 0.000000e+00 : f32
    %326 = vector.broadcast %cst_224 : f32 to vector<8x256xf32>
    %327 = arith.maximumf %325, %326 : vector<8x256xf32>
    %c5_225 = arith.constant 5 : index
    %c0_226 = arith.constant 0 : index
    %c0_227 = arith.constant 0 : index
    %328 = vector.load %arg5[%c5_225, %c0_226, %c0_227] : memref<16x8x256xf32, #tpu.memory_space<vmem>>, vector<1x8x256xf32>
    %329 = vector.shape_cast %328 : vector<1x8x256xf32> to vector<8x256xf32>
    %330 = vector.shape_cast %327 : vector<8x256xf32> to vector<1x8x256xf32>
    tpu.vector_store %arg5[%c5_225, %c0_226, %c0_227], %330 {strides = array<i32>} : memref<16x8x256xf32, #tpu.memory_space<vmem>>, vector<1x8x256xf32>,
    %c6_228 = arith.constant 6 : index
    %c0_229 = arith.constant 0 : index
    %c0_230 = arith.constant 0 : index
    %331 = vector.load %arg5[%c6_228, %c0_229, %c0_230] : memref<16x8x256xf32, #tpu.memory_space<vmem>>, vector<1x8x256xf32>
    %332 = vector.shape_cast %331 : vector<1x8x256xf32> to vector<8x256xf32>
    %333 = arith.mulf %332, %274 : vector<8x256xf32>
    %334 = arith.addf %333, %276 : vector<8x256xf32>
    %cst_231 = arith.constant 0.000000e+00 : f32
    %335 = vector.broadcast %cst_231 : f32 to vector<8x256xf32>
    %336 = arith.maximumf %334, %335 : vector<8x256xf32>
    %c6_232 = arith.constant 6 : index
    %c0_233 = arith.constant 0 : index
    %c0_234 = arith.constant 0 : index
    %337 = vector.load %arg5[%c6_232, %c0_233, %c0_234] : memref<16x8x256xf32, #tpu.memory_space<vmem>>, vector<1x8x256xf32>
    %338 = vector.shape_cast %337 : vector<1x8x256xf32> to vector<8x256xf32>
    %339 = vector.shape_cast %336 : vector<8x256xf32> to vector<1x8x256xf32>
    tpu.vector_store %arg5[%c6_232, %c0_233, %c0_234], %339 {strides = array<i32>} : memref<16x8x256xf32, #tpu.memory_space<vmem>>, vector<1x8x256xf32>,
    %c7_235 = arith.constant 7 : index
    %c0_236 = arith.constant 0 : index
    %c0_237 = arith.constant 0 : index
    %340 = vector.load %arg5[%c7_235, %c0_236, %c0_237] : memref<16x8x256xf32, #tpu.memory_space<vmem>>, vector<1x8x256xf32>
    %341 = vector.shape_cast %340 : vector<1x8x256xf32> to vector<8x256xf32>
    %342 = arith.mulf %341, %274 : vector<8x256xf32>
    %343 = arith.addf %342, %276 : vector<8x256xf32>
    %cst_238 = arith.constant 0.000000e+00 : f32
    %344 = vector.broadcast %cst_238 : f32 to vector<8x256xf32>
    %345 = arith.maximumf %343, %344 : vector<8x256xf32>
    %c7_239 = arith.constant 7 : index
    %c0_240 = arith.constant 0 : index
    %c0_241 = arith.constant 0 : index
    %346 = vector.load %arg5[%c7_239, %c0_240, %c0_241] : memref<16x8x256xf32, #tpu.memory_space<vmem>>, vector<1x8x256xf32>
    %347 = vector.shape_cast %346 : vector<1x8x256xf32> to vector<8x256xf32>
    %348 = vector.shape_cast %345 : vector<8x256xf32> to vector<1x8x256xf32>
    tpu.vector_store %arg5[%c7_239, %c0_240, %c0_241], %348 {strides = array<i32>} : memref<16x8x256xf32, #tpu.memory_space<vmem>>, vector<1x8x256xf32>,
    %c8_242 = arith.constant 8 : index
    %c0_243 = arith.constant 0 : index
    %c0_244 = arith.constant 0 : index
    %349 = vector.load %arg5[%c8_242, %c0_243, %c0_244] : memref<16x8x256xf32, #tpu.memory_space<vmem>>, vector<1x8x256xf32>
    %350 = vector.shape_cast %349 : vector<1x8x256xf32> to vector<8x256xf32>
    %351 = arith.mulf %350, %274 : vector<8x256xf32>
    %352 = arith.addf %351, %276 : vector<8x256xf32>
    %cst_245 = arith.constant 0.000000e+00 : f32
    %353 = vector.broadcast %cst_245 : f32 to vector<8x256xf32>
    %354 = arith.maximumf %352, %353 : vector<8x256xf32>
    %c8_246 = arith.constant 8 : index
    %c0_247 = arith.constant 0 : index
    %c0_248 = arith.constant 0 : index
    %355 = vector.load %arg5[%c8_246, %c0_247, %c0_248] : memref<16x8x256xf32, #tpu.memory_space<vmem>>, vector<1x8x256xf32>
    %356 = vector.shape_cast %355 : vector<1x8x256xf32> to vector<8x256xf32>
    %357 = vector.shape_cast %354 : vector<8x256xf32> to vector<1x8x256xf32>
    tpu.vector_store %arg5[%c8_246, %c0_247, %c0_248], %357 {strides = array<i32>} : memref<16x8x256xf32, #tpu.memory_space<vmem>>, vector<1x8x256xf32>,
    %c9_249 = arith.constant 9 : index
    %c0_250 = arith.constant 0 : index
    %c0_251 = arith.constant 0 : index
    %358 = vector.load %arg5[%c9_249, %c0_250, %c0_251] : memref<16x8x256xf32, #tpu.memory_space<vmem>>, vector<1x8x256xf32>
    %359 = vector.shape_cast %358 : vector<1x8x256xf32> to vector<8x256xf32>
    %360 = arith.mulf %359, %274 : vector<8x256xf32>
    %361 = arith.addf %360, %276 : vector<8x256xf32>
    %cst_252 = arith.constant 0.000000e+00 : f32
    %362 = vector.broadcast %cst_252 : f32 to vector<8x256xf32>
    %363 = arith.maximumf %361, %362 : vector<8x256xf32>
    %c9_253 = arith.constant 9 : index
    %c0_254 = arith.constant 0 : index
    %c0_255 = arith.constant 0 : index
    %364 = vector.load %arg5[%c9_253, %c0_254, %c0_255] : memref<16x8x256xf32, #tpu.memory_space<vmem>>, vector<1x8x256xf32>
    %365 = vector.shape_cast %364 : vector<1x8x256xf32> to vector<8x256xf32>
    %366 = vector.shape_cast %363 : vector<8x256xf32> to vector<1x8x256xf32>
    tpu.vector_store %arg5[%c9_253, %c0_254, %c0_255], %366 {strides = array<i32>} : memref<16x8x256xf32, #tpu.memory_space<vmem>>, vector<1x8x256xf32>,
    %c10_256 = arith.constant 10 : index
    %c0_257 = arith.constant 0 : index
    %c0_258 = arith.constant 0 : index
    %367 = vector.load %arg5[%c10_256, %c0_257, %c0_258] : memref<16x8x256xf32, #tpu.memory_space<vmem>>, vector<1x8x256xf32>
    %368 = vector.shape_cast %367 : vector<1x8x256xf32> to vector<8x256xf32>
    %369 = arith.mulf %368, %274 : vector<8x256xf32>
    %370 = arith.addf %369, %276 : vector<8x256xf32>
    %cst_259 = arith.constant 0.000000e+00 : f32
    %371 = vector.broadcast %cst_259 : f32 to vector<8x256xf32>
    %372 = arith.maximumf %370, %371 : vector<8x256xf32>
    %c10_260 = arith.constant 10 : index
    %c0_261 = arith.constant 0 : index
    %c0_262 = arith.constant 0 : index
    %373 = vector.load %arg5[%c10_260, %c0_261, %c0_262] : memref<16x8x256xf32, #tpu.memory_space<vmem>>, vector<1x8x256xf32>
    %374 = vector.shape_cast %373 : vector<1x8x256xf32> to vector<8x256xf32>
    %375 = vector.shape_cast %372 : vector<8x256xf32> to vector<1x8x256xf32>
    tpu.vector_store %arg5[%c10_260, %c0_261, %c0_262], %375 {strides = array<i32>} : memref<16x8x256xf32, #tpu.memory_space<vmem>>, vector<1x8x256xf32>,
    %c11_263 = arith.constant 11 : index
    %c0_264 = arith.constant 0 : index
    %c0_265 = arith.constant 0 : index
    %376 = vector.load %arg5[%c11_263, %c0_264, %c0_265] : memref<16x8x256xf32, #tpu.memory_space<vmem>>, vector<1x8x256xf32>
    %377 = vector.shape_cast %376 : vector<1x8x256xf32> to vector<8x256xf32>
    %378 = arith.mulf %377, %274 : vector<8x256xf32>
    %379 = arith.addf %378, %276 : vector<8x256xf32>
    %cst_266 = arith.constant 0.000000e+00 : f32
    %380 = vector.broadcast %cst_266 : f32 to vector<8x256xf32>
    %381 = arith.maximumf %379, %380 : vector<8x256xf32>
    %c11_267 = arith.constant 11 : index
    %c0_268 = arith.constant 0 : index
    %c0_269 = arith.constant 0 : index
    %382 = vector.load %arg5[%c11_267, %c0_268, %c0_269] : memref<16x8x256xf32, #tpu.memory_space<vmem>>, vector<1x8x256xf32>
    %383 = vector.shape_cast %382 : vector<1x8x256xf32> to vector<8x256xf32>
    %384 = vector.shape_cast %381 : vector<8x256xf32> to vector<1x8x256xf32>
    tpu.vector_store %arg5[%c11_267, %c0_268, %c0_269], %384 {strides = array<i32>} : memref<16x8x256xf32, #tpu.memory_space<vmem>>, vector<1x8x256xf32>,
    %c12_270 = arith.constant 12 : index
    %c0_271 = arith.constant 0 : index
    %c0_272 = arith.constant 0 : index
    %385 = vector.load %arg5[%c12_270, %c0_271, %c0_272] : memref<16x8x256xf32, #tpu.memory_space<vmem>>, vector<1x8x256xf32>
    %386 = vector.shape_cast %385 : vector<1x8x256xf32> to vector<8x256xf32>
    %387 = arith.mulf %386, %274 : vector<8x256xf32>
    %388 = arith.addf %387, %276 : vector<8x256xf32>
    %cst_273 = arith.constant 0.000000e+00 : f32
    %389 = vector.broadcast %cst_273 : f32 to vector<8x256xf32>
    %390 = arith.maximumf %388, %389 : vector<8x256xf32>
    %c12_274 = arith.constant 12 : index
    %c0_275 = arith.constant 0 : index
    %c0_276 = arith.constant 0 : index
    %391 = vector.load %arg5[%c12_274, %c0_275, %c0_276] : memref<16x8x256xf32, #tpu.memory_space<vmem>>, vector<1x8x256xf32>
    %392 = vector.shape_cast %391 : vector<1x8x256xf32> to vector<8x256xf32>
    %393 = vector.shape_cast %390 : vector<8x256xf32> to vector<1x8x256xf32>
    tpu.vector_store %arg5[%c12_274, %c0_275, %c0_276], %393 {strides = array<i32>} : memref<16x8x256xf32, #tpu.memory_space<vmem>>, vector<1x8x256xf32>,
    %c13_277 = arith.constant 13 : index
    %c0_278 = arith.constant 0 : index
    %c0_279 = arith.constant 0 : index
    %394 = vector.load %arg5[%c13_277, %c0_278, %c0_279] : memref<16x8x256xf32, #tpu.memory_space<vmem>>, vector<1x8x256xf32>
    %395 = vector.shape_cast %394 : vector<1x8x256xf32> to vector<8x256xf32>
    %396 = arith.mulf %395, %274 : vector<8x256xf32>
    %397 = arith.addf %396, %276 : vector<8x256xf32>
    %cst_280 = arith.constant 0.000000e+00 : f32
    %398 = vector.broadcast %cst_280 : f32 to vector<8x256xf32>
    %399 = arith.maximumf %397, %398 : vector<8x256xf32>
    %c13_281 = arith.constant 13 : index
    %c0_282 = arith.constant 0 : index
    %c0_283 = arith.constant 0 : index
    %400 = vector.load %arg5[%c13_281, %c0_282, %c0_283] : memref<16x8x256xf32, #tpu.memory_space<vmem>>, vector<1x8x256xf32>
    %401 = vector.shape_cast %400 : vector<1x8x256xf32> to vector<8x256xf32>
    %402 = vector.shape_cast %399 : vector<8x256xf32> to vector<1x8x256xf32>
    tpu.vector_store %arg5[%c13_281, %c0_282, %c0_283], %402 {strides = array<i32>} : memref<16x8x256xf32, #tpu.memory_space<vmem>>, vector<1x8x256xf32>,
    %c14_284 = arith.constant 14 : index
    %c0_285 = arith.constant 0 : index
    %c0_286 = arith.constant 0 : index
    %403 = vector.load %arg5[%c14_284, %c0_285, %c0_286] : memref<16x8x256xf32, #tpu.memory_space<vmem>>, vector<1x8x256xf32>
    %404 = vector.shape_cast %403 : vector<1x8x256xf32> to vector<8x256xf32>
    %405 = arith.mulf %404, %274 : vector<8x256xf32>
    %406 = arith.addf %405, %276 : vector<8x256xf32>
    %cst_287 = arith.constant 0.000000e+00 : f32
    %407 = vector.broadcast %cst_287 : f32 to vector<8x256xf32>
    %408 = arith.maximumf %406, %407 : vector<8x256xf32>
    %c14_288 = arith.constant 14 : index
    %c0_289 = arith.constant 0 : index
    %c0_290 = arith.constant 0 : index
    %409 = vector.load %arg5[%c14_288, %c0_289, %c0_290] : memref<16x8x256xf32, #tpu.memory_space<vmem>>, vector<1x8x256xf32>
    %410 = vector.shape_cast %409 : vector<1x8x256xf32> to vector<8x256xf32>
    %411 = vector.shape_cast %408 : vector<8x256xf32> to vector<1x8x256xf32>
    tpu.vector_store %arg5[%c14_288, %c0_289, %c0_290], %411 {strides = array<i32>} : memref<16x8x256xf32, #tpu.memory_space<vmem>>, vector<1x8x256xf32>,
    %c15_291 = arith.constant 15 : index
    %c0_292 = arith.constant 0 : index
    %c0_293 = arith.constant 0 : index
    %412 = vector.load %arg5[%c15_291, %c0_292, %c0_293] : memref<16x8x256xf32, #tpu.memory_space<vmem>>, vector<1x8x256xf32>
    %413 = vector.shape_cast %412 : vector<1x8x256xf32> to vector<8x256xf32>
    %414 = arith.mulf %413, %274 : vector<8x256xf32>
    %415 = arith.addf %414, %276 : vector<8x256xf32>
    %cst_294 = arith.constant 0.000000e+00 : f32
    %416 = vector.broadcast %cst_294 : f32 to vector<8x256xf32>
    %417 = arith.maximumf %415, %416 : vector<8x256xf32>
    %c15_295 = arith.constant 15 : index
    %c0_296 = arith.constant 0 : index
    %c0_297 = arith.constant 0 : index
    %418 = vector.load %arg5[%c15_295, %c0_296, %c0_297] : memref<16x8x256xf32, #tpu.memory_space<vmem>>, vector<1x8x256xf32>
    %419 = vector.shape_cast %418 : vector<1x8x256xf32> to vector<8x256xf32>
    %420 = vector.shape_cast %417 : vector<8x256xf32> to vector<1x8x256xf32>
    tpu.vector_store %arg5[%c15_295, %c0_296, %c0_297], %420 {strides = array<i32>} : memref<16x8x256xf32, #tpu.memory_space<vmem>>, vector<1x8x256xf32>,
    return
  }
  func.func @transform_0(%arg0: i32) -> (i32, i32) {
    %c0_i32 = arith.constant 0 : i32
    %c0_i32_0 = arith.constant 0 : i32
    %c0_i32_1 = arith.constant 0 : i32
    return %c0_i32, %c0_i32_0 : i32, i32
  }
  func.func @transform_1(%arg0: i32) -> (i32, i32, i32) {
    %c0_i32 = arith.constant 0 : i32
    %c0_i32_0 = arith.constant 0 : i32
    %c0_i32_1 = arith.constant 0 : i32
    return %c0_i32, %c0_i32_0, %arg0 : i32, i32, i32
  }
  func.func @transform_2(%arg0: i32) -> (i32, i32) {
    %c0_i32 = arith.constant 0 : i32
    %c0_i32_0 = arith.constant 0 : i32
    return %c0_i32, %arg0 : i32, i32
  }
  func.func @transform_3(%arg0: i32) -> (i32, i32) {
    %c0_i32 = arith.constant 0 : i32
    %c0_i32_0 = arith.constant 0 : i32
    return %c0_i32, %arg0 : i32, i32
  }
  func.func @transform_4(%arg0: i32) -> (i32, i32, i32) {
    %c0_i32 = arith.constant 0 : i32
    %c0_i32_0 = arith.constant 0 : i32
    %c0_i32_1 = arith.constant 0 : i32
    return %c0_i32, %c0_i32_0, %arg0 : i32, i32, i32
  }
}

</mosaic_0001>

<bundles_post_ra>
// kernel: tpu_custom_call.1
= control target key start
LH: loop header
LB: loop body
LE: loop exit
PB: predicated region body
PF: predicated region fallthrough
CT: control target
= control target key end

     0   :  { %9 = vsyncpa [#allocation4], 0  ;;  %s6284_s0 = inlined_call_operand.vmem [shape: bf16[8,100], index: 0, kind: input, shape index: {}]   ;;  %s6285_s1 = inlined_call_operand.vmem [shape: bf16[16,100,512], index: 1, kind: input, shape index: {}]   ;;  %s6286_s2 = inlined_call_operand.vmem [shape: f32[1,512], index: 2, kind: input, shape index: {}]   ;;  %s6287_s3 = inlined_call_operand.vmem [shape: f32[1,512], index: 3, kind: input, shape index: {}]   ;;  %s6288_s4 = inlined_call_operand.hbm [shape: f32[16,8,512], index: 4, kind: output, shape index: {}]  }
   0x1   :  { %11 = vsyncpa [#allocation4 + $0x1], 0  ;;  %s5095_s15 = smov 0   ;;  %s5097_s16 = smov 0  }
   0x2   :  { %s5099_s17 = smov 0   ;;  %s5101_s18 = smov 0  }
   0x3 LB: > { %s5116_s19 = sadd.s32 4294967295, %s5062_s18   ;;  %s4042_s20 = sadd.s32 4294967294, %s5062_s18   ;;  %s5062_s18 = sphi %s5101_s18, %s6321_s18   ;;  %s5058_s17 = sphi %s5099_s17, %s6320_s17   ;;  %s5054_s16 = sphi %s5097_s16, %s6319_s16   ;;  %s5050_s15 = sphi %s5095_s15, %s6318_s15  }
   0x4   : > { %s5120_s21 = sadd.s32 1, %s5062_s18   ;;  %s45_s22 = sadd.s32 1, %s5058_s17 }
   0x5   : > { %s42_s23 = ssub.s32 %s5062_s18, %s5120_s21  ;;  %p52_p0 = scmp.ne.s32.totalorder %s5058_s17, %s5054_s16 }
   0x6   : > { %p43_p1 = scmp.eq.s32.totalorder %s42_s23, 0  ;;  %p53_p2 = scmp.eq.s32.totalorder %s5062_s18, 0 }
   0x7   : > { %p134_p3 = scmp.eq.s32.totalorder %s5116_s19, 1  ;;  %p139_p4 = scmp.ne.s32.totalorder %s5054_s16, %s5050_s15 }
   0x8   : > { %s5132_s24 = scalar_select %p43_p1, %s5058_s17, %s45_s22  }
   0x9   : > { %p54_p5 = por %p53_p2, %p52_p0  ;;  %p5134_p6 = por %p134_p3, %p52_p0 }
   0xa   : > { %p140_p7 = scmp.eq.s32.totalorder %s4042_s20, 1  ;;  %p4044_p9 = scmp.ge.s32.totalorder %s5062_s18, 2 }
   0xc   : > { %p5138_p8 = por %p140_p7, %p139_p4  ;;  %159 = sbr.rel (%p4044_p9) target bundleno = 127 (0x7f), region = 20 }
  0x13   : > { %162 = sbr.rel (!%p54_p5) target bundleno = 127 (0x7f), region = 24  ;;  %s164_s27 = sand.u32 (%p54_p5), 1, %s5058_s17  }
  0x14   : > { %s4627_s28 = sshll.u32 (%p54_p5), %s5062_s18, 3  ;;  %s4629_s29 = smul.u32 (%p54_p5), 1664, %s164_s27 }
  0x15   : > { %s5150_s6 = scalar_lea.vmem (%p54_p5), %s6285_s1, %s4627_s28 }
  0x16   : > { %v611_v0 = vld [vmem:[%s5150_s6] sm:$0xff] (%p54_p5)  ;;  %v613_v1 = vld [vmem:[%s5150_s6 + $0x10] sm:$0xff] (%p54_p5)  ;;  %s5158_s7 = scalar_lea.vmem (%p54_p5), [#allocation2], %s4629_s29 }
  0x17   : > { %v615_v2 = vld [vmem:[%s5150_s6 + $0x20] sm:$0xff] (%p54_p5)  ;;  %v617_v3 = vld [vmem:[%s5150_s6 + $0x30] sm:$0xff] (%p54_p5)  ;;  %612 = vst [vmem:[%s5158_s7] sm:$0xff] (%p54_p5), %v611_v0  ;;  %614 = vst [vmem:[%s5158_s7 + $0x8] sm:$0xff] (%p54_p5), %v613_v1 }
  0x18   : > { %v619_v4 = vld [vmem:[%s5150_s6 + $0x40] sm:$0xff] (%p54_p5)  ;;  %v621_v5 = vld [vmem:[%s5150_s6 + $0x50] sm:$0xff] (%p54_p5)  ;;  %616 = vst [vmem:[%s5158_s7 + $0x10] sm:$0xff] (%p54_p5), %v615_v2  ;;  %618 = vst [vmem:[%s5158_s7 + $0x18] sm:$0xff] (%p54_p5), %v617_v3 }
  0x19   : > { %620 = vst [vmem:[%s5158_s7 + $0x20] sm:$0xff] (%p54_p5), %v619_v4  ;;  %622 = vst [vmem:[%s5158_s7 + $0x28] sm:$0xff] (%p54_p5), %v621_v5  ;;  %v623_v6 = vld [vmem:[%s5150_s6 + $0x60] sm:$0xff] (%p54_p5)  ;;  %v625_v7 = vld [vmem:[%s5150_s6 + $0x70] sm:$0xff] (%p54_p5) }
  0x1a   : > { %v627_v8 = vld [vmem:[%s5150_s6 + $0x80] sm:$0xff]  ;;  %624 = vst [vmem:[%s5158_s7 + $0x30] sm:$0xff] %v623_v6  ;;  %626 = vst [vmem:[%s5158_s7 + $0x38] sm:$0xff] %v625_v7  ;;  %v629_v9 = vld [vmem:[%s5150_s6 + $0x90] sm:$0xff] }
  0x1b   : > { %628 = vst [vmem:[%s5158_s7 + $0x40] sm:$0xff] %v627_v8  ;;  %v631_v10 = vld [vmem:[%s5150_s6 + $0xa0] sm:$0xff]  ;;  %v633_v11 = vld [vmem:[%s5150_s6 + $0xb0] sm:$0xff]  ;;  %630 = vst [vmem:[%s5158_s7 + $0x48] sm:$0xff] %v629_v9 }
  0x1c   : > { %632 = vst [vmem:[%s5158_s7 + $0x50] sm:$0xff] %v631_v10  ;;  %634 = vst [vmem:[%s5158_s7 + $0x58] sm:$0xff] %v633_v11  ;;  %v635_v12 = vld [vmem:[%s5150_s6 + $0xc0] sm:$0xff]  ;;  %v637_v13 = vld [vmem:[%s5150_s6 + $0xd0] sm:$0xff] }
  0x1d   : > { %v639_v14 = vld [vmem:[%s5150_s6 + $0xe0] sm:$0xff]  ;;  %636 = vst [vmem:[%s5158_s7 + $0x60] sm:$0xff] %v635_v12  ;;  %638 = vst [vmem:[%s5158_s7 + $0x68] sm:$0xff] %v637_v13  ;;  %v641_v15 = vld [vmem:[%s5150_s6 + $0xf0] sm:$0xff] }
  0x1e   : > { %640 = vst [vmem:[%s5158_s7 + $0x70] sm:$0xff] %v639_v14  ;;  %v643_v16 = vld [vmem:[%s5150_s6 + $0x100] sm:$0xff]  ;;  %v645_v17 = vld [vmem:[%s5150_s6 + $0x110] sm:$0xff]  ;;  %642 = vst [vmem:[%s5158_s7 + $0x78] sm:$0xff] %v641_v15 }
  0x1f   : > { %644 = vst [vmem:[%s5158_s7 + $0x80] sm:$0xff] %v643_v16  ;;  %646 = vst [vmem:[%s5158_s7 + $0x88] sm:$0xff] %v645_v17  ;;  %v647_v18 = vld [vmem:[%s5150_s6 + $0x120] sm:$0xff]  ;;  %v649_v19 = vld [vmem:[%s5150_s6 + $0x130] sm:$0xff] }
  0x20   : > { %v651_v20 = vld [vmem:[%s5150_s6 + $0x140] sm:$0xff]  ;;  %648 = vst [vmem:[%s5158_s7 + $0x90] sm:$0xff] %v647_v18  ;;  %650 = vst [vmem:[%s5158_s7 + $0x98] sm:$0xff] %v649_v19  ;;  %v653_v21 = vld [vmem:[%s5150_s6 + $0x150] sm:$0xff] }
  0x21   : > { %652 = vst [vmem:[%s5158_s7 + $0xa0] sm:$0xff] %v651_v20  ;;  %v655_v22 = vld [vmem:[%s5150_s6 + $0x160] sm:$0xff]  ;;  %v657_v23 = vld [vmem:[%s5150_s6 + $0x170] sm:$0xff]  ;;  %654 = vst [vmem:[%s5158_s7 + $0xa8] sm:$0xff] %v653_v21 }
  0x22   : > { %656 = vst [vmem:[%s5158_s7 + $0xb0] sm:$0xff] %v655_v22  ;;  %658 = vst [vmem:[%s5158_s7 + $0xb8] sm:$0xff] %v657_v23  ;;  %v659_v24 = vld [vmem:[%s5150_s6 + $0x180] sm:$0xff]  ;;  %v661_v25 = vld [vmem:[%s5150_s6 + $0x190] sm:$0xff] }
  0x23   : > { %v663_v26 = vld [vmem:[%s5150_s6 + $0x1a0] sm:$0xff]  ;;  %660 = vst [vmem:[%s5158_s7 + $0xc0] sm:$0xff] %v659_v24  ;;  %662 = vst [vmem:[%s5158_s7 + $0xc8] sm:$0xff] %v661_v25  ;;  %v665_v27 = vld [vmem:[%s5150_s6 + $0x1b0] sm:$0xff] }
  0x24   : > { %664 = vst [vmem:[%s5158_s7 + $0xd0] sm:$0xff] %v663_v26  ;;  %v667_v28 = vld [vmem:[%s5150_s6 + $0x1c0] sm:$0xff]  ;;  %v669_v29 = vld [vmem:[%s5150_s6 + $0x1d0] sm:$0xff]  ;;  %666 = vst [vmem:[%s5158_s7 + $0xd8] sm:$0xff] %v665_v27 }
  0x25   : > { %668 = vst [vmem:[%s5158_s7 + $0xe0] sm:$0xff] %v667_v28  ;;  %670 = vst [vmem:[%s5158_s7 + $0xe8] sm:$0xff] %v669_v29  ;;  %v671_v30 = vld [vmem:[%s5150_s6 + $0x1e0] sm:$0xff]  ;;  %v673_v31 = vld [vmem:[%s5150_s6 + $0x1f0] sm:$0xff] }
  0x26   : > { %v675_v32 = vld [vmem:[%s5150_s6 + $0x200] sm:$0xff]  ;;  %672 = vst [vmem:[%s5158_s7 + $0xf0] sm:$0xff] %v671_v30  ;;  %674 = vst [vmem:[%s5158_s7 + $0xf8] sm:$0xff] %v673_v31  ;;  %v677_v33 = vld [vmem:[%s5150_s6 + $0x210] sm:$0xff] }
  0x27   : > { %676 = vst [vmem:[%s5158_s7 + $0x100] sm:$0xff] %v675_v32  ;;  %v679_v34 = vld [vmem:[%s5150_s6 + $0x220] sm:$0xff]  ;;  %v681_v35 = vld [vmem:[%s5150_s6 + $0x230] sm:$0xff]  ;;  %678 = vst [vmem:[%s5158_s7 + $0x108] sm:$0xff] %v677_v33 }
  0x28   : > { %680 = vst [vmem:[%s5158_s7 + $0x110] sm:$0xff] %v679_v34  ;;  %682 = vst [vmem:[%s5158_s7 + $0x118] sm:$0xff] %v681_v35  ;;  %v683_v36 = vld [vmem:[%s5150_s6 + $0x240] sm:$0xff]  ;;  %v685_v37 = vld [vmem:[%s5150_s6 + $0x250] sm:$0xff] }
  0x29   : > { %v687_v38 = vld [vmem:[%s5150_s6 + $0x260] sm:$0xff]  ;;  %684 = vst [vmem:[%s5158_s7 + $0x120] sm:$0xff] %v683_v36  ;;  %686 = vst [vmem:[%s5158_s7 + $0x128] sm:$0xff] %v685_v37  ;;  %v689_v39 = vld [vmem:[%s5150_s6 + $0x270] sm:$0xff] }
  0x2a   : > { %688 = vst [vmem:[%s5158_s7 + $0x130] sm:$0xff] %v687_v38  ;;  %v691_v40 = vld [vmem:[%s5150_s6 + $0x280] sm:$0xff]  ;;  %v693_v41 = vld [vmem:[%s5150_s6 + $0x290] sm:$0xff]  ;;  %690 = vst [vmem:[%s5158_s7 + $0x138] sm:$0xff] %v689_v39 }
  0x2b   : > { %692 = vst [vmem:[%s5158_s7 + $0x140] sm:$0xff] %v691_v40  ;;  %694 = vst [vmem:[%s5158_s7 + $0x148] sm:$0xff] %v693_v41  ;;  %v695_v42 = vld [vmem:[%s5150_s6 + $0x2a0] sm:$0xff]  ;;  %v697_v43 = vld [vmem:[%s5150_s6 + $0x2b0] sm:$0xff] }
  0x2c   : > { %v699_v44 = vld [vmem:[%s5150_s6 + $0x2c0] sm:$0xff]  ;;  %696 = vst [vmem:[%s5158_s7 + $0x150] sm:$0xff] %v695_v42  ;;  %698 = vst [vmem:[%s5158_s7 + $0x158] sm:$0xff] %v697_v43  ;;  %v701_v45 = vld [vmem:[%s5150_s6 + $0x2d0] sm:$0xff] }
  0x2d   : > { %700 = vst [vmem:[%s5158_s7 + $0x160] sm:$0xff] %v699_v44  ;;  %v703_v46 = vld [vmem:[%s5150_s6 + $0x2e0] sm:$0xff]  ;;  %v705_v47 = vld [vmem:[%s5150_s6 + $0x2f0] sm:$0xff]  ;;  %702 = vst [vmem:[%s5158_s7 + $0x168] sm:$0xff] %v701_v45 }
  0x2e   : > { %704 = vst [vmem:[%s5158_s7 + $0x170] sm:$0xff] %v703_v46  ;;  %706 = vst [vmem:[%s5158_s7 + $0x178] sm:$0xff] %v705_v47  ;;  %v707_v48 = vld [vmem:[%s5150_s6 + $0x300] sm:$0xff]  ;;  %v709_v49 = vld [vmem:[%s5150_s6 + $0x310] sm:$0xff] }
  0x2f   : > { %v711_v50 = vld [vmem:[%s5150_s6 + $0x320] sm:$0xff]  ;;  %708 = vst [vmem:[%s5158_s7 + $0x180] sm:$0xff] %v707_v48  ;;  %710 = vst [vmem:[%s5158_s7 + $0x188] sm:$0xff] %v709_v49  ;;  %v713_v51 = vld [vmem:[%s5150_s6 + $0x330] sm:$0xff] }
  0x30   : > { %712 = vst [vmem:[%s5158_s7 + $0x190] sm:$0xff] %v711_v50  ;;  %v715_v52 = vld [vmem:[%s5150_s6 + $0x340] sm:$0xff]  ;;  %v717_v53 = vld [vmem:[%s5150_s6 + $0x350] sm:$0xff]  ;;  %714 = vst [vmem:[%s5158_s7 + $0x198] sm:$0xff] %v713_v51 }
  0x31   : > { %716 = vst [vmem:[%s5158_s7 + $0x1a0] sm:$0xff] %v715_v52  ;;  %718 = vst [vmem:[%s5158_s7 + $0x1a8] sm:$0xff] %v717_v53  ;;  %v719_v54 = vld [vmem:[%s5150_s6 + $0x360] sm:$0xff]  ;;  %v721_v55 = vld [vmem:[%s5150_s6 + $0x370] sm:$0xff] }
  0x32   : > { %v723_v56 = vld [vmem:[%s5150_s6 + $0x380] sm:$0xff]  ;;  %720 = vst [vmem:[%s5158_s7 + $0x1b0] sm:$0xff] %v719_v54  ;;  %722 = vst [vmem:[%s5158_s7 + $0x1b8] sm:$0xff] %v721_v55  ;;  %v725_v57 = vld [vmem:[%s5150_s6 + $0x390] sm:$0xff] }
  0x33   : > { %724 = vst [vmem:[%s5158_s7 + $0x1c0] sm:$0xff] %v723_v56  ;;  %v727_v58 = vld [vmem:[%s5150_s6 + $0x3a0] sm:$0xff]  ;;  %v729_v59 = vld [vmem:[%s5150_s6 + $0x3b0] sm:$0xff]  ;;  %726 = vst [vmem:[%s5158_s7 + $0x1c8] sm:$0xff] %v725_v57 }
  0x34   : > { %728 = vst [vmem:[%s5158_s7 + $0x1d0] sm:$0xff] %v727_v58  ;;  %730 = vst [vmem:[%s5158_s7 + $0x1d8] sm:$0xff] %v729_v59  ;;  %v731_v60 = vld [vmem:[%s5150_s6 + $0x3c0] sm:$0xff]  ;;  %v733_v61 = vld [vmem:[%s5150_s6 + $0x3d0] sm:$0xff] }
  0x35   : > { %v735_v62 = vld [vmem:[%s5150_s6 + $0x3e0] sm:$0xff]  ;;  %732 = vst [vmem:[%s5158_s7 + $0x1e0] sm:$0xff] %v731_v60  ;;  %734 = vst [vmem:[%s5158_s7 + $0x1e8] sm:$0xff] %v733_v61  ;;  %v737_v63 = vld [vmem:[%s5150_s6 + $0x3f0] sm:$0xff] }
  0x36   : > { %736 = vst [vmem:[%s5158_s7 + $0x1f0] sm:$0xff] %v735_v62  ;;  %v739_v0 = vld [vmem:[%s5150_s6 + $0x400] sm:$0xff]  ;;  %v741_v1 = vld [vmem:[%s5150_s6 + $0x410] sm:$0xff]  ;;  %738 = vst [vmem:[%s5158_s7 + $0x1f8] sm:$0xff] %v737_v63 }
  0x37   : > { %740 = vst [vmem:[%s5158_s7 + $0x200] sm:$0xff] %v739_v0  ;;  %742 = vst [vmem:[%s5158_s7 + $0x208] sm:$0xff] %v741_v1  ;;  %v743_v2 = vld [vmem:[%s5150_s6 + $0x420] sm:$0xff]  ;;  %v745_v3 = vld [vmem:[%s5150_s6 + $0x430] sm:$0xff] }
  0x38   : > { %v747_v4 = vld [vmem:[%s5150_s6 + $0x440] sm:$0xff]  ;;  %744 = vst [vmem:[%s5158_s7 + $0x210] sm:$0xff] %v743_v2  ;;  %746 = vst [vmem:[%s5158_s7 + $0x218] sm:$0xff] %v745_v3  ;;  %v749_v5 = vld [vmem:[%s5150_s6 + $0x450] sm:$0xff] }
  0x39   : > { %748 = vst [vmem:[%s5158_s7 + $0x220] sm:$0xff] %v747_v4  ;;  %v751_v6 = vld [vmem:[%s5150_s6 + $0x460] sm:$0xff]  ;;  %v753_v7 = vld [vmem:[%s5150_s6 + $0x470] sm:$0xff]  ;;  %750 = vst [vmem:[%s5158_s7 + $0x228] sm:$0xff] %v749_v5 }
  0x3a   : > { %752 = vst [vmem:[%s5158_s7 + $0x230] sm:$0xff] %v751_v6  ;;  %754 = vst [vmem:[%s5158_s7 + $0x238] sm:$0xff] %v753_v7  ;;  %v755_v8 = vld [vmem:[%s5150_s6 + $0x480] sm:$0xff]  ;;  %v757_v9 = vld [vmem:[%s5150_s6 + $0x490] sm:$0xff] }
  0x3b   : > { %v759_v10 = vld [vmem:[%s5150_s6 + $0x4a0] sm:$0xff]  ;;  %756 = vst [vmem:[%s5158_s7 + $0x240] sm:$0xff] %v755_v8  ;;  %758 = vst [vmem:[%s5158_s7 + $0x248] sm:$0xff] %v757_v9  ;;  %v761_v11 = vld [vmem:[%s5150_s6 + $0x4b0] sm:$0xff] }
  0x3c   : > { %760 = vst [vmem:[%s5158_s7 + $0x250] sm:$0xff] %v759_v10  ;;  %v763_v12 = vld [vmem:[%s5150_s6 + $0x4c0] sm:$0xff]  ;;  %v765_v13 = vld [vmem:[%s5150_s6 + $0x4d0] sm:$0xff]  ;;  %762 = vst [vmem:[%s5158_s7 + $0x258] sm:$0xff] %v761_v11 }
  0x3d   : > { %764 = vst [vmem:[%s5158_s7 + $0x260] sm:$0xff] %v763_v12  ;;  %766 = vst [vmem:[%s5158_s7 + $0x268] sm:$0xff] %v765_v13  ;;  %v767_v14 = vld [vmem:[%s5150_s6 + $0x4e0] sm:$0xff]  ;;  %v769_v15 = vld [vmem:[%s5150_s6 + $0x4f0] sm:$0xff] }
  0x3e   : > { %v771_v16 = vld [vmem:[%s5150_s6 + $0x500] sm:$0xff]  ;;  %768 = vst [vmem:[%s5158_s7 + $0x270] sm:$0xff] %v767_v14  ;;  %770 = vst [vmem:[%s5158_s7 + $0x278] sm:$0xff] %v769_v15  ;;  %v773_v17 = vld [vmem:[%s5150_s6 + $0x510] sm:$0xff] }
  0x3f   : > { %772 = vst [vmem:[%s5158_s7 + $0x280] sm:$0xff] %v771_v16  ;;  %v775_v18 = vld [vmem:[%s5150_s6 + $0x520] sm:$0xff]  ;;  %v777_v19 = vld [vmem:[%s5150_s6 + $0x530] sm:$0xff]  ;;  %774 = vst [vmem:[%s5158_s7 + $0x288] sm:$0xff] %v773_v17 }
  0x40   : > { %776 = vst [vmem:[%s5158_s7 + $0x290] sm:$0xff] %v775_v18  ;;  %778 = vst [vmem:[%s5158_s7 + $0x298] sm:$0xff] %v777_v19  ;;  %v779_v20 = vld [vmem:[%s5150_s6 + $0x540] sm:$0xff]  ;;  %v781_v21 = vld [vmem:[%s5150_s6 + $0x550] sm:$0xff] }
  0x41   : > { %v783_v22 = vld [vmem:[%s5150_s6 + $0x560] sm:$0xff]  ;;  %780 = vst [vmem:[%s5158_s7 + $0x2a0] sm:$0xff] %v779_v20  ;;  %782 = vst [vmem:[%s5158_s7 + $0x2a8] sm:$0xff] %v781_v21  ;;  %v785_v23 = vld [vmem:[%s5150_s6 + $0x570] sm:$0xff] }
  0x42   : > { %784 = vst [vmem:[%s5158_s7 + $0x2b0] sm:$0xff] %v783_v22  ;;  %v787_v24 = vld [vmem:[%s5150_s6 + $0x580] sm:$0xff]  ;;  %v789_v25 = vld [vmem:[%s5150_s6 + $0x590] sm:$0xff]  ;;  %786 = vst [vmem:[%s5158_s7 + $0x2b8] sm:$0xff] %v785_v23 }
  0x43   : > { %788 = vst [vmem:[%s5158_s7 + $0x2c0] sm:$0xff] %v787_v24  ;;  %790 = vst [vmem:[%s5158_s7 + $0x2c8] sm:$0xff] %v789_v25  ;;  %v791_v26 = vld [vmem:[%s5150_s6 + $0x5a0] sm:$0xff]  ;;  %v793_v27 = vld [vmem:[%s5150_s6 + $0x5b0] sm:$0xff] }
  0x44   : > { %v795_v28 = vld [vmem:[%s5150_s6 + $0x5c0] sm:$0xff]  ;;  %792 = vst [vmem:[%s5158_s7 + $0x2d0] sm:$0xff] %v791_v26  ;;  %794 = vst [vmem:[%s5158_s7 + $0x2d8] sm:$0xff] %v793_v27  ;;  %v797_v29 = vld [vmem:[%s5150_s6 + $0x5d0] sm:$0xff] }
  0x45   : > { %796 = vst [vmem:[%s5158_s7 + $0x2e0] sm:$0xff] %v795_v28  ;;  %v799_v30 = vld [vmem:[%s5150_s6 + $0x5e0] sm:$0xff]  ;;  %v801_v31 = vld [vmem:[%s5150_s6 + $0x5f0] sm:$0xff]  ;;  %798 = vst [vmem:[%s5158_s7 + $0x2e8] sm:$0xff] %v797_v29 }
  0x46   : > { %800 = vst [vmem:[%s5158_s7 + $0x2f0] sm:$0xff] %v799_v30  ;;  %802 = vst [vmem:[%s5158_s7 + $0x2f8] sm:$0xff] %v801_v31  ;;  %v803_v32 = vld [vmem:[%s5150_s6 + $0x600] sm:$0xff]  ;;  %v805_v33 = vld [vmem:[%s5150_s6 + $0x610] sm:$0xff] }
  0x47   : > { %v807_v34 = vld [vmem:[%s5150_s6 + $0x620] sm:$0xff]  ;;  %804 = vst [vmem:[%s5158_s7 + $0x300] sm:$0xff] %v803_v32  ;;  %806 = vst [vmem:[%s5158_s7 + $0x308] sm:$0xff] %v805_v33  ;;  %v809_v35 = vld [vmem:[%s5150_s6 + $0x630] sm:$0xff] }
  0x48   : > { %808 = vst [vmem:[%s5158_s7 + $0x310] sm:$0xff] %v807_v34  ;;  %v811_v36 = vld [vmem:[%s5150_s6 + $0x640] sm:$0xff]  ;;  %v813_v37 = vld [vmem:[%s5150_s6 + $0x650] sm:$0xff]  ;;  %810 = vst [vmem:[%s5158_s7 + $0x318] sm:$0xff] %v809_v35 }
  0x49   : > { %812 = vst [vmem:[%s5158_s7 + $0x320] sm:$0xff] %v811_v36  ;;  %814 = vst [vmem:[%s5158_s7 + $0x328] sm:$0xff] %v813_v37  ;;  %v815_v38 = vld [vmem:[%s5150_s6 + $0x660] sm:$0xff]  ;;  %v817_v39 = vld [vmem:[%s5150_s6 + $0x670] sm:$0xff] }
  0x4a   : > { %v819_v40 = vld [vmem:[%s5150_s6 + $0x680] sm:$0xff]  ;;  %816 = vst [vmem:[%s5158_s7 + $0x330] sm:$0xff] %v815_v38  ;;  %818 = vst [vmem:[%s5158_s7 + $0x338] sm:$0xff] %v817_v39  ;;  %v821_v41 = vld [vmem:[%s5150_s6 + $0x690] sm:$0xff] }
  0x4b   : > { %820 = vst [vmem:[%s5158_s7 + $0x340] sm:$0xff] %v819_v40  ;;  %v823_v42 = vld [vmem:[%s5150_s6 + $0x6a0] sm:$0xff]  ;;  %v825_v43 = vld [vmem:[%s5150_s6 + $0x6b0] sm:$0xff]  ;;  %822 = vst [vmem:[%s5158_s7 + $0x348] sm:$0xff] %v821_v41 }
  0x4c   : > { %824 = vst [vmem:[%s5158_s7 + $0x350] sm:$0xff] %v823_v42  ;;  %826 = vst [vmem:[%s5158_s7 + $0x358] sm:$0xff] %v825_v43  ;;  %v827_v44 = vld [vmem:[%s5150_s6 + $0x6c0] sm:$0xff]  ;;  %v829_v45 = vld [vmem:[%s5150_s6 + $0x6d0] sm:$0xff] }
  0x4d   : > { %v831_v46 = vld [vmem:[%s5150_s6 + $0x6e0] sm:$0xff]  ;;  %828 = vst [vmem:[%s5158_s7 + $0x360] sm:$0xff] %v827_v44  ;;  %830 = vst [vmem:[%s5158_s7 + $0x368] sm:$0xff] %v829_v45  ;;  %v833_v47 = vld [vmem:[%s5150_s6 + $0x6f0] sm:$0xff] }
  0x4e   : > { %832 = vst [vmem:[%s5158_s7 + $0x370] sm:$0xff] %v831_v46  ;;  %v835_v48 = vld [vmem:[%s5150_s6 + $0x700] sm:$0xff]  ;;  %v837_v49 = vld [vmem:[%s5150_s6 + $0x710] sm:$0xff]  ;;  %834 = vst [vmem:[%s5158_s7 + $0x378] sm:$0xff] %v833_v47 }
  0x4f   : > { %836 = vst [vmem:[%s5158_s7 + $0x380] sm:$0xff] %v835_v48  ;;  %838 = vst [vmem:[%s5158_s7 + $0x388] sm:$0xff] %v837_v49  ;;  %v839_v50 = vld [vmem:[%s5150_s6 + $0x720] sm:$0xff]  ;;  %v841_v51 = vld [vmem:[%s5150_s6 + $0x730] sm:$0xff] }
  0x50   : > { %v843_v52 = vld [vmem:[%s5150_s6 + $0x740] sm:$0xff]  ;;  %840 = vst [vmem:[%s5158_s7 + $0x390] sm:$0xff] %v839_v50  ;;  %842 = vst [vmem:[%s5158_s7 + $0x398] sm:$0xff] %v841_v51  ;;  %v845_v53 = vld [vmem:[%s5150_s6 + $0x750] sm:$0xff] }
  0x51   : > { %844 = vst [vmem:[%s5158_s7 + $0x3a0] sm:$0xff] %v843_v52  ;;  %v847_v54 = vld [vmem:[%s5150_s6 + $0x760] sm:$0xff]  ;;  %v849_v55 = vld [vmem:[%s5150_s6 + $0x770] sm:$0xff]  ;;  %846 = vst [vmem:[%s5158_s7 + $0x3a8] sm:$0xff] %v845_v53 }
  0x52   : > { %848 = vst [vmem:[%s5158_s7 + $0x3b0] sm:$0xff] %v847_v54  ;;  %850 = vst [vmem:[%s5158_s7 + $0x3b8] sm:$0xff] %v849_v55  ;;  %v851_v56 = vld [vmem:[%s5150_s6 + $0x780] sm:$0xff]  ;;  %v853_v57 = vld [vmem:[%s5150_s6 + $0x790] sm:$0xff] }
  0x53   : > { %v855_v58 = vld [vmem:[%s5150_s6 + $0x7a0] sm:$0xff]  ;;  %852 = vst [vmem:[%s5158_s7 + $0x3c0] sm:$0xff] %v851_v56  ;;  %854 = vst [vmem:[%s5158_s7 + $0x3c8] sm:$0xff] %v853_v57  ;;  %v857_v59 = vld [vmem:[%s5150_s6 + $0x7b0] sm:$0xff] }
  0x54   : > { %856 = vst [vmem:[%s5158_s7 + $0x3d0] sm:$0xff] %v855_v58  ;;  %v859_v60 = vld [vmem:[%s5150_s6 + $0x7c0] sm:$0xff]  ;;  %v861_v61 = vld [vmem:[%s5150_s6 + $0x7d0] sm:$0xff]  ;;  %858 = vst [vmem:[%s5158_s7 + $0x3d8] sm:$0xff] %v857_v59 }
  0x55   : > { %860 = vst [vmem:[%s5158_s7 + $0x3e0] sm:$0xff] %v859_v60  ;;  %862 = vst [vmem:[%s5158_s7 + $0x3e8] sm:$0xff] %v861_v61  ;;  %v863_v62 = vld [vmem:[%s5150_s6 + $0x7e0] sm:$0xff]  ;;  %v865_v63 = vld [vmem:[%s5150_s6 + $0x7f0] sm:$0xff] }
  0x56   : > { %v867_v0 = vld [vmem:[%s5150_s6 + $0x800] sm:$0xff]  ;;  %864 = vst [vmem:[%s5158_s7 + $0x3f0] sm:$0xff] %v863_v62  ;;  %866 = vst [vmem:[%s5158_s7 + $0x3f8] sm:$0xff] %v865_v63  ;;  %v869_v1 = vld [vmem:[%s5150_s6 + $0x810] sm:$0xff] }
  0x57   : > { %868 = vst [vmem:[%s5158_s7 + $0x400] sm:$0xff] %v867_v0  ;;  %v871_v2 = vld [vmem:[%s5150_s6 + $0x820] sm:$0xff]  ;;  %v873_v3 = vld [vmem:[%s5150_s6 + $0x830] sm:$0xff]  ;;  %870 = vst [vmem:[%s5158_s7 + $0x408] sm:$0xff] %v869_v1 }
  0x58   : > { %872 = vst [vmem:[%s5158_s7 + $0x410] sm:$0xff] %v871_v2  ;;  %874 = vst [vmem:[%s5158_s7 + $0x418] sm:$0xff] %v873_v3  ;;  %v875_v4 = vld [vmem:[%s5150_s6 + $0x840] sm:$0xff]  ;;  %v877_v5 = vld [vmem:[%s5150_s6 + $0x850] sm:$0xff] }
  0x59   : > { %v879_v6 = vld [vmem:[%s5150_s6 + $0x860] sm:$0xff]  ;;  %876 = vst [vmem:[%s5158_s7 + $0x420] sm:$0xff] %v875_v4  ;;  %878 = vst [vmem:[%s5158_s7 + $0x428] sm:$0xff] %v877_v5  ;;  %v881_v7 = vld [vmem:[%s5150_s6 + $0x870] sm:$0xff] }
  0x5a   : > { %880 = vst [vmem:[%s5158_s7 + $0x430] sm:$0xff] %v879_v6  ;;  %v883_v8 = vld [vmem:[%s5150_s6 + $0x880] sm:$0xff]  ;;  %v885_v9 = vld [vmem:[%s5150_s6 + $0x890] sm:$0xff]  ;;  %882 = vst [vmem:[%s5158_s7 + $0x438] sm:$0xff] %v881_v7 }
  0x5b   : > { %884 = vst [vmem:[%s5158_s7 + $0x440] sm:$0xff] %v883_v8  ;;  %886 = vst [vmem:[%s5158_s7 + $0x448] sm:$0xff] %v885_v9  ;;  %v887_v10 = vld [vmem:[%s5150_s6 + $0x8a0] sm:$0xff]  ;;  %v889_v11 = vld [vmem:[%s5150_s6 + $0x8b0] sm:$0xff] }
  0x5c   : > { %v891_v12 = vld [vmem:[%s5150_s6 + $0x8c0] sm:$0xff]  ;;  %888 = vst [vmem:[%s5158_s7 + $0x450] sm:$0xff] %v887_v10  ;;  %890 = vst [vmem:[%s5158_s7 + $0x458] sm:$0xff] %v889_v11  ;;  %v893_v13 = vld [vmem:[%s5150_s6 + $0x8d0] sm:$0xff] }
  0x5d   : > { %892 = vst [vmem:[%s5158_s7 + $0x460] sm:$0xff] %v891_v12  ;;  %v895_v14 = vld [vmem:[%s5150_s6 + $0x8e0] sm:$0xff]  ;;  %v897_v15 = vld [vmem:[%s5150_s6 + $0x8f0] sm:$0xff]  ;;  %894 = vst [vmem:[%s5158_s7 + $0x468] sm:$0xff] %v893_v13 }
  0x5e   : > { %896 = vst [vmem:[%s5158_s7 + $0x470] sm:$0xff] %v895_v14  ;;  %898 = vst [vmem:[%s5158_s7 + $0x478] sm:$0xff] %v897_v15  ;;  %v899_v16 = vld [vmem:[%s5150_s6 + $0x900] sm:$0xff]  ;;  %v901_v17 = vld [vmem:[%s5150_s6 + $0x910] sm:$0xff] }
  0x5f   : > { %v903_v18 = vld [vmem:[%s5150_s6 + $0x920] sm:$0xff]  ;;  %900 = vst [vmem:[%s5158_s7 + $0x480] sm:$0xff] %v899_v16  ;;  %902 = vst [vmem:[%s5158_s7 + $0x488] sm:$0xff] %v901_v17  ;;  %v905_v19 = vld [vmem:[%s5150_s6 + $0x930] sm:$0xff] }
  0x60   : > { %904 = vst [vmem:[%s5158_s7 + $0x490] sm:$0xff] %v903_v18  ;;  %v907_v20 = vld [vmem:[%s5150_s6 + $0x940] sm:$0xff]  ;;  %v909_v21 = vld [vmem:[%s5150_s6 + $0x950] sm:$0xff]  ;;  %906 = vst [vmem:[%s5158_s7 + $0x498] sm:$0xff] %v905_v19 }
  0x61   : > { %908 = vst [vmem:[%s5158_s7 + $0x4a0] sm:$0xff] %v907_v20  ;;  %910 = vst [vmem:[%s5158_s7 + $0x4a8] sm:$0xff] %v909_v21  ;;  %v911_v22 = vld [vmem:[%s5150_s6 + $0x960] sm:$0xff]  ;;  %v913_v23 = vld [vmem:[%s5150_s6 + $0x970] sm:$0xff] }
  0x62   : > { %v915_v24 = vld [vmem:[%s5150_s6 + $0x980] sm:$0xff]  ;;  %912 = vst [vmem:[%s5158_s7 + $0x4b0] sm:$0xff] %v911_v22  ;;  %914 = vst [vmem:[%s5158_s7 + $0x4b8] sm:$0xff] %v913_v23  ;;  %v917_v25 = vld [vmem:[%s5150_s6 + $0x990] sm:$0xff] }
  0x63   : > { %916 = vst [vmem:[%s5158_s7 + $0x4c0] sm:$0xff] %v915_v24  ;;  %v919_v26 = vld [vmem:[%s5150_s6 + $0x9a0] sm:$0xff]  ;;  %v921_v27 = vld [vmem:[%s5150_s6 + $0x9b0] sm:$0xff]  ;;  %918 = vst [vmem:[%s5158_s7 + $0x4c8] sm:$0xff] %v917_v25 }
  0x64   : > { %920 = vst [vmem:[%s5158_s7 + $0x4d0] sm:$0xff] %v919_v26  ;;  %922 = vst [vmem:[%s5158_s7 + $0x4d8] sm:$0xff] %v921_v27  ;;  %v923_v28 = vld [vmem:[%s5150_s6 + $0x9c0] sm:$0xff]  ;;  %v925_v29 = vld [vmem:[%s5150_s6 + $0x9d0] sm:$0xff] }
  0x65   : > { %v927_v30 = vld [vmem:[%s5150_s6 + $0x9e0] sm:$0xff]  ;;  %924 = vst [vmem:[%s5158_s7 + $0x4e0] sm:$0xff] %v923_v28  ;;  %926 = vst [vmem:[%s5158_s7 + $0x4e8] sm:$0xff] %v925_v29  ;;  %v929_v31 = vld [vmem:[%s5150_s6 + $0x9f0] sm:$0xff] }
  0x66   : > { %928 = vst [vmem:[%s5158_s7 + $0x4f0] sm:$0xff] %v927_v30  ;;  %v931_v32 = vld [vmem:[%s5150_s6 + $0xa00] sm:$0xff]  ;;  %v933_v33 = vld [vmem:[%s5150_s6 + $0xa10] sm:$0xff]  ;;  %930 = vst [vmem:[%s5158_s7 + $0x4f8] sm:$0xff] %v929_v31 }
  0x67   : > { %932 = vst [vmem:[%s5158_s7 + $0x500] sm:$0xff] %v931_v32  ;;  %934 = vst [vmem:[%s5158_s7 + $0x508] sm:$0xff] %v933_v33  ;;  %v935_v34 = vld [vmem:[%s5150_s6 + $0xa20] sm:$0xff]  ;;  %v937_v35 = vld [vmem:[%s5150_s6 + $0xa30] sm:$0xff] }
  0x68   : > { %v939_v36 = vld [vmem:[%s5150_s6 + $0xa40] sm:$0xff]  ;;  %936 = vst [vmem:[%s5158_s7 + $0x510] sm:$0xff] %v935_v34  ;;  %938 = vst [vmem:[%s5158_s7 + $0x518] sm:$0xff] %v937_v35  ;;  %v941_v37 = vld [vmem:[%s5150_s6 + $0xa50] sm:$0xff] }
  0x69   : > { %940 = vst [vmem:[%s5158_s7 + $0x520] sm:$0xff] %v939_v36  ;;  %v943_v38 = vld [vmem:[%s5150_s6 + $0xa60] sm:$0xff]  ;;  %v945_v39 = vld [vmem:[%s5150_s6 + $0xa70] sm:$0xff]  ;;  %942 = vst [vmem:[%s5158_s7 + $0x528] sm:$0xff] %v941_v37 }
  0x6a   : > { %944 = vst [vmem:[%s5158_s7 + $0x530] sm:$0xff] %v943_v38  ;;  %946 = vst [vmem:[%s5158_s7 + $0x538] sm:$0xff] %v945_v39  ;;  %v947_v40 = vld [vmem:[%s5150_s6 + $0xa80] sm:$0xff]  ;;  %v949_v41 = vld [vmem:[%s5150_s6 + $0xa90] sm:$0xff] }
  0x6b   : > { %v951_v42 = vld [vmem:[%s5150_s6 + $0xaa0] sm:$0xff]  ;;  %948 = vst [vmem:[%s5158_s7 + $0x540] sm:$0xff] %v947_v40  ;;  %950 = vst [vmem:[%s5158_s7 + $0x548] sm:$0xff] %v949_v41  ;;  %v953_v43 = vld [vmem:[%s5150_s6 + $0xab0] sm:$0xff] }
  0x6c   : > { %952 = vst [vmem:[%s5158_s7 + $0x550] sm:$0xff] %v951_v42  ;;  %v955_v44 = vld [vmem:[%s5150_s6 + $0xac0] sm:$0xff]  ;;  %v957_v45 = vld [vmem:[%s5150_s6 + $0xad0] sm:$0xff]  ;;  %954 = vst [vmem:[%s5158_s7 + $0x558] sm:$0xff] %v953_v43 }
  0x6d   : > { %956 = vst [vmem:[%s5158_s7 + $0x560] sm:$0xff] %v955_v44  ;;  %958 = vst [vmem:[%s5158_s7 + $0x568] sm:$0xff] %v957_v45  ;;  %v959_v46 = vld [vmem:[%s5150_s6 + $0xae0] sm:$0xff]  ;;  %v961_v47 = vld [vmem:[%s5150_s6 + $0xaf0] sm:$0xff] }
  0x6e   : > { %v963_v48 = vld [vmem:[%s5150_s6 + $0xb00] sm:$0xff]  ;;  %960 = vst [vmem:[%s5158_s7 + $0x570] sm:$0xff] %v959_v46  ;;  %962 = vst [vmem:[%s5158_s7 + $0x578] sm:$0xff] %v961_v47  ;;  %v965_v49 = vld [vmem:[%s5150_s6 + $0xb10] sm:$0xff] }
  0x6f   : > { %964 = vst [vmem:[%s5158_s7 + $0x580] sm:$0xff] %v963_v48  ;;  %v967_v50 = vld [vmem:[%s5150_s6 + $0xb20] sm:$0xff]  ;;  %v969_v51 = vld [vmem:[%s5150_s6 + $0xb30] sm:$0xff]  ;;  %966 = vst [vmem:[%s5158_s7 + $0x588] sm:$0xff] %v965_v49 }
  0x70   : > { %968 = vst [vmem:[%s5158_s7 + $0x590] sm:$0xff] %v967_v50  ;;  %970 = vst [vmem:[%s5158_s7 + $0x598] sm:$0xff] %v969_v51  ;;  %v971_v52 = vld [vmem:[%s5150_s6 + $0xb40] sm:$0xff]  ;;  %v973_v53 = vld [vmem:[%s5150_s6 + $0xb50] sm:$0xff] }
  0x71   : > { %v975_v54 = vld [vmem:[%s5150_s6 + $0xb60] sm:$0xff]  ;;  %972 = vst [vmem:[%s5158_s7 + $0x5a0] sm:$0xff] %v971_v52  ;;  %974 = vst [vmem:[%s5158_s7 + $0x5a8] sm:$0xff] %v973_v53  ;;  %v977_v55 = vld [vmem:[%s5150_s6 + $0xb70] sm:$0xff] }
  0x72   : > { %976 = vst [vmem:[%s5158_s7 + $0x5b0] sm:$0xff] %v975_v54  ;;  %v979_v56 = vld [vmem:[%s5150_s6 + $0xb80] sm:$0xff]  ;;  %v981_v57 = vld [vmem:[%s5150_s6 + $0xb90] sm:$0xff]  ;;  %978 = vst [vmem:[%s5158_s7 + $0x5b8] sm:$0xff] %v977_v55 }
  0x73   : > { %980 = vst [vmem:[%s5158_s7 + $0x5c0] sm:$0xff] %v979_v56  ;;  %982 = vst [vmem:[%s5158_s7 + $0x5c8] sm:$0xff] %v981_v57  ;;  %v983_v58 = vld [vmem:[%s5150_s6 + $0xba0] sm:$0xff]  ;;  %v985_v59 = vld [vmem:[%s5150_s6 + $0xbb0] sm:$0xff] }
  0x74   : > { %v987_v60 = vld [vmem:[%s5150_s6 + $0xbc0] sm:$0xff]  ;;  %984 = vst [vmem:[%s5158_s7 + $0x5d0] sm:$0xff] %v983_v58  ;;  %986 = vst [vmem:[%s5158_s7 + $0x5d8] sm:$0xff] %v985_v59  ;;  %v989_v61 = vld [vmem:[%s5150_s6 + $0xbd0] sm:$0xff] }
  0x75   : > { %988 = vst [vmem:[%s5158_s7 + $0x5e0] sm:$0xff] %v987_v60  ;;  %v991_v62 = vld [vmem:[%s5150_s6 + $0xbe0] sm:$0xff]  ;;  %v993_v63 = vld [vmem:[%s5150_s6 + $0xbf0] sm:$0xff]  ;;  %990 = vst [vmem:[%s5158_s7 + $0x5e8] sm:$0xff] %v989_v61 }
  0x76   : > { %992 = vst [vmem:[%s5158_s7 + $0x5f0] sm:$0xff] %v991_v62  ;;  %994 = vst [vmem:[%s5158_s7 + $0x5f8] sm:$0xff] %v993_v63  ;;  %v995_v0 = vld [vmem:[%s5150_s6 + $0xc00] sm:$0xff]  ;;  %v997_v1 = vld [vmem:[%s5150_s6 + $0xc10] sm:$0xff] }
  0x77   : > { %v999_v2 = vld [vmem:[%s5150_s6 + $0xc20] sm:$0xff]  ;;  %996 = vst [vmem:[%s5158_s7 + $0x600] sm:$0xff] %v995_v0  ;;  %998 = vst [vmem:[%s5158_s7 + $0x608] sm:$0xff] %v997_v1  ;;  %v1001_v3 = vld [vmem:[%s5150_s6 + $0xc30] sm:$0xff] }
  0x78   : > { %1000 = vst [vmem:[%s5158_s7 + $0x610] sm:$0xff] %v999_v2  ;;  %v1003_v4 = vld [vmem:[%s5150_s6 + $0xc40] sm:$0xff]  ;;  %v1005_v5 = vld [vmem:[%s5150_s6 + $0xc50] sm:$0xff]  ;;  %1002 = vst [vmem:[%s5158_s7 + $0x618] sm:$0xff] %v1001_v3 }
  0x79   : > { %1004 = vst [vmem:[%s5158_s7 + $0x620] sm:$0xff] %v1003_v4  ;;  %1006 = vst [vmem:[%s5158_s7 + $0x628] sm:$0xff] %v1005_v5  ;;  %v1007_v6 = vld [vmem:[%s5150_s6 + $0xc60] sm:$0xff]  ;;  %v1009_v7 = vld [vmem:[%s5150_s6 + $0xc70] sm:$0xff] }
  0x7a   : > { %v1011_v8 = vld [vmem:[%s5150_s6 + $0xc80] sm:$0xff]  ;;  %1008 = vst [vmem:[%s5158_s7 + $0x630] sm:$0xff] %v1007_v6  ;;  %1010 = vst [vmem:[%s5158_s7 + $0x638] sm:$0xff] %v1009_v7  ;;  %v1013_v9 = vld [vmem:[%s5150_s6 + $0xc90] sm:$0xff] }
  0x7b   : > { %1012 = vst [vmem:[%s5158_s7 + $0x640] sm:$0xff] %v1011_v8  ;;  %v1015_v10 = vld [vmem:[%s5150_s6 + $0xca0] sm:$0xff]  ;;  %v1017_v11 = vld [vmem:[%s5150_s6 + $0xcb0] sm:$0xff]  ;;  %1014 = vst [vmem:[%s5158_s7 + $0x648] sm:$0xff] %v1013_v9 }
  0x7c   : > { %1016 = vst [vmem:[%s5158_s7 + $0x650] sm:$0xff] %v1015_v10  ;;  %1018 = vst [vmem:[%s5158_s7 + $0x658] sm:$0xff] %v1017_v11  ;;  %v1019_v12 = vld [vmem:[%s5150_s6 + $0xcc0] sm:$0xff]  ;;  %v1021_v13 = vld [vmem:[%s5150_s6 + $0xcd0] sm:$0xff] }
  0x7d   : > { %v1023_v14 = vld [vmem:[%s5150_s6 + $0xce0] sm:$0xff]  ;;  %1020 = vst [vmem:[%s5158_s7 + $0x660] sm:$0xff] %v1019_v12  ;;  %1022 = vst [vmem:[%s5158_s7 + $0x668] sm:$0xff] %v1021_v13  ;;  %v1025_v15 = vld [vmem:[%s5150_s6 + $0xcf0] sm:$0xff] }
  0x7e   : > { %1024 = vst [vmem:[%s5158_s7 + $0x670] sm:$0xff] %v1023_v14  ;;  %1026 = vst [vmem:[%s5158_s7 + $0x678] sm:$0xff] %v1025_v15 }
  0x7f PF: > { %p4047_p10 = scmp.ge.s32.totalorder %s5062_s18, 1  ;;  %p1047_p11 = scmp.lt.s32.totalorder %s5062_s18, 3 }
  0x81   : > { %p1048_p12 = pnand %p4047_p10, %p1047_p11 }
  0x83   : > { %1051 = sbr.rel (%p1048_p12) target bundleno = 751 (0x2ef), region = 70 }
  0x8a   : > { %s5573_s8 = sand.u32 1, %s5054_s16   ;;  %v5064_v16 = vmov 0   ;;  %vm1183_vm0 = vcmask 1041408   ;;  %v5615_v51 = vld [vmem:[%s6284_s0] sm:$0xf]  ;;  %vm1179_vm1 = vcmask 818176  }
  0x8b   : > { %s4630_s9 = smul.u32 1664, %s5573_s8  ;;  %1222 = vmatprep.mubr.bf16.mxu0 %v5064_v16  ;;  %1364 = vmatprep.mubr.bf16.mxu1 %v5064_v16  ;;  %s4049_s20 = sshll.u32 %s5116_s19, 1 }
  0x8c   : > { %p1089_p13 = scmp.lt.s32.totalorder %s4049_s20, 3  ;;  %s4048_s5 = sshll.u32 %s5573_s8, 8 }
  0x8d   : > { %s5578_s10 = scalar_lea.vmem [#allocation2], %s4630_s9  ;;  %s6159_s6 = scalar_lea.vmem [#allocation3], %s4048_s5 }
  0x8e   : > { %v4675_v17 = vld [vmem:[%s5578_s10 + $0x4] ss:$8 sps:$4 sm:$0xff]   ;;  %v4679_v19 = vld [vmem:[%s5578_s10] ss:$8 sps:$4 sm:$0xff]   ;;  %v4681_v21 = vld [vmem:[%s5578_s10 + $0x14] ss:$8 sps:$4 sm:$0xff]  }
  0x8f   : > { %v4677_v18 = vld [vmem:[%s5578_s10 + $0x6c] ss:$8 sps:$4 sm:$0xff]   ;;  %1190 = vmatprep.subr.bf16.mxu0 %v4675_v17  ;;  %v4680_v20 = vld [vmem:[%s5578_s10 + $0x68] ss:$8 sps:$4 sm:$0xff]   ;;  %v4683_v22 = vld [vmem:[%s5578_s10 + $0x7c] ss:$8 sps:$4 sm:$0xff]  }
  0x90   : > { %1332 = vmatprep.subr.bf16.mxu1 %v4677_v18  ;;  %1191 = vmatpush1.bf16.msra.mxu0 %v4679_v19  ;;  %v4685_v23 = vld [vmem:[%s5578_s10 + $0x10] ss:$8 sps:$4 sm:$0xff]   ;;  %v4687_v25 = vld [vmem:[%s5578_s10 + $0x24] ss:$8 sps:$4 sm:$0xff]   ;;  %v4691_v27 = vld [vmem:[%s5578_s10 + $0x20] ss:$8 sps:$4 sm:$0xff]  }
  0x91   : > { %1333 = vmatpush1.bf16.msra.mxu1 %v4680_v20  ;;  %1192 = vmatprep.subr.bf16.mxu0 %v4681_v21  ;;  %v4686_v24 = vld [vmem:[%s5578_s10 + $0x78] ss:$8 sps:$4 sm:$0xff]   ;;  %v4689_v26 = vld [vmem:[%s5578_s10 + $0x8c] ss:$8 sps:$4 sm:$0xff]   ;;  %v4692_v28 = vld [vmem:[%s5578_s10 + $0x88] ss:$8 sps:$4 sm:$0xff]  }
  0x92   : > { %1334 = vmatprep.subr.bf16.mxu1 %v4683_v22  ;;  %v4693_v29 = vld [vmem:[%s5578_s10 + $0x34] ss:$8 sps:$4 sm:$0xff]   ;;  %v4697_v31 = vld [vmem:[%s5578_s10 + $0x30] ss:$8 sps:$4 sm:$0xff]   ;;  %v4699_v33 = vld [vmem:[%s5578_s10 + $0x44] ss:$8 sps:$4 sm:$0xff]  }
  0x93   : > { %v4695_v30 = vld [vmem:[%s5578_s10 + $0x9c] ss:$8 sps:$4 sm:$0xff]   ;;  %v4698_v32 = vld [vmem:[%s5578_s10 + $0x98] ss:$8 sps:$4 sm:$0xff]   ;;  %v4701_v34 = vld [vmem:[%s5578_s10 + $0xac] ss:$8 sps:$4 sm:$0xff]  }
  0x94   : > { %1193 = vmatpush1.bf16.msra.mxu0 %v4685_v23  ;;  %v4703_v35 = vld [vmem:[%s5578_s10 + $0x40] ss:$8 sps:$4 sm:$0xff]   ;;  %v4705_v37 = vld [vmem:[%s5578_s10 + $0x54] ss:$8 sps:$4 sm:$0xff]   ;;  %v4709_v41 = vld [vmem:[%s5578_s10 + $0x50] ss:$8 sps:$4 sm:$0xff]  }
  0x95   : > { %1335 = vmatpush1.bf16.msra.mxu1 %v4686_v24  ;;  %1194 = vmatprep.subr.bf16.mxu0 %v4687_v25  ;;  %v4704_v36 = vld [vmem:[%s5578_s10 + $0xa8] ss:$8 sps:$4 sm:$0xff]   ;;  %v4707_v38 = vld [vmem:[%s5578_s10 + $0xbc] ss:$8 sps:$4 sm:$0xff]   ;;  %v4710_v42 = vld [vmem:[%s5578_s10 + $0xb8] ss:$8 sps:$4 sm:$0xff]  }
  0x96   : > { %1336 = vmatprep.subr.bf16.mxu1 %v4689_v26  ;;  %v1113_v39 = vld [vmem:[%s5578_s10 + $0x60] sm:$0x33]  ;;  %v4079_v40 = vld [vmem:[%s5578_s10 + $0xc8] sm:$0x33]  ;;  %v4717_v47 = vld [vmem:[%s5578_s10 + $0xd4] ss:$8 sps:$4 sm:$0xff]  }
  0x97   : > { %v4064_v43 = vcombine.high %v1113_v39, %v1113_v39  ;;  %v4093_v44 = vcombine.high %v4079_v40, %v4079_v40  ;;  %v4063_v45 = vcombine.low %v1113_v39, %v1113_v39  ;;  %v4092_v46 = vcombine.low %v4079_v40, %v4079_v40  ;;  %v4720_v50 = vld [vmem:[%s5578_s10 + $0x13c] ss:$8 sps:$4 sm:$0xff]   ;;  %v4715_v52 = vld [vmem:[%s5578_s10 + $0xd0] ss:$8 sps:$4 sm:$0xff]   ;;  %v4726_v55 = vld [vmem:[%s5578_s10 + $0x14c] ss:$8 sps:$4 sm:$0xff]  }
  0x98   : > { %1195 = vmatpush1.bf16.msra.mxu0 %v4691_v27  ;;  %v4718_v53 = vld [vmem:[%s5578_s10 + $0x138] ss:$8 sps:$4 sm:$0xff]   ;;  %v4723_v54 = vld [vmem:[%s5578_s10 + $0xe4] ss:$8 sps:$4 sm:$0xff]   ;;  %v4724_v57 = vld [vmem:[%s5578_s10 + $0x148] ss:$8 sps:$4 sm:$0xff]  }
  0x99   : > { %1337 = vmatpush1.bf16.msra.mxu1 %v4692_v28  ;;  %1196 = vmatprep.subr.bf16.mxu0 %v4693_v29  ;;  %v1185_v48 = vsel %vm1183_vm0, %v4063_v45, 0  ;;  %v1327_v49 = vsel %vm1183_vm0, %v4092_v46, 0  ;;  %v4721_v56 = vld [vmem:[%s5578_s10 + $0xe0] ss:$8 sps:$4 sm:$0xff]   ;;  %v4729_v58 = vld [vmem:[%s5578_s10 + $0xf4] ss:$8 sps:$4 sm:$0xff]  }
  0x9a   : > { %1338 = vmatprep.subr.bf16.mxu1 %v4695_v30  ;;  %v4732_v59 = vld [vmem:[%s5578_s10 + $0x15c] ss:$8 sps:$4 sm:$0xff]   ;;  %v4727_v60 = vld [vmem:[%s5578_s10 + $0xf0] ss:$8 sps:$4 sm:$0xff]   ;;  %v4738_v63 = vld [vmem:[%s5578_s10 + $0x16c] ss:$8 sps:$4 sm:$0xff]  }
  0x9b   : > { %v4730_v61 = vld [vmem:[%s5578_s10 + $0x158] ss:$8 sps:$4 sm:$0xff]   ;;  %v4735_v62 = vld [vmem:[%s5578_s10 + $0x104] ss:$8 sps:$4 sm:$0xff]   ;;  %v4736_v1 = vld [vmem:[%s5578_s10 + $0x168] ss:$8 sps:$4 sm:$0xff]  }
  0x9c   : > { %1197 = vmatpush1.bf16.msra.mxu0 %v4697_v31  ;;  %v4733_v0 = vld [vmem:[%s5578_s10 + $0x100] ss:$8 sps:$4 sm:$0xff]   ;;  %v4741_v2 = vld [vmem:[%s5578_s10 + $0x114] ss:$8 sps:$4 sm:$0xff]   ;;  %v4739_v4 = vld [vmem:[%s5578_s10 + $0x110] ss:$8 sps:$4 sm:$0xff]  }
  0x9d   : > { %1339 = vmatpush1.bf16.msra.mxu1 %v4698_v32  ;;  %1198 = vmatprep.subr.bf16.mxu0 %v4699_v33  ;;  %v4744_v3 = vld [vmem:[%s5578_s10 + $0x17c] ss:$8 sps:$4 sm:$0xff]   ;;  %v4742_v5 = vld [vmem:[%s5578_s10 + $0x178] ss:$8 sps:$4 sm:$0xff]   ;;  %v4750_v7 = vld [vmem:[%s5578_s10 + $0x18c] ss:$8 sps:$4 sm:$0xff]  }
  0x9e   : > { %1340 = vmatprep.subr.bf16.mxu1 %v4701_v34  ;;  %v4747_v6 = vld [vmem:[%s5578_s10 + $0x124] ss:$8 sps:$4 sm:$0xff]   ;;  %v4110_v8 = vld [vmem:[%s5578_s10 + $0x130] sm:$0x33]  ;;  %v4141_v9 = vld [vmem:[%s5578_s10 + $0x198] sm:$0x33] }
  0x9f   : > { %v4745_v10 = vld [vmem:[%s5578_s10 + $0x120] ss:$8 sps:$4 sm:$0xff]   ;;  %v4124_v12 = vcombine.high %v4110_v8, %v4110_v8  ;;  %v4155_v13 = vcombine.high %v4141_v9, %v4141_v9  ;;  %v4123_v14 = vcombine.low %v4110_v8, %v4110_v8  ;;  %v4154_v15 = vcombine.low %v4141_v9, %v4141_v9  ;;  %v4757_v17 = vld [vmem:[%s5578_s10 + $0x1a4] ss:$8 sps:$4 sm:$0xff]   ;;  %v4763_v23 = vld [vmem:[%s5578_s10 + $0x1b4] ss:$8 sps:$4 sm:$0xff]  }
  0xa0   : > { %1199 = vmatpush1.bf16.msra.mxu0 %v4703_v35  ;;  %v4748_v11 = vld [vmem:[%s5578_s10 + $0x188] ss:$8 sps:$4 sm:$0xff]   ;;  %v4760_v20 = vld [vmem:[%s5578_s10 + $0x20c] ss:$8 sps:$4 sm:$0xff]   ;;  %v4766_v24 = vld [vmem:[%s5578_s10 + $0x21c] ss:$8 sps:$4 sm:$0xff]  }
  0xa1   : > { %1341 = vmatpush1.bf16.msra.mxu1 %v4704_v36  ;;  %1200 = vmatprep.subr.bf16.mxu0 %v4705_v37  ;;  %v1470_v18 = vsel %vm1183_vm0, %v4123_v14, 0  ;;  %v1613_v19 = vsel %vm1183_vm0, %v4154_v15, 0  ;;  %v4755_v21 = vld [vmem:[%s5578_s10 + $0x1a0] ss:$8 sps:$4 sm:$0xff]   ;;  %v4761_v25 = vld [vmem:[%s5578_s10 + $0x1b0] ss:$8 sps:$4 sm:$0xff]  }
  0xa2   : > { %1342 = vmatprep.subr.bf16.mxu1 %v4707_v38  ;;  %v4758_v22 = vld [vmem:[%s5578_s10 + $0x208] ss:$8 sps:$4 sm:$0xff]   ;;  %v4764_v26 = vld [vmem:[%s5578_s10 + $0x218] ss:$8 sps:$4 sm:$0xff]   ;;  %v4769_v27 = vld [vmem:[%s5578_s10 + $0x1c4] ss:$8 sps:$4 sm:$0xff]  }
  0xa3   : > { %v4772_v28 = vld [vmem:[%s5578_s10 + $0x22c] ss:$8 sps:$4 sm:$0xff]   ;;  %v4767_v29 = vld [vmem:[%s5578_s10 + $0x1c0] ss:$8 sps:$4 sm:$0xff]   ;;  %v4778_v32 = vld [vmem:[%s5578_s10 + $0x23c] ss:$8 sps:$4 sm:$0xff]  }
  0xa4   : > { %1201 = vmatpush1.bf16.msra.mxu0 %v4709_v41  ;;  %v4770_v30 = vld [vmem:[%s5578_s10 + $0x228] ss:$8 sps:$4 sm:$0xff]   ;;  %v4775_v31 = vld [vmem:[%s5578_s10 + $0x1d4] ss:$8 sps:$4 sm:$0xff]   ;;  %v4776_v34 = vld [vmem:[%s5578_s10 + $0x238] ss:$8 sps:$4 sm:$0xff]  }
  0xa5   : > { %1343 = vmatpush1.bf16.msra.mxu1 %v4710_v42  ;;  %4065 = vmatprep.subr.msk.bf16.mxu0 %vm1183_vm0, %v4064_v43  ;;  %v4773_v33 = vld [vmem:[%s5578_s10 + $0x1d0] ss:$8 sps:$4 sm:$0xff]   ;;  %v4781_v35 = vld [vmem:[%s5578_s10 + $0x1e4] ss:$8 sps:$4 sm:$0xff]   ;;  %v4779_v37 = vld [vmem:[%s5578_s10 + $0x1e0] ss:$8 sps:$4 sm:$0xff]  }
  0xa6   : > { %4094 = vmatprep.subr.msk.bf16.mxu1 %vm1183_vm0, %v4093_v44  ;;  %v4784_v36 = vld [vmem:[%s5578_s10 + $0x24c] ss:$8 sps:$4 sm:$0xff]   ;;  %v4782_v38 = vld [vmem:[%s5578_s10 + $0x248] ss:$8 sps:$4 sm:$0xff]   ;;  %v4790_v40 = vld [vmem:[%s5578_s10 + $0x25c] ss:$8 sps:$4 sm:$0xff]  }
  0xa7   : > { %v4787_v39 = vld [vmem:[%s5578_s10 + $0x1f4] ss:$8 sps:$4 sm:$0xff]   ;;  %v4172_v41 = vld [vmem:[%s5578_s10 + $0x200] sm:$0x33]  ;;  %v4203_v42 = vld [vmem:[%s5578_s10 + $0x268] sm:$0x33] }
  0xa8   : > { %1203 = vmatpush1.bf16.msra.mxu0 %v1185_v48  ;;  %v4785_v43 = vld [vmem:[%s5578_s10 + $0x1f0] ss:$8 sps:$4 sm:$0xff]   ;;  %v4186_v45 = vcombine.high %v4172_v41, %v4172_v41  ;;  %v4217_v46 = vcombine.high %v4203_v42, %v4203_v42  ;;  %v4216_v48 = vcombine.low %v4203_v42, %v4203_v42  ;;  %v4827_v8 = vld [vmem:[%s5578_s10 + $0x2c4] ss:$8 sps:$4 sm:$0xff]   ;;  %s6323_s20 = smov (!%p1089_p13, %s4049_s20), 3  ;;  %s4628_s7 = sshll.u32 %s5116_s19, 8 }
  0xa9   : > { %1345 = vmatpush1.bf16.msra.mxu1 %v1327_v49  ;;  %1475 = vmatprep.subr.bf16.mxu0 %v4717_v47  ;;  %v4788_v44 = vld [vmem:[%s5578_s10 + $0x258] ss:$8 sps:$4 sm:$0xff]   ;;  %v4185_v47 = vcombine.low %v4172_v41, %v4172_v41  ;;  %v4797_v49 = vld [vmem:[%s5578_s10 + $0x274] ss:$8 sps:$4 sm:$0xff]   ;;  %s1091_s27 = scalar_lea.vmem %s6286_s2, %s6323_s20  ;;  %s1096_s30 = scalar_lea.vmem %s6287_s3, %s6323_s20 }
  0xaa   : > { %1618 = vmatprep.subr.bf16.mxu1 %v4720_v50  ;;  %v4830_v9 = vld [vmem:[%s5578_s10 + $0x32c] ss:$8 sps:$4 sm:$0xff]   ;;  %v4870_v42 = vld [vmem:[%s5578_s10 + $0x3fc] ss:$8 sps:$4 sm:$0xff]   ;;  %s3956_s9 = sshll.u32 %s6159_s6, 4  ;;  %s6230_s11 = scalar_lea.hbm %s6288_s4, %s4628_s7  ;;  %s6232_s9 = int_to_ptr.vmem [resolvable:$true] %s3956_s9 }
  0xab   : > { %4066 = vmatmul.mubr.msk.bf16.vlgmr.msra.gmra.mrb[0].mxu0 %vm1179_vm1, %v5615_v51  ;;  %v1756_v50 = vsel %vm1183_vm0, %v4185_v47, 0  ;;  %v4867_v41 = vld [vmem:[%s5578_s10 + $0x394] ss:$8 sps:$4 sm:$0xff]   ;;  %s3943_s12 = scalar_lea.sflag [#allocation4], %s5573_s8  ;;  %s5000_s13 = scalar_lea.vmem %s6232_s9, 4096 }
  0xac   : > { %4095 = vmatmul.mubr.msk.bf16.vlgmr.msra.gmra.mrb[0].mxu1 %vm1179_vm1, %v5615_v51  ;;  %1476 = vmatpush1.bf16.msra.mxu0 %v4715_v52  ;;  %v1899_v52 = vsel %vm1183_vm0, %v4216_v48, 0  ;;  %p5001_p0 = scmp.ne.s32.totalorder %s6232_s9, %s5000_s13  ;;  %s5066_s14 = smov [#allocation3]  }
  0xad   : > { %1619 = vmatpush1.bf16.msra.mxu1 %v4718_v53  ;;  %1477 = vmatprep.subr.bf16.mxu0 %v4723_v54  ;;  %v4800_v53 = vld [vmem:[%s5578_s10 + $0x2dc] ss:$8 sps:$4 sm:$0xff]   ;;  %v4795_v54 = vld [vmem:[%s5578_s10 + $0x270] ss:$8 sps:$4 sm:$0xff]   ;;  %s5004_s20 = sshll.u32 %s5066_s14, 4  ;;  %s5005_s20 = int_to_ptr.vmem [resolvable:$false] %s5004_s20 }
  0xae   : > { %1620 = vmatprep.subr.bf16.mxu1 %v4726_v55  ;;  %1507 = vmatprep.mubr.bf16.mxu0 %v5064_v16  ;;  %v4798_v55 = vld [vmem:[%s5578_s10 + $0x2d8] ss:$8 sps:$4 sm:$0xff]   ;;  %p5002_p1 = pnand %p5001_p0, %p5134_p6  ;;  %s5006_s22 = scalar_lea.vmem %s5005_s20, 8192 }
  0xaf   : > { %1650 = vmatprep.mubr.bf16.mxu1 %v5064_v16  ;;  %p5007_p3 = scmp.lt.s32.totalorder %s6232_s9, %s5005_s20  ;;  %p5008_p4 = scmp.lt.s32.totalorder %s5006_s22, %s5000_s13 }
  0xb0   : > { %1478 = vmatpush1.bf16.msra.mxu0 %v4721_v56  ;;  %v4803_v56 = vld [vmem:[%s5578_s10 + $0x284] ss:$8 sps:$4 sm:$0xff]   ;;  %p5003_p2 = pneg %p5002_p1 }
  0xb1   : > { %1621 = vmatpush1.bf16.msra.mxu1 %v4724_v57  ;;  %1479 = vmatprep.subr.bf16.mxu0 %v4729_v58  ;;  %v4806_v57 = vld [vmem:[%s5578_s10 + $0x2ec] ss:$8 sps:$4 sm:$0xff]   ;;  %v4801_v58 = vld [vmem:[%s5578_s10 + $0x280] ss:$8 sps:$4 sm:$0xff]   ;;  %p5009_p5 = por %p5008_p4, %p5007_p3 }
  0xb2   : > { %1622 = vmatprep.subr.bf16.mxu1 %v4732_v59  ;;  %v4804_v59 = vld [vmem:[%s5578_s10 + $0x2e8] ss:$8 sps:$4 sm:$0xff]  }
  0xb3   : > { %p5010_p7 = pnand %p5009_p5, %p5003_p2 }
  0xb4   : > { %1480 = vmatpush1.bf16.msra.mxu0 %v4727_v60  ;;  %v4809_v60 = vld [vmem:[%s5578_s10 + $0x294] ss:$8 sps:$4 sm:$0xff]  }
  0xb5   : > { %1623 = vmatpush1.bf16.msra.mxu1 %v4730_v61  ;;  %1481 = vmatprep.subr.bf16.mxu0 %v4735_v62  ;;  %v4812_v61 = vld [vmem:[%s5578_s10 + $0x2fc] ss:$8 sps:$4 sm:$0xff]   ;;  %v4807_v62 = vld [vmem:[%s5578_s10 + $0x290] ss:$8 sps:$4 sm:$0xff]  }
  0xb6   : > { %1624 = vmatprep.subr.bf16.mxu1 %v4738_v63  ;;  %v4810_v63 = vld [vmem:[%s5578_s10 + $0x2f8] ss:$8 sps:$4 sm:$0xff]  }
  0xb8   : > { %1482 = vmatpush1.bf16.msra.mxu0 %v4733_v0  ;;  %v4815_v0 = vld [vmem:[%s5578_s10 + $0x2a4] ss:$8 sps:$4 sm:$0xff]  }
  0xb9   : > { %1625 = vmatpush1.bf16.msra.mxu1 %v4736_v1  ;;  %1483 = vmatprep.subr.bf16.mxu0 %v4741_v2  ;;  %v4818_v1 = vld [vmem:[%s5578_s10 + $0x30c] ss:$8 sps:$4 sm:$0xff]   ;;  %v4813_v2 = vld [vmem:[%s5578_s10 + $0x2a0] ss:$8 sps:$4 sm:$0xff]  }
  0xba   : > { %1626 = vmatprep.subr.bf16.mxu1 %v4744_v3  ;;  %v4816_v3 = vld [vmem:[%s5578_s10 + $0x308] ss:$8 sps:$4 sm:$0xff]  }
  0xbc   : > { %1484 = vmatpush1.bf16.msra.mxu0 %v4739_v4  ;;  %v4821_v4 = vld [vmem:[%s5578_s10 + $0x2b4] ss:$8 sps:$4 sm:$0xff]  }
  0xbd   : > { %1627 = vmatpush1.bf16.msra.mxu1 %v4742_v5  ;;  %1485 = vmatprep.subr.bf16.mxu0 %v4747_v6  ;;  %v4824_v5 = vld [vmem:[%s5578_s10 + $0x31c] ss:$8 sps:$4 sm:$0xff]   ;;  %v4819_v6 = vld [vmem:[%s5578_s10 + $0x2b0] ss:$8 sps:$4 sm:$0xff]  }
  0xbe   : > { %1628 = vmatprep.subr.bf16.mxu1 %v4750_v7  ;;  %v4822_v7 = vld [vmem:[%s5578_s10 + $0x318] ss:$8 sps:$4 sm:$0xff]  }
  0xc0   : > { %1486 = vmatpush1.bf16.msra.mxu0 %v4745_v10  ;;  %v4234_v10 = vld [vmem:[%s5578_s10 + $0x2d0] sm:$0x33] }
  0xc1   : > { %1629 = vmatpush1.bf16.msra.mxu1 %v4748_v11  ;;  %4125 = vmatprep.subr.msk.bf16.mxu0 %vm1183_vm0, %v4124_v12  ;;  %v4265_v11 = vld [vmem:[%s5578_s10 + $0x338] sm:$0x33]  ;;  %v4825_v12 = vld [vmem:[%s5578_s10 + $0x2c0] ss:$8 sps:$4 sm:$0xff]   ;;  %v4248_v14 = vcombine.high %v4234_v10, %v4234_v10 }
  0xc2   : > { %4156 = vmatprep.subr.msk.bf16.mxu1 %vm1183_vm0, %v4155_v13  ;;  %v4828_v13 = vld [vmem:[%s5578_s10 + $0x328] ss:$8 sps:$4 sm:$0xff]   ;;  %v4279_v15 = vcombine.high %v4265_v11, %v4265_v11 }
  0xc4   : > { %1488 = vmatpush1.bf16.msra.mxu0 %v1470_v18  ;;  %v4278_v18 = vcombine.low %v4265_v11, %v4265_v11  ;;  %v4910_v11 = vld [vmem:[%s5578_s10 + $0x4cc] ss:$8 sps:$4 sm:$0xff]  }
  0xc5   : > { %1631 = vmatpush1.bf16.msra.mxu1 %v1613_v19  ;;  %1761 = vmatprep.subr.bf16.mxu0 %v4757_v17  ;;  %v4247_v17 = vcombine.low %v4234_v10, %v4234_v10  ;;  %v4837_v19 = vld [vmem:[%s5578_s10 + $0x344] ss:$8 sps:$4 sm:$0xff]  }
  0xc6   : > { %1904 = vmatprep.subr.bf16.mxu1 %v4760_v20  ;;  %v4907_v10 = vld [vmem:[%s5578_s10 + $0x464] ss:$8 sps:$4 sm:$0xff]  }
  0xc7   : > { %4126 = vmatmul.mubr.msk.bf16.vlgmr.msra.gmra.mrb[4].mxu0 %vm1179_vm1, %v5615_v51  ;;  %v2042_v20 = vsel %vm1183_vm0, %v4247_v17, 0 }
  0xc8   : > { %4157 = vmatmul.mubr.msk.bf16.vlgmr.msra.gmra.mrb[4].mxu1 %vm1179_vm1, %v5615_v51  ;;  %1762 = vmatpush1.bf16.msra.mxu0 %v4755_v21  ;;  %v2185_v21 = vsel %vm1183_vm0, %v4278_v18, 0 }
  0xc9   : > { %1905 = vmatpush1.bf16.msra.mxu1 %v4758_v22  ;;  %1763 = vmatprep.subr.bf16.mxu0 %v4763_v23  ;;  %v4840_v22 = vld [vmem:[%s5578_s10 + $0x3ac] ss:$8 sps:$4 sm:$0xff]   ;;  %v4835_v23 = vld [vmem:[%s5578_s10 + $0x340] ss:$8 sps:$4 sm:$0xff]  }
  0xca   : > { %1906 = vmatprep.subr.bf16.mxu1 %v4766_v24  ;;  %1793 = vmatprep.mubr.bf16.mxu0 %v5064_v16  ;;  %v4838_v24 = vld [vmem:[%s5578_s10 + $0x3a8] ss:$8 sps:$4 sm:$0xff]  }
  0xcb   : > { %1936 = vmatprep.mubr.bf16.mxu1 %v5064_v16 }
  0xcc   : > { %1764 = vmatpush1.bf16.msra.mxu0 %v4761_v25  ;;  %v4843_v25 = vld [vmem:[%s5578_s10 + $0x354] ss:$8 sps:$4 sm:$0xff]  }
  0xcd   : > { %1907 = vmatpush1.bf16.msra.mxu1 %v4764_v26  ;;  %1765 = vmatprep.subr.bf16.mxu0 %v4769_v27  ;;  %v4846_v26 = vld [vmem:[%s5578_s10 + $0x3bc] ss:$8 sps:$4 sm:$0xff]   ;;  %v4841_v27 = vld [vmem:[%s5578_s10 + $0x350] ss:$8 sps:$4 sm:$0xff]  }
  0xce   : > { %1908 = vmatprep.subr.bf16.mxu1 %v4772_v28  ;;  %v4844_v28 = vld [vmem:[%s5578_s10 + $0x3b8] ss:$8 sps:$4 sm:$0xff]  }
  0xd0   : > { %1766 = vmatpush1.bf16.msra.mxu0 %v4767_v29  ;;  %v4849_v29 = vld [vmem:[%s5578_s10 + $0x364] ss:$8 sps:$4 sm:$0xff]  }
  0xd1   : > { %1909 = vmatpush1.bf16.msra.mxu1 %v4770_v30  ;;  %1767 = vmatprep.subr.bf16.mxu0 %v4775_v31  ;;  %v4852_v30 = vld [vmem:[%s5578_s10 + $0x3cc] ss:$8 sps:$4 sm:$0xff]   ;;  %v4847_v31 = vld [vmem:[%s5578_s10 + $0x360] ss:$8 sps:$4 sm:$0xff]  }
  0xd2   : > { %1910 = vmatprep.subr.bf16.mxu1 %v4778_v32  ;;  %v4850_v32 = vld [vmem:[%s5578_s10 + $0x3c8] ss:$8 sps:$4 sm:$0xff]  }
  0xd4   : > { %1768 = vmatpush1.bf16.msra.mxu0 %v4773_v33  ;;  %v4855_v33 = vld [vmem:[%s5578_s10 + $0x374] ss:$8 sps:$4 sm:$0xff]  }
  0xd5   : > { %1911 = vmatpush1.bf16.msra.mxu1 %v4776_v34  ;;  %1769 = vmatprep.subr.bf16.mxu0 %v4781_v35  ;;  %v4858_v34 = vld [vmem:[%s5578_s10 + $0x3dc] ss:$8 sps:$4 sm:$0xff]   ;;  %v4853_v35 = vld [vmem:[%s5578_s10 + $0x370] ss:$8 sps:$4 sm:$0xff]  }
  0xd6   : > { %1912 = vmatprep.subr.bf16.mxu1 %v4784_v36  ;;  %v4856_v36 = vld [vmem:[%s5578_s10 + $0x3d8] ss:$8 sps:$4 sm:$0xff]  }
  0xd8   : > { %1770 = vmatpush1.bf16.msra.mxu0 %v4779_v37  ;;  %v4861_v37 = vld [vmem:[%s5578_s10 + $0x384] ss:$8 sps:$4 sm:$0xff]  }
  0xd9   : > { %1913 = vmatpush1.bf16.msra.mxu1 %v4782_v38  ;;  %1771 = vmatprep.subr.bf16.mxu0 %v4787_v39  ;;  %v4864_v38 = vld [vmem:[%s5578_s10 + $0x3ec] ss:$8 sps:$4 sm:$0xff]   ;;  %v4859_v39 = vld [vmem:[%s5578_s10 + $0x380] ss:$8 sps:$4 sm:$0xff]  }
  0xda   : > { %1914 = vmatprep.subr.bf16.mxu1 %v4790_v40  ;;  %v4862_v40 = vld [vmem:[%s5578_s10 + $0x3e8] ss:$8 sps:$4 sm:$0xff]  }
  0xdc   : > { %1772 = vmatpush1.bf16.msra.mxu0 %v4785_v43  ;;  %v4296_v43 = vld [vmem:[%s5578_s10 + $0x3a0] sm:$0x33] }
  0xdd   : > { %1915 = vmatpush1.bf16.msra.mxu1 %v4788_v44  ;;  %4187 = vmatprep.subr.msk.bf16.mxu0 %vm1183_vm0, %v4186_v45  ;;  %v4327_v44 = vld [vmem:[%s5578_s10 + $0x408] sm:$0x33]  ;;  %v4865_v45 = vld [vmem:[%s5578_s10 + $0x390] ss:$8 sps:$4 sm:$0xff]   ;;  %v4310_v47 = vcombine.high %v4296_v43, %v4296_v43 }
  0xde   : > { %4218 = vmatprep.subr.msk.bf16.mxu1 %vm1183_vm0, %v4217_v46  ;;  %v4868_v46 = vld [vmem:[%s5578_s10 + $0x3f8] ss:$8 sps:$4 sm:$0xff]   ;;  %v4341_v48 = vcombine.high %v4327_v44, %v4327_v44 }
  0xe0   : > { %1774 = vmatpush1.bf16.msra.mxu0 %v1756_v50  ;;  %v4340_v50 = vcombine.low %v4327_v44, %v4327_v44  ;;  %v4420_v44 = vld [vmem:[%s5578_s10 + $0x540] sm:$0x33] }
  0xe1   : > { %1917 = vmatpush1.bf16.msra.mxu1 %v1899_v52  ;;  %2047 = vmatprep.subr.bf16.mxu0 %v4797_v49  ;;  %v4309_v49 = vcombine.low %v4296_v43, %v4296_v43  ;;  %v4950_v43 = vld [vmem:[%s5578_s10 + $0x59c] ss:$8 sps:$4 sm:$0xff]  }
  0xe2   : > { %2190 = vmatprep.subr.bf16.mxu1 %v4800_v53  ;;  %v2471_v53 = vsel %vm1183_vm0, %v4340_v50, 0  ;;  %v4433_v50 = vcombine.low %v4420_v44, %v4420_v44 }
  0xe3   : > { %4188 = vmatmul.mubr.msk.bf16.vlgmr.msra.gmra.mrb[8].mxu0 %vm1179_vm1, %v5615_v51  ;;  %v2328_v52 = vsel %vm1183_vm0, %v4309_v49, 0 }
  0xe4   : > { %4219 = vmatmul.mubr.msk.bf16.vlgmr.msra.gmra.mrb[8].mxu1 %vm1179_vm1, %v5615_v51  ;;  %2048 = vmatpush1.bf16.msra.mxu0 %v4795_v54  ;;  %v4877_v54 = vld [vmem:[%s5578_s10 + $0x414] ss:$8 sps:$4 sm:$0xff]  }
  0xe5   : > { %2191 = vmatpush1.bf16.msra.mxu1 %v4798_v55  ;;  %2049 = vmatprep.subr.bf16.mxu0 %v4803_v56  ;;  %v4880_v55 = vld [vmem:[%s5578_s10 + $0x47c] ss:$8 sps:$4 sm:$0xff]   ;;  %v4875_v56 = vld [vmem:[%s5578_s10 + $0x410] ss:$8 sps:$4 sm:$0xff]  }
  0xe6   : > { %2192 = vmatprep.subr.bf16.mxu1 %v4806_v57  ;;  %2079 = vmatprep.mubr.bf16.mxu0 %v5064_v16  ;;  %v4878_v57 = vld [vmem:[%s5578_s10 + $0x478] ss:$8 sps:$4 sm:$0xff]  }
  0xe7   : > { %2222 = vmatprep.mubr.bf16.mxu1 %v5064_v16 }
  0xe8   : > { %2050 = vmatpush1.bf16.msra.mxu0 %v4801_v58  ;;  %v4883_v58 = vld [vmem:[%s5578_s10 + $0x424] ss:$8 sps:$4 sm:$0xff]  }
  0xe9   : > { %2193 = vmatpush1.bf16.msra.mxu1 %v4804_v59  ;;  %2051 = vmatprep.subr.bf16.mxu0 %v4809_v60  ;;  %v4886_v59 = vld [vmem:[%s5578_s10 + $0x48c] ss:$8 sps:$4 sm:$0xff]   ;;  %v4881_v60 = vld [vmem:[%s5578_s10 + $0x420] ss:$8 sps:$4 sm:$0xff]  }
  0xea   : > { %2194 = vmatprep.subr.bf16.mxu1 %v4812_v61  ;;  %v4884_v61 = vld [vmem:[%s5578_s10 + $0x488] ss:$8 sps:$4 sm:$0xff]  }
  0xec   : > { %2052 = vmatpush1.bf16.msra.mxu0 %v4807_v62  ;;  %v4889_v62 = vld [vmem:[%s5578_s10 + $0x434] ss:$8 sps:$4 sm:$0xff]  }
  0xed   : > { %2195 = vmatpush1.bf16.msra.mxu1 %v4810_v63  ;;  %2053 = vmatprep.subr.bf16.mxu0 %v4815_v0  ;;  %v4892_v63 = vld [vmem:[%s5578_s10 + $0x49c] ss:$8 sps:$4 sm:$0xff]   ;;  %v4887_v0 = vld [vmem:[%s5578_s10 + $0x430] ss:$8 sps:$4 sm:$0xff]  }
  0xee   : > { %2196 = vmatprep.subr.bf16.mxu1 %v4818_v1  ;;  %v4890_v1 = vld [vmem:[%s5578_s10 + $0x498] ss:$8 sps:$4 sm:$0xff]  }
  0xf0   : > { %2054 = vmatpush1.bf16.msra.mxu0 %v4813_v2  ;;  %v4895_v2 = vld [vmem:[%s5578_s10 + $0x444] ss:$8 sps:$4 sm:$0xff]  }
  0xf1   : > { %2197 = vmatpush1.bf16.msra.mxu1 %v4816_v3  ;;  %2055 = vmatprep.subr.bf16.mxu0 %v4821_v4  ;;  %v4898_v3 = vld [vmem:[%s5578_s10 + $0x4ac] ss:$8 sps:$4 sm:$0xff]   ;;  %v4893_v4 = vld [vmem:[%s5578_s10 + $0x440] ss:$8 sps:$4 sm:$0xff]  }
  0xf2   : > { %2198 = vmatprep.subr.bf16.mxu1 %v4824_v5  ;;  %v4896_v5 = vld [vmem:[%s5578_s10 + $0x4a8] ss:$8 sps:$4 sm:$0xff]  }
  0xf4   : > { %2056 = vmatpush1.bf16.msra.mxu0 %v4819_v6  ;;  %v4901_v6 = vld [vmem:[%s5578_s10 + $0x454] ss:$8 sps:$4 sm:$0xff]  }
  0xf5   : > { %2199 = vmatpush1.bf16.msra.mxu1 %v4822_v7  ;;  %2057 = vmatprep.subr.bf16.mxu0 %v4827_v8  ;;  %v4904_v7 = vld [vmem:[%s5578_s10 + $0x4bc] ss:$8 sps:$4 sm:$0xff]   ;;  %v4899_v8 = vld [vmem:[%s5578_s10 + $0x450] ss:$8 sps:$4 sm:$0xff]  }
  0xf6   : > { %2200 = vmatprep.subr.bf16.mxu1 %v4830_v9  ;;  %v4902_v9 = vld [vmem:[%s5578_s10 + $0x4b8] ss:$8 sps:$4 sm:$0xff]  }
  0xf8   : > { %2058 = vmatpush1.bf16.msra.mxu0 %v4825_v12  ;;  %v4358_v12 = vld [vmem:[%s5578_s10 + $0x470] sm:$0x33] }
  0xf9   : > { %2201 = vmatpush1.bf16.msra.mxu1 %v4828_v13  ;;  %4249 = vmatprep.subr.msk.bf16.mxu0 %vm1183_vm0, %v4248_v14  ;;  %v4389_v13 = vld [vmem:[%s5578_s10 + $0x4d8] sm:$0x33]  ;;  %v4905_v14 = vld [vmem:[%s5578_s10 + $0x460] ss:$8 sps:$4 sm:$0xff]   ;;  %v4372_v17 = vcombine.high %v4358_v12, %v4358_v12 }
  0xfa   : > { %4280 = vmatprep.subr.msk.bf16.mxu1 %vm1183_vm0, %v4279_v15  ;;  %v4908_v15 = vld [vmem:[%s5578_s10 + $0x4c8] ss:$8 sps:$4 sm:$0xff]   ;;  %v4403_v18 = vcombine.high %v4389_v13, %v4389_v13 }
  0xfc   : > { %2060 = vmatpush1.bf16.msra.mxu0 %v2042_v20  ;;  %v4402_v20 = vcombine.low %v4389_v13, %v4389_v13  ;;  %v4482_v13 = vld [vmem:[%s5578_s10 + $0x610] sm:$0x33] }
  0xfd   : > { %2203 = vmatpush1.bf16.msra.mxu1 %v2185_v21  ;;  %2333 = vmatprep.subr.bf16.mxu0 %v4837_v19  ;;  %v4371_v19 = vcombine.low %v4358_v12, %v4358_v12  ;;  %v4990_v12 = vld [vmem:[%s5578_s10 + $0x66c] ss:$8 sps:$4 sm:$0xff]  }
  0xfe   : > { %2476 = vmatprep.subr.bf16.mxu1 %v4840_v22  ;;  %v2757_v22 = vsel %vm1183_vm0, %v4402_v20, 0  ;;  %v4495_v20 = vcombine.low %v4482_v13, %v4482_v13 }
  0xff   : > { %4250 = vmatmul.mubr.msk.bf16.vlgmr.msra.gmra.mrb[12].mxu0 %vm1179_vm1, %v5615_v51  ;;  %v2614_v21 = vsel %vm1183_vm0, %v4371_v19, 0 }
 0x100   : > { %4281 = vmatmul.mubr.msk.bf16.vlgmr.msra.gmra.mrb[12].mxu1 %vm1179_vm1, %v5615_v51  ;;  %2334 = vmatpush1.bf16.msra.mxu0 %v4835_v23  ;;  %v4917_v23 = vld [vmem:[%s5578_s10 + $0x4e4] ss:$8 sps:$4 sm:$0xff]  }
 0x101   : > { %2477 = vmatpush1.bf16.msra.mxu1 %v4838_v24  ;;  %2335 = vmatprep.subr.bf16.mxu0 %v4843_v25  ;;  %v4920_v24 = vld [vmem:[%s5578_s10 + $0x54c] ss:$8 sps:$4 sm:$0xff]   ;;  %v4915_v25 = vld [vmem:[%s5578_s10 + $0x4e0] ss:$8 sps:$4 sm:$0xff]  }
 0x102   : > { %2478 = vmatprep.subr.bf16.mxu1 %v4846_v26  ;;  %2365 = vmatprep.mubr.bf16.mxu0 %v5064_v16  ;;  %v4918_v26 = vld [vmem:[%s5578_s10 + $0x548] ss:$8 sps:$4 sm:$0xff]  }
 0x103   : > { %2508 = vmatprep.mubr.bf16.mxu1 %v5064_v16 }
 0x104   : > { %2336 = vmatpush1.bf16.msra.mxu0 %v4841_v27  ;;  %v4923_v27 = vld [vmem:[%s5578_s10 + $0x4f4] ss:$8 sps:$4 sm:$0xff]  }
 0x105   : > { %2479 = vmatpush1.bf16.msra.mxu1 %v4844_v28  ;;  %2337 = vmatprep.subr.bf16.mxu0 %v4849_v29  ;;  %v4926_v28 = vld [vmem:[%s5578_s10 + $0x55c] ss:$8 sps:$4 sm:$0xff]   ;;  %v4921_v29 = vld [vmem:[%s5578_s10 + $0x4f0] ss:$8 sps:$4 sm:$0xff]  }
 0x106   : > { %2480 = vmatprep.subr.bf16.mxu1 %v4852_v30  ;;  %v4924_v30 = vld [vmem:[%s5578_s10 + $0x558] ss:$8 sps:$4 sm:$0xff]  }
 0x108   : > { %2338 = vmatpush1.bf16.msra.mxu0 %v4847_v31  ;;  %v4929_v31 = vld [vmem:[%s5578_s10 + $0x504] ss:$8 sps:$4 sm:$0xff]  }
 0x109   : > { %2481 = vmatpush1.bf16.msra.mxu1 %v4850_v32  ;;  %2339 = vmatprep.subr.bf16.mxu0 %v4855_v33  ;;  %v4932_v32 = vld [vmem:[%s5578_s10 + $0x56c] ss:$8 sps:$4 sm:$0xff]   ;;  %v4930_v33 = vld [vmem:[%s5578_s10 + $0x568] ss:$8 sps:$4 sm:$0xff]  }
 0x10a   : > { %2482 = vmatprep.subr.bf16.mxu1 %v4858_v34  ;;  %v4935_v34 = vld [vmem:[%s5578_s10 + $0x514] ss:$8 sps:$4 sm:$0xff]  }
 0x10c   : > { %2340 = vmatpush1.bf16.msra.mxu0 %v4853_v35  ;;  %v4938_v35 = vld [vmem:[%s5578_s10 + $0x57c] ss:$8 sps:$4 sm:$0xff]  }
 0x10d   : > { %2483 = vmatpush1.bf16.msra.mxu1 %v4856_v36  ;;  %2341 = vmatprep.subr.bf16.mxu0 %v4861_v37  ;;  %v4933_v36 = vld [vmem:[%s5578_s10 + $0x510] ss:$8 sps:$4 sm:$0xff]  }
 0x10e   : > { %2484 = vmatprep.subr.bf16.mxu1 %v4864_v38  ;;  %v4936_v37 = vld [vmem:[%s5578_s10 + $0x578] ss:$8 sps:$4 sm:$0xff]   ;;  %v4941_v38 = vld [vmem:[%s5578_s10 + $0x524] ss:$8 sps:$4 sm:$0xff]  }
 0x110   : > { %2342 = vmatpush1.bf16.msra.mxu0 %v4859_v39  ;;  %v4944_v39 = vld [vmem:[%s5578_s10 + $0x58c] ss:$8 sps:$4 sm:$0xff]  }
 0x111   : > { %2485 = vmatpush1.bf16.msra.mxu1 %v4862_v40  ;;  %2343 = vmatprep.subr.bf16.mxu0 %v4867_v41  ;;  %v4939_v40 = vld [vmem:[%s5578_s10 + $0x520] ss:$8 sps:$4 sm:$0xff]  }
 0x112   : > { %2486 = vmatprep.subr.bf16.mxu1 %v4870_v42  ;;  %v4942_v41 = vld [vmem:[%s5578_s10 + $0x588] ss:$8 sps:$4 sm:$0xff]   ;;  %v4947_v42 = vld [vmem:[%s5578_s10 + $0x534] ss:$8 sps:$4 sm:$0xff]  }
 0x114   : > { %2344 = vmatpush1.bf16.msra.mxu0 %v4865_v45  ;;  %v4451_v45 = vld [vmem:[%s5578_s10 + $0x5a8] sm:$0x33] }
 0x115   : > { %2487 = vmatpush1.bf16.msra.mxu1 %v4868_v46  ;;  %4311 = vmatprep.subr.msk.bf16.mxu0 %vm1183_vm0, %v4310_v47  ;;  %v4945_v46 = vld [vmem:[%s5578_s10 + $0x530] ss:$8 sps:$4 sm:$0xff]   ;;  %v4465_v49 = vcombine.high %v4451_v45, %v4451_v45 }
 0x116   : > { %4342 = vmatprep.subr.msk.bf16.mxu1 %vm1183_vm0, %v4341_v48  ;;  %v4948_v47 = vld [vmem:[%s5578_s10 + $0x598] ss:$8 sps:$4 sm:$0xff]   ;;  %v4434_v48 = vcombine.high %v4420_v44, %v4420_v44 }
 0x118   : > { %2346 = vmatpush1.bf16.msra.mxu0 %v2328_v52  ;;  %v4464_v52 = vcombine.low %v4451_v45, %v4451_v45 }
 0x119   : > { %2489 = vmatpush1.bf16.msra.mxu1 %v2471_v53  ;;  %2619 = vmatprep.subr.bf16.mxu0 %v4877_v54  ;;  %v2900_v53 = vsel %vm1183_vm0, %v4433_v50, 0 }
 0x11a   : > { %2762 = vmatprep.subr.bf16.mxu1 %v4880_v55  ;;  %v3043_v54 = vsel %vm1183_vm0, %v4464_v52, 0  ;;  %v4957_v55 = vld [vmem:[%s5578_s10 + $0x5b4] ss:$8 sps:$4 sm:$0xff]  }
 0x11b   : > { %4312 = vmatmul.mubr.msk.bf16.vlgmr.msra.gmra.mrb[16].mxu0 %vm1179_vm1, %v5615_v51 }
 0x11c   : > { %4343 = vmatmul.mubr.msk.bf16.vlgmr.msra.gmra.mrb[16].mxu1 %vm1179_vm1, %v5615_v51  ;;  %2620 = vmatpush1.bf16.msra.mxu0 %v4875_v56  ;;  %v4960_v56 = vld [vmem:[%s5578_s10 + $0x61c] ss:$8 sps:$4 sm:$0xff]  }
 0x11d   : > { %2763 = vmatpush1.bf16.msra.mxu1 %v4878_v57  ;;  %2621 = vmatprep.subr.bf16.mxu0 %v4883_v58  ;;  %v4955_v57 = vld [vmem:[%s5578_s10 + $0x5b0] ss:$8 sps:$4 sm:$0xff]  }
 0x11e   : > { %2764 = vmatprep.subr.bf16.mxu1 %v4886_v59  ;;  %2651 = vmatprep.mubr.bf16.mxu0 %v5064_v16  ;;  %v4958_v58 = vld [vmem:[%s5578_s10 + $0x618] ss:$8 sps:$4 sm:$0xff]   ;;  %v4963_v59 = vld [vmem:[%s5578_s10 + $0x5c4] ss:$8 sps:$4 sm:$0xff]  }
 0x11f   : > { %2794 = vmatprep.mubr.bf16.mxu1 %v5064_v16 }
 0x120   : > { %2622 = vmatpush1.bf16.msra.mxu0 %v4881_v60  ;;  %v4966_v60 = vld [vmem:[%s5578_s10 + $0x62c] ss:$8 sps:$4 sm:$0xff]  }
 0x121   : > { %2765 = vmatpush1.bf16.msra.mxu1 %v4884_v61  ;;  %2623 = vmatprep.subr.bf16.mxu0 %v4889_v62  ;;  %v4999_v61 = vld [vmem:[%s6284_s0] sm:$0xf] }
 0x122   : > { %2766 = vmatprep.subr.bf16.mxu1 %v4892_v63  ;;  %v4961_v62 = vld [vmem:[%s5578_s10 + $0x5c0] ss:$8 sps:$4 sm:$0xff]  }
 0x123   : > { %v4964_v63 = vld [vmem:[%s5578_s10 + $0x628] ss:$8 sps:$4 sm:$0xff]  }
 0x124   : > { %2624 = vmatpush1.bf16.msra.mxu0 %v4887_v0  ;;  %v4969_v0 = vld [vmem:[%s5578_s10 + $0x5d4] ss:$8 sps:$4 sm:$0xff]  }
 0x125   : > { %2767 = vmatpush1.bf16.msra.mxu1 %v4890_v1  ;;  %2625 = vmatprep.subr.bf16.mxu0 %v4895_v2  ;;  %v4972_v1 = vld [vmem:[%s5578_s10 + $0x63c] ss:$8 sps:$4 sm:$0xff]   ;;  %v4967_v2 = vld [vmem:[%s5578_s10 + $0x5d0] ss:$8 sps:$4 sm:$0xff]  }
 0x126   : > { %2768 = vmatprep.subr.bf16.mxu1 %v4898_v3  ;;  %v4970_v3 = vld [vmem:[%s5578_s10 + $0x638] ss:$8 sps:$4 sm:$0xff]  }
 0x128   : > { %2626 = vmatpush1.bf16.msra.mxu0 %v4893_v4  ;;  %v4975_v4 = vld [vmem:[%s5578_s10 + $0x5e4] ss:$8 sps:$4 sm:$0xff]  }
 0x129   : > { %2769 = vmatpush1.bf16.msra.mxu1 %v4896_v5  ;;  %2627 = vmatprep.subr.bf16.mxu0 %v4901_v6  ;;  %v4978_v5 = vld [vmem:[%s5578_s10 + $0x64c] ss:$8 sps:$4 sm:$0xff]   ;;  %v4973_v6 = vld [vmem:[%s5578_s10 + $0x5e0] ss:$8 sps:$4 sm:$0xff]  }
 0x12a   : > { %2770 = vmatprep.subr.bf16.mxu1 %v4904_v7  ;;  %v4976_v7 = vld [vmem:[%s5578_s10 + $0x648] ss:$8 sps:$4 sm:$0xff]  }
 0x12c   : > { %2628 = vmatpush1.bf16.msra.mxu0 %v4899_v8  ;;  %v4984_v8 = vld [vmem:[%s5578_s10 + $0x65c] ss:$8 sps:$4 sm:$0xff]  }
 0x12d   : > { %2771 = vmatpush1.bf16.msra.mxu1 %v4902_v9  ;;  %2629 = vmatprep.subr.bf16.mxu0 %v4907_v10  ;;  %v4979_v9 = vld [vmem:[%s5578_s10 + $0x5f0] ss:$8 sps:$4 sm:$0xff]  }
 0x12e   : > { %2772 = vmatprep.subr.bf16.mxu1 %v4910_v11  ;;  %v4982_v10 = vld [vmem:[%s5578_s10 + $0x658] ss:$8 sps:$4 sm:$0xff]   ;;  %v4987_v11 = vld [vmem:[%s5578_s10 + $0x604] ss:$8 sps:$4 sm:$0xff]  }
 0x130   : > { %2630 = vmatpush1.bf16.msra.mxu0 %v4905_v14  ;;  %v4513_v14 = vld [vmem:[%s5578_s10 + $0x678] sm:$0x33] }
 0x131   : > { %2773 = vmatpush1.bf16.msra.mxu1 %v4908_v15  ;;  %4373 = vmatprep.subr.msk.bf16.mxu0 %vm1183_vm0, %v4372_v17  ;;  %v4985_v15 = vld [vmem:[%s5578_s10 + $0x600] ss:$8 sps:$4 sm:$0xff]   ;;  %v4527_v19 = vcombine.high %v4513_v14, %v4513_v14 }
 0x132   : > { %4404 = vmatprep.subr.msk.bf16.mxu1 %vm1183_vm0, %v4403_v18  ;;  %v4988_v17 = vld [vmem:[%s5578_s10 + $0x668] ss:$8 sps:$4 sm:$0xff]   ;;  %v4496_v18 = vcombine.high %v4482_v13, %v4482_v13 }
 0x134   : > { %2632 = vmatpush1.bf16.msra.mxu0 %v2614_v21  ;;  %v4526_v21 = vcombine.low %v4513_v14, %v4513_v14 }
 0x135   : > { %2775 = vmatpush1.bf16.msra.mxu1 %v2757_v22  ;;  %2905 = vmatprep.subr.bf16.mxu0 %v4917_v23  ;;  %v3186_v22 = vsel %vm1183_vm0, %v4495_v20, 0 }
 0x136   : > { %3048 = vmatprep.subr.bf16.mxu1 %v4920_v24  ;;  %v3329_v23 = vsel %vm1183_vm0, %v4526_v21, 0 }
 0x137   : > { %4374 = vmatmul.mubr.msk.bf16.vlgmr.msra.gmra.mrb[20].mxu0 %vm1179_vm1, %v5615_v51 }
 0x138   : > { %4405 = vmatmul.mubr.msk.bf16.vlgmr.msra.gmra.mrb[20].mxu1 %vm1179_vm1, %v5615_v51  ;;  %2906 = vmatpush1.bf16.msra.mxu0 %v4915_v25  ;;  %v4927_v51 = vld [vmem:[%s5578_s10 + $0x500] ss:$8 sps:$4 sm:$0xff]  }
 0x139   : > { %3049 = vmatpush1.bf16.msra.mxu1 %v4918_v26  ;;  %2907 = vmatprep.subr.bf16.mxu0 %v4923_v27 }
 0x13a   : > { %3050 = vmatprep.subr.bf16.mxu1 %v4926_v28  ;;  %2937 = vmatprep.mubr.bf16.mxu0 %v5064_v16 }
 0x13b   : > { %3080 = vmatprep.mubr.bf16.mxu1 %v5064_v16 }
 0x13c   : > { %2908 = vmatpush1.bf16.msra.mxu0 %v4921_v29 }
 0x13d   : > { %3051 = vmatpush1.bf16.msra.mxu1 %v4924_v30  ;;  %2909 = vmatprep.subr.bf16.mxu0 %v4929_v31 }
 0x13e   : > { %3052 = vmatprep.subr.bf16.mxu1 %v4932_v32 }
 0x140   : > { %2910 = vmatpush1.bf16.msra.mxu0 %v4927_v51 }
 0x141   : > { %3053 = vmatpush1.bf16.msra.mxu1 %v4930_v33  ;;  %2911 = vmatprep.subr.bf16.mxu0 %v4935_v34 }
 0x142   : > { %3054 = vmatprep.subr.bf16.mxu1 %v4938_v35 }
 0x144   : > { %2912 = vmatpush1.bf16.msra.mxu0 %v4933_v36 }
 0x145   : > { %3055 = vmatpush1.bf16.msra.mxu1 %v4936_v37  ;;  %2913 = vmatprep.subr.bf16.mxu0 %v4941_v38 }
 0x146   : > { %3056 = vmatprep.subr.bf16.mxu1 %v4944_v39 }
 0x148   : > { %2914 = vmatpush1.bf16.msra.mxu0 %v4939_v40 }
 0x149   : > { %3057 = vmatpush1.bf16.msra.mxu1 %v4942_v41  ;;  %2915 = vmatprep.subr.bf16.mxu0 %v4947_v42 }
 0x14a   : > { %3058 = vmatprep.subr.bf16.mxu1 %v4950_v43 }
 0x14c   : > { %2916 = vmatpush1.bf16.msra.mxu0 %v4945_v46 }
 0x14d   : > { %3059 = vmatpush1.bf16.msra.mxu1 %v4948_v47  ;;  %4435 = vmatprep.subr.msk.bf16.mxu0 %vm1183_vm0, %v4434_v48 }
 0x14e   : > { %4466 = vmatprep.subr.msk.bf16.mxu1 %vm1183_vm0, %v4465_v49 }
 0x150   : > { %2918 = vmatpush1.bf16.msra.mxu0 %v2900_v53 }
 0x151   : > { %3061 = vmatpush1.bf16.msra.mxu1 %v3043_v54  ;;  %3191 = vmatprep.subr.bf16.mxu0 %v4957_v55 }
 0x152   : > { %3334 = vmatprep.subr.bf16.mxu1 %v4960_v56 }
 0x153   : > { %4436 = vmatmul.mubr.msk.bf16.vlgmr.msra.gmra.mrb[24].mxu0 %vm1179_vm1, %v4999_v61 }
 0x154   : > { %4467 = vmatmul.mubr.msk.bf16.vlgmr.msra.gmra.mrb[24].mxu1 %vm1179_vm1, %v4999_v61  ;;  %3192 = vmatpush1.bf16.msra.mxu0 %v4955_v57 }
 0x155   : > { %3335 = vmatpush1.bf16.msra.mxu1 %v4958_v58  ;;  %3193 = vmatprep.subr.bf16.mxu0 %v4963_v59 }
 0x156   : > { %3336 = vmatprep.subr.bf16.mxu1 %v4966_v60  ;;  %3223 = vmatprep.mubr.bf16.mxu0 %v5064_v16 }
 0x157   : > { %3366 = vmatprep.mubr.bf16.mxu1 %v5064_v16  ;;  %v4981_v16 = vld [vmem:[%s5578_s10 + $0x5f4] ss:$8 sps:$4 sm:$0xff]  }
 0x158   : > { %3194 = vmatpush1.bf16.msra.mxu0 %v4961_v62 }
 0x159   : > { %3337 = vmatpush1.bf16.msra.mxu1 %v4964_v63  ;;  %3195 = vmatprep.subr.bf16.mxu0 %v4969_v0 }
 0x15a   : > { %3338 = vmatprep.subr.bf16.mxu1 %v4972_v1 }
 0x15c   : > { %3196 = vmatpush1.bf16.msra.mxu0 %v4967_v2 }
 0x15d   : > { %3339 = vmatpush1.bf16.msra.mxu1 %v4970_v3  ;;  %3197 = vmatprep.subr.bf16.mxu0 %v4975_v4 }
 0x15e   : > { %3340 = vmatprep.subr.bf16.mxu1 %v4978_v5 }
 0x160   : > { %3198 = vmatpush1.bf16.msra.mxu0 %v4973_v6 }
 0x161   : > { %3341 = vmatpush1.bf16.msra.mxu1 %v4976_v7  ;;  %3199 = vmatprep.subr.bf16.mxu0 %v4981_v16 }
 0x162   : > { %3342 = vmatprep.subr.bf16.mxu1 %v4984_v8 }
 0x164   : > { %3200 = vmatpush1.bf16.msra.mxu0 %v4979_v9 }
 0x165   : > { %3343 = vmatpush1.bf16.msra.mxu1 %v4982_v10  ;;  %3201 = vmatprep.subr.bf16.mxu0 %v4987_v11 }
 0x166   : > { %3344 = vmatprep.subr.bf16.mxu1 %v4990_v12 }
 0x168   : > { %3202 = vmatpush1.bf16.msra.mxu0 %v4985_v15 }
 0x169   : > { %3345 = vmatpush1.bf16.msra.mxu1 %v4988_v17  ;;  %4497 = vmatprep.subr.msk.bf16.mxu0 %vm1183_vm0, %v4496_v18 }
 0x16a   : > { %4528 = vmatprep.subr.msk.bf16.mxu1 %vm1183_vm0, %v4527_v19 }
 0x16c   : > { %3204 = vmatpush1.bf16.msra.mxu0 %v3186_v22 }
 0x16d   : > { %3347 = vmatpush1.bf16.msra.mxu1 %v3329_v23 }
 0x16f   : > { %4498 = vmatmul.mubr.msk.bf16.vlgmr.msra.gmra.mrb[28].mxu0 %vm1179_vm1, %v4999_v61 }
 0x170   : > { %4529 = vmatmul.mubr.msk.bf16.vlgmr.msra.gmra.mrb[28].mxu1 %vm1179_vm1, %v4999_v61 }
 0x17e   : > { %v5870_v24 = vpop.f32.mrb[0].mxu0 }
 0x17f   : > { %v5872_v25 = vpop.f32.mrb[0].mxu1  ;;  %v1233_v26 = vrot.slane %v5870_v24, 4  ;;  %v5876_v28 = vpop.f32.mrb[1].mxu0 }
 0x180   : > { %v1376_v27 = vrot.slane %v5872_v25, 4  ;;  %v5878_v29 = vpop.f32.mrb[1].mxu1  ;;  %v1239_v30 = vrot.slane %v5876_v28, 4  ;;  %v1228_v32 = vpop.f32.mrb[2].mxu0 }
 0x181   : > { %v1382_v31 = vrot.slane %v5878_v29, 4  ;;  %v1370_v51 = vpop.f32.mrb[2].mxu1  ;;  %v1234_v33 = vadd.f32 %v1233_v26, %v5870_v24  ;;  %v1229_v35 = vpop.f32.mrb[3].mxu0 }
 0x182   : > { %v1377_v34 = vadd.f32 %v1376_v27, %v5872_v25  ;;  %v1371_v36 = vpop.f32.mrb[3].mxu1  ;;  %v1240_v37 = vadd.f32 %v1239_v30, %v5876_v28 }
 0x183   : > { %v1383_v38 = vadd.f32 %v1382_v31, %v5878_v29  ;;  %v1235_v39 = vrot.slane %v1234_v33, 2 }
 0x184   : > { %v1378_v40 = vrot.slane %v1377_v34, 2  ;;  %v1241_v41 = vrot.slane %v1240_v37, 2 }
 0x185   : > { %v1384_v42 = vrot.slane %v1383_v38, 2  ;;  %v1236_v43 = vadd.f32 %v1235_v39, %v1234_v33 }
 0x186   : > { %v1379_v44 = vadd.f32 %v1378_v40, %v1377_v34  ;;  %v1242_v45 = vadd.f32 %v1241_v41, %v1240_v37 }
 0x187   : > { %v1385_v46 = vadd.f32 %v1384_v42, %v1383_v38  ;;  %v1237_v47 = vrot.slane %v1236_v43, 1 }
 0x188   : > { %v1380_v48 = vrot.slane %v1379_v44, 1  ;;  %v1243_v49 = vrot.slane %v1242_v45, 1 }
 0x189   : > { %v1386_v50 = vrot.slane %v1385_v46, 1  ;;  %v1238_v52 = vadd.f32 %v1237_v47, %v1236_v43 }
 0x18a   : > { %v1381_v53 = vadd.f32 %v1380_v48, %v1379_v44  ;;  %v1244_v54 = vadd.f32 %v1243_v49, %v1242_v45 }
 0x18b   : > { %v1387_v55 = vadd.f32 %v1386_v50, %v1385_v46 }
 0x18c   : > { %v1388_v56 = vadd.f32 %v1381_v53, %v1238_v52 }
 0x18d   : > { %v1389_v57 = vadd.f32 %v1387_v55, %v1244_v54 }
 0x19a   : > { %v5886_v58 = vpop.f32.mrb[4].mxu0 }
 0x19b   : > { %6300 = vst [vmem:[#allocation6_spill] sm:$0xff] %v5886_v58  ;;  %v5888_v59 = vpop.f32.mrb[4].mxu1  ;;  %v1519_v60 = vrot.slane %v5886_v58, 4  ;;  %v5892_v62 = vpop.f32.mrb[5].mxu0 }
 0x19c   : > { %6301 = vst [vmem:[#allocation7_spill] sm:$0xff] %v5888_v59  ;;  %v1662_v61 = vrot.slane %v5888_v59, 4  ;;  %v5894_v63 = vpop.f32.mrb[5].mxu1  ;;  %v1525_v0 = vrot.slane %v5892_v62, 4  ;;  %v1513_v2 = vpop.f32.mrb[6].mxu0 }
 0x19d   : > { %v1668_v1 = vrot.slane %v5894_v63, 4  ;;  %v1656_v3 = vpop.f32.mrb[6].mxu1  ;;  %v1520_v4 = vadd.f32 %v1519_v60, %v5886_v58  ;;  %v1514_v6 = vpop.f32.mrb[7].mxu0 }
 0x19e   : > { %v1663_v5 = vadd.f32 %v1662_v61, %v5888_v59  ;;  %v1657_v7 = vpop.f32.mrb[7].mxu1  ;;  %v1526_v16 = vadd.f32 %v1525_v0, %v5892_v62 }
 0x19f   : > { %v1669_v8 = vadd.f32 %v1668_v1, %v5894_v63  ;;  %v1521_v9 = vrot.slane %v1520_v4, 2 }
 0x1a0   : > { %v1664_v10 = vrot.slane %v1663_v5, 2  ;;  %v1527_v11 = vrot.slane %v1526_v16, 2 }
 0x1a1   : > { %v1670_v12 = vrot.slane %v1669_v8, 2  ;;  %v1522_v13 = vadd.f32 %v1521_v9, %v1520_v4 }
 0x1a2   : > { %v1665_v14 = vadd.f32 %v1664_v10, %v1663_v5  ;;  %v1528_v15 = vadd.f32 %v1527_v11, %v1526_v16 }
 0x1a3   : > { %v1671_v17 = vadd.f32 %v1670_v12, %v1669_v8  ;;  %v1523_v18 = vrot.slane %v1522_v13, 1 }
 0x1a4   : > { %v1666_v19 = vrot.slane %v1665_v14, 1  ;;  %v1529_v20 = vrot.slane %v1528_v15, 1 }
 0x1a5   : > { %v1672_v21 = vrot.slane %v1671_v17, 1  ;;  %v1524_v22 = vadd.f32 %v1523_v18, %v1522_v13 }
 0x1a6   : > { %v1530_v23 = vadd.f32 %v1529_v20, %v1528_v15  ;;  %v1667_v27 = vadd.f32 %v1666_v19, %v1665_v14 }
 0x1a7   : > { %v1531_v26 = vadd.f32 %v1524_v22, %v1388_v56  ;;  %v1673_v31 = vadd.f32 %v1672_v21, %v1671_v17 }
 0x1a8   : > { %v1532_v30 = vadd.f32 %v1530_v23, %v1389_v57 }
 0x1a9   : > { %v1674_v32 = vadd.f32 %v1667_v27, %v1531_v26 }
 0x1aa   : > { %v1675_v51 = vadd.f32 %v1673_v31, %v1532_v30 }
 0x1b6   : > { %v5902_v33 = vpop.f32.mrb[8].mxu0 }
 0x1b7   : > { %6302 = vst [vmem:[#allocation8_spill] sm:$0xff] %v5902_v33  ;;  %v5904_v34 = vpop.f32.mrb[8].mxu1  ;;  %v1805_v35 = vrot.slane %v5902_v33, 4  ;;  %v5908_v37 = vpop.f32.mrb[9].mxu0 }
 0x1b8   : > { %6303 = vst [vmem:[#allocation9_spill] sm:$0xff] %v5904_v34  ;;  %v1948_v36 = vrot.slane %v5904_v34, 4  ;;  %v5910_v38 = vpop.f32.mrb[9].mxu1  ;;  %v1811_v39 = vrot.slane %v5908_v37, 4  ;;  %v1799_v41 = vpop.f32.mrb[10].mxu0 }
 0x1b9   : > { %v1954_v40 = vrot.slane %v5910_v38, 4  ;;  %v1942_v42 = vpop.f32.mrb[10].mxu1  ;;  %v1806_v43 = vadd.f32 %v1805_v35, %v5902_v33  ;;  %v1800_v45 = vpop.f32.mrb[11].mxu0 }
 0x1ba   : > { %v1949_v44 = vadd.f32 %v1948_v36, %v5904_v34  ;;  %v1943_v46 = vpop.f32.mrb[11].mxu1  ;;  %v1812_v47 = vadd.f32 %v1811_v39, %v5908_v37 }
 0x1bb   : > { %v1955_v48 = vadd.f32 %v1954_v40, %v5910_v38  ;;  %v1807_v49 = vrot.slane %v1806_v43, 2 }
 0x1bc   : > { %v1950_v50 = vrot.slane %v1949_v44, 2  ;;  %v1813_v52 = vrot.slane %v1812_v47, 2 }
 0x1bd   : > { %v1956_v53 = vrot.slane %v1955_v48, 2  ;;  %v1808_v54 = vadd.f32 %v1807_v49, %v1806_v43 }
 0x1be   : > { %v1951_v55 = vadd.f32 %v1950_v50, %v1949_v44  ;;  %v1814_v56 = vadd.f32 %v1813_v52, %v1812_v47 }
 0x1bf   : > { %v1957_v57 = vadd.f32 %v1956_v53, %v1955_v48  ;;  %v1809_v60 = vrot.slane %v1808_v54, 1 }
 0x1c0   : > { %v1952_v61 = vrot.slane %v1951_v55, 1  ;;  %v1815_v0 = vrot.slane %v1814_v56, 1 }
 0x1c1   : > { %v1958_v1 = vrot.slane %v1957_v57, 1  ;;  %v1810_v2 = vadd.f32 %v1809_v60, %v1808_v54 }
 0x1c2   : > { %v1816_v3 = vadd.f32 %v1815_v0, %v1814_v56  ;;  %v1953_v5 = vadd.f32 %v1952_v61, %v1951_v55 }
 0x1c3   : > { %v1817_v4 = vadd.f32 %v1810_v2, %v1674_v32  ;;  %v1959_v7 = vadd.f32 %v1958_v1, %v1957_v57 }
 0x1c4   : > { %v1818_v6 = vadd.f32 %v1816_v3, %v1675_v51 }
 0x1c5   : > { %v1960_v16 = vadd.f32 %v1953_v5, %v1817_v4 }
 0x1c6   : > { %v1961_v8 = vadd.f32 %v1959_v7, %v1818_v6 }
 0x1d2   : > { %v5918_v9 = vpop.f32.mrb[12].mxu0 }
 0x1d3   : > { %6304 = vst [vmem:[#allocation10_spill] sm:$0xff] %v5918_v9  ;;  %v5920_v10 = vpop.f32.mrb[12].mxu1  ;;  %v2091_v11 = vrot.slane %v5918_v9, 4  ;;  %v5924_v13 = vpop.f32.mrb[13].mxu0 }
 0x1d4   : > { %6305 = vst [vmem:[#allocation11_spill] sm:$0xff] %v5920_v10  ;;  %v2234_v12 = vrot.slane %v5920_v10, 4  ;;  %v5926_v14 = vpop.f32.mrb[13].mxu1  ;;  %v2097_v15 = vrot.slane %v5924_v13, 4  ;;  %v2085_v18 = vpop.f32.mrb[14].mxu0 }
 0x1d5   : > { %v2240_v17 = vrot.slane %v5926_v14, 4  ;;  %v2228_v19 = vpop.f32.mrb[14].mxu1  ;;  %v2092_v20 = vadd.f32 %v2091_v11, %v5918_v9  ;;  %v2086_v22 = vpop.f32.mrb[15].mxu0 }
 0x1d6   : > { %v2235_v21 = vadd.f32 %v2234_v12, %v5920_v10  ;;  %v2229_v23 = vpop.f32.mrb[15].mxu1  ;;  %v2098_v26 = vadd.f32 %v2097_v15, %v5924_v13 }
 0x1d7   : > { %v2241_v27 = vadd.f32 %v2240_v17, %v5926_v14  ;;  %v2093_v30 = vrot.slane %v2092_v20, 2 }
 0x1d8   : > { %v2236_v31 = vrot.slane %v2235_v21, 2  ;;  %v2099_v32 = vrot.slane %v2098_v26, 2 }
 0x1d9   : > { %v2242_v51 = vrot.slane %v2241_v27, 2  ;;  %v2094_v35 = vadd.f32 %v2093_v30, %v2092_v20 }
 0x1da   : > { %v2237_v36 = vadd.f32 %v2236_v31, %v2235_v21  ;;  %v2100_v39 = vadd.f32 %v2099_v32, %v2098_v26 }
 0x1db   : > { %v2243_v40 = vadd.f32 %v2242_v51, %v2241_v27  ;;  %v2095_v41 = vrot.slane %v2094_v35, 1 }
 0x1dc   : > { %v2238_v42 = vrot.slane %v2237_v36, 1  ;;  %v2101_v43 = vrot.slane %v2100_v39, 1 }
 0x1dd   : > { %v2244_v44 = vrot.slane %v2243_v40, 1  ;;  %v2096_v45 = vadd.f32 %v2095_v41, %v2094_v35 }
 0x1de   : > { %v2102_v46 = vadd.f32 %v2101_v43, %v2100_v39  ;;  %v2239_v48 = vadd.f32 %v2238_v42, %v2237_v36 }
 0x1df   : > { %v2103_v47 = vadd.f32 %v2096_v45, %v1960_v16  ;;  %v2245_v50 = vadd.f32 %v2244_v44, %v2243_v40 }
 0x1e0   : > { %v2104_v49 = vadd.f32 %v2102_v46, %v1961_v8 }
 0x1e1   : > { %v2246_v52 = vadd.f32 %v2239_v48, %v2103_v47 }
 0x1e2   : > { %v2247_v53 = vadd.f32 %v2245_v50, %v2104_v49 }
 0x1ee   : > { %v5934_v54 = vpop.f32.mrb[16].mxu0 }
 0x1ef   : > { %v5936_v55 = vpop.f32.mrb[16].mxu1  ;;  %v2377_v56 = vrot.slane %v5934_v54, 4  ;;  %v5940_v60 = vpop.f32.mrb[17].mxu0 }
 0x1f0   : > { %v2520_v57 = vrot.slane %v5936_v55, 4  ;;  %v5942_v61 = vpop.f32.mrb[17].mxu1  ;;  %v2383_v0 = vrot.slane %v5940_v60, 4  ;;  %v2371_v2 = vpop.f32.mrb[18].mxu0 }
 0x1f1   : > { %v2526_v1 = vrot.slane %v5942_v61, 4  ;;  %v2514_v3 = vpop.f32.mrb[18].mxu1  ;;  %v2378_v4 = vadd.f32 %v2377_v56, %v5934_v54  ;;  %v2372_v6 = vpop.f32.mrb[19].mxu0 }
 0x1f2   : > { %v2521_v5 = vadd.f32 %v2520_v57, %v5936_v55  ;;  %v2515_v7 = vpop.f32.mrb[19].mxu1  ;;  %v2384_v16 = vadd.f32 %v2383_v0, %v5940_v60 }
 0x1f3   : > { %v2527_v8 = vadd.f32 %v2526_v1, %v5942_v61  ;;  %v2379_v11 = vrot.slane %v2378_v4, 2 }
 0x1f4   : > { %v2522_v12 = vrot.slane %v2521_v5, 2  ;;  %v2385_v15 = vrot.slane %v2384_v16, 2 }
 0x1f5   : > { %v2528_v17 = vrot.slane %v2527_v8, 2  ;;  %v2380_v18 = vadd.f32 %v2379_v11, %v2378_v4 }
 0x1f6   : > { %v2523_v19 = vadd.f32 %v2522_v12, %v2521_v5  ;;  %v2386_v20 = vadd.f32 %v2385_v15, %v2384_v16 }
 0x1f7   : > { %v2529_v21 = vadd.f32 %v2528_v17, %v2527_v8  ;;  %v2381_v22 = vrot.slane %v2380_v18, 1 }
 0x1f8   : > { %v2524_v23 = vrot.slane %v2523_v19, 1  ;;  %v2387_v26 = vrot.slane %v2386_v20, 1 }
 0x1f9   : > { %v2530_v27 = vrot.slane %v2529_v21, 1  ;;  %v2382_v30 = vadd.f32 %v2381_v22, %v2380_v18 }
 0x1fa   : > { %v2388_v31 = vadd.f32 %v2387_v26, %v2386_v20  ;;  %v2525_v51 = vadd.f32 %v2524_v23, %v2523_v19 }
 0x1fb   : > { %v2389_v32 = vadd.f32 %v2382_v30, %v2246_v52  ;;  %v2531_v36 = vadd.f32 %v2530_v27, %v2529_v21 }
 0x1fc   : > { %v2390_v35 = vadd.f32 %v2388_v31, %v2247_v53 }
 0x1fd   : > { %v2532_v39 = vadd.f32 %v2525_v51, %v2389_v32 }
 0x1fe   : > { %v2533_v40 = vadd.f32 %v2531_v36, %v2390_v35 }
 0x20a   : > { %v5950_v41 = vpop.f32.mrb[20].mxu0 }
 0x20b   : > { %v5952_v42 = vpop.f32.mrb[20].mxu1  ;;  %v2663_v43 = vrot.slane %v5950_v41, 4  ;;  %v5956_v45 = vpop.f32.mrb[21].mxu0 }
 0x20c   : > { %v2806_v44 = vrot.slane %v5952_v42, 4  ;;  %v5958_v46 = vpop.f32.mrb[21].mxu1  ;;  %v2669_v47 = vrot.slane %v5956_v45, 4  ;;  %v2657_v49 = vpop.f32.mrb[22].mxu0 }
 0x20d   : > { %v2812_v48 = vrot.slane %v5958_v46, 4  ;;  %v2800_v50 = vpop.f32.mrb[22].mxu1  ;;  %v2664_v52 = vadd.f32 %v2663_v43, %v5950_v41  ;;  %v2658_v56 = vpop.f32.mrb[23].mxu0 }
 0x20e   : > { %v2807_v53 = vadd.f32 %v2806_v44, %v5952_v42  ;;  %v2801_v57 = vpop.f32.mrb[23].mxu1  ;;  %v2670_v0 = vadd.f32 %v2669_v47, %v5956_v45 }
 0x20f   : > { %v2813_v1 = vadd.f32 %v2812_v48, %v5958_v46  ;;  %v2665_v2 = vrot.slane %v2664_v52, 2 }
 0x210   : > { %v2808_v3 = vrot.slane %v2807_v53, 2  ;;  %v2671_v4 = vrot.slane %v2670_v0, 2 }
 0x211   : > { %v2814_v5 = vrot.slane %v2813_v1, 2  ;;  %v2666_v6 = vadd.f32 %v2665_v2, %v2664_v52 }
 0x212   : > { %v2809_v7 = vadd.f32 %v2808_v3, %v2807_v53  ;;  %v2672_v16 = vadd.f32 %v2671_v4, %v2670_v0 }
 0x213   : > { %v2815_v8 = vadd.f32 %v2814_v5, %v2813_v1  ;;  %v2667_v11 = vrot.slane %v2666_v6, 1 }
 0x214   : > { %v2810_v12 = vrot.slane %v2809_v7, 1  ;;  %v2673_v15 = vrot.slane %v2672_v16, 1 }
 0x215   : > { %v2816_v17 = vrot.slane %v2815_v8, 1  ;;  %v2668_v18 = vadd.f32 %v2667_v11, %v2666_v6 }
 0x216   : > { %v2674_v19 = vadd.f32 %v2673_v15, %v2672_v16  ;;  %v2811_v21 = vadd.f32 %v2810_v12, %v2809_v7 }
 0x217   : > { %v2675_v20 = vadd.f32 %v2668_v18, %v2532_v39  ;;  %v2817_v23 = vadd.f32 %v2816_v17, %v2815_v8 }
 0x218   : > { %v2676_v22 = vadd.f32 %v2674_v19, %v2533_v40 }
 0x219   : > { %v2818_v26 = vadd.f32 %v2811_v21, %v2675_v20 }
 0x21a   : > { %v2819_v27 = vadd.f32 %v2817_v23, %v2676_v22 }
 0x226   : > { %v5966_v30 = vpop.f32.mrb[24].mxu0 }
 0x227   : > { %6306 = vst [vmem:[#allocation12_spill] sm:$0xff] %v5966_v30  ;;  %v5968_v31 = vpop.f32.mrb[24].mxu1  ;;  %v2949_v32 = vrot.slane %v5966_v30, 4  ;;  %v5972_v35 = vpop.f32.mrb[25].mxu0 }
 0x228   : > { %6307 = vst [vmem:[#allocation13_spill] sm:$0xff] %v5968_v31  ;;  %v3092_v51 = vrot.slane %v5968_v31, 4  ;;  %v5974_v36 = vpop.f32.mrb[25].mxu1  ;;  %v2955_v43 = vrot.slane %v5972_v35, 4  ;;  %v2943_v40 = vpop.f32.mrb[26].mxu0 }
 0x229   : > { %v3098_v39 = vrot.slane %v5974_v36, 4  ;;  %v3086_v44 = vpop.f32.mrb[26].mxu1  ;;  %v2950_v47 = vadd.f32 %v2949_v32, %v5966_v30  ;;  %v2944_v49 = vpop.f32.mrb[27].mxu0 }
 0x22a   : > { %v3093_v48 = vadd.f32 %v3092_v51, %v5968_v31  ;;  %v3087_v50 = vpop.f32.mrb[27].mxu1  ;;  %v2956_v52 = vadd.f32 %v2955_v43, %v5972_v35 }
 0x22b   : > { %v3099_v53 = vadd.f32 %v3098_v39, %v5974_v36  ;;  %v2951_v56 = vrot.slane %v2950_v47, 2 }
 0x22c   : > { %v3094_v57 = vrot.slane %v3093_v48, 2  ;;  %v2957_v0 = vrot.slane %v2956_v52, 2 }
 0x22d   : > { %v3100_v1 = vrot.slane %v3099_v53, 2  ;;  %v2952_v2 = vadd.f32 %v2951_v56, %v2950_v47 }
 0x22e   : > { %v3095_v3 = vadd.f32 %v3094_v57, %v3093_v48  ;;  %v2958_v4 = vadd.f32 %v2957_v0, %v2956_v52 }
 0x22f   : > { %v3101_v5 = vadd.f32 %v3100_v1, %v3099_v53  ;;  %v2953_v6 = vrot.slane %v2952_v2, 1 }
 0x230   : > { %v3096_v7 = vrot.slane %v3095_v3, 1  ;;  %v2959_v16 = vrot.slane %v2958_v4, 1 }
 0x231   : > { %v3102_v8 = vrot.slane %v3101_v5, 1  ;;  %v2954_v11 = vadd.f32 %v2953_v6, %v2952_v2 }
 0x232   : > { %v2960_v12 = vadd.f32 %v2959_v16, %v2958_v4  ;;  %v3097_v17 = vadd.f32 %v3096_v7, %v3095_v3 }
 0x233   : > { %v2961_v15 = vadd.f32 %v2954_v11, %v2818_v26  ;;  %v3103_v19 = vadd.f32 %v3102_v8, %v3101_v5 }
 0x234   : > { %v2962_v18 = vadd.f32 %v2960_v12, %v2819_v27 }
 0x235   : > { %v3104_v20 = vadd.f32 %v3097_v17, %v2961_v15 }
 0x236   : > { %v3105_v21 = vadd.f32 %v3103_v19, %v2962_v18 }
 0x242   : > { %v5982_v22 = vpop.f32.mrb[28].mxu0 }
 0x243   : > { %6308 = vst [vmem:[#allocation14_spill] sm:$0xff] %v5982_v22  ;;  %v5984_v23 = vpop.f32.mrb[28].mxu1  ;;  %v3235_v32 = vrot.slane %v5982_v22, 4  ;;  %v5988_v43 = vpop.f32.mrb[29].mxu0 }
 0x244   : > { %v3378_v51 = vrot.slane %v5984_v23, 4  ;;  %v5990_v39 = vpop.f32.mrb[29].mxu1  ;;  %v3241_v40 = vrot.slane %v5988_v43, 4  ;;  %v3229_v27 = vpop.f32.mrb[30].mxu0 }
 0x245   : > { %v3384_v26 = vrot.slane %v5990_v39, 4  ;;  %v3372_v44 = vpop.f32.mrb[30].mxu1  ;;  %v3236_v47 = vadd.f32 %v3235_v32, %v5982_v22  ;;  %v3230_v49 = vpop.f32.mrb[31].mxu0 }
 0x246   : > { %v3379_v48 = vadd.f32 %v3378_v51, %v5984_v23  ;;  %v3373_v50 = vpop.f32.mrb[31].mxu1  ;;  %v3242_v52 = vadd.f32 %v3241_v40, %v5988_v43 }
 0x247   : > { %v3385_v53 = vadd.f32 %v3384_v26, %v5990_v39  ;;  %v3237_v56 = vrot.slane %v3236_v47, 2 }
 0x248   : > { %v3380_v57 = vrot.slane %v3379_v48, 2  ;;  %v3243_v0 = vrot.slane %v3242_v52, 2 }
 0x249   : > { %v3386_v1 = vrot.slane %v3385_v53, 2  ;;  %v3238_v2 = vadd.f32 %v3237_v56, %v3236_v47 }
 0x24a   : > { %v3381_v3 = vadd.f32 %v3380_v57, %v3379_v48  ;;  %v3244_v4 = vadd.f32 %v3243_v0, %v3242_v52 }
 0x24b   : > { %v3387_v5 = vadd.f32 %v3386_v1, %v3385_v53  ;;  %v3239_v6 = vrot.slane %v3238_v2, 1 }
 0x24c   : > { %v3382_v7 = vrot.slane %v3381_v3, 1  ;;  %v3245_v16 = vrot.slane %v3244_v4, 1 }
 0x24d   : > { %v3388_v8 = vrot.slane %v3387_v5, 1  ;;  %v3240_v11 = vadd.f32 %v3239_v6, %v3238_v2 }
 0x24e   : > { %v3246_v12 = vadd.f32 %v3245_v16, %v3244_v4  ;;  %v3383_v17 = vadd.f32 %v3382_v7, %v3381_v3 }
 0x24f   : > { %v3247_v15 = vadd.f32 %v3240_v11, %v3104_v20  ;;  %v3389_v19 = vadd.f32 %v3388_v8, %v3387_v5 }
 0x250   : > { %v3248_v18 = vadd.f32 %v3246_v12, %v3105_v21 }
 0x251   : > { %v3390_v32 = vadd.f32 %v3383_v17, %v3247_v15 }
 0x252   : > { %v3391_v51 = vadd.f32 %v3389_v19, %v3248_v18 }
 0x253   : > { %v5998_v40 = vmul.f32 0.0078125, %v3390_v32 }
 0x254   : > { %v6000_v26 = vmul.f32 0.0078125, %v3391_v51 }
 0x255   : > { %v3396_v27 = vsub.f32 %v5870_v24, %v5998_v40  ;;  %v3416_v44 = vsub.f32 %v5872_v25, %v5998_v40  ;;  %v3436_v47 = vsub.f32 %v5886_v58, %v5998_v40  ;;  %v3456_v20 = vsub.f32 %v5888_v59, %v5998_v40 }
 0x256   : > { %v3476_v21 = vsub.f32 %v5902_v33, %v5998_v40  ;;  %v3496_v48 = vsub.f32 %v5904_v34, %v5998_v40  ;;  %v3516_v49 = vsub.f32 %v5918_v9, %v5998_v40  ;;  %v3536_v50 = vsub.f32 %v5920_v10, %v5998_v40 }
 0x257   : > { %v3398_v52 = vmul.f32 %v3396_v27, %v3396_v27  ;;  %v3418_v53 = vmul.f32 %v3416_v44, %v3416_v44  ;;  %v3438_v56 = vmul.f32 %v3436_v47, %v3436_v47  ;;  %v3458_v57 = vmul.f32 %v3456_v20, %v3456_v20 }
 0x258   : > { %v3478_v0 = vmul.f32 %v3476_v21, %v3476_v21  ;;  %v3498_v1 = vmul.f32 %v3496_v48, %v3496_v48  ;;  %v3518_v2 = vmul.f32 %v3516_v49, %v3516_v49  ;;  %v3538_v3 = vmul.f32 %v3536_v50, %v3536_v50 }
 0x259   : > { %v3400_v4 = vrot.slane %v3398_v52, 4  ;;  %v3420_v5 = vrot.slane %v3418_v53, 4  ;;  %v3440_v6 = vrot.slane %v3438_v56, 4  ;;  %v3460_v7 = vrot.slane %v3458_v57, 4 }
 0x25a   : > { %v3480_v16 = vrot.slane %v3478_v0, 4  ;;  %v3500_v8 = vrot.slane %v3498_v1, 4  ;;  %v3520_v11 = vrot.slane %v3518_v2, 4  ;;  %v3540_v12 = vrot.slane %v3538_v3, 4 }
 0x25b   : > { %v3401_v15 = vadd.f32 %v3400_v4, %v3398_v52  ;;  %v3421_v17 = vadd.f32 %v3420_v5, %v3418_v53  ;;  %v3441_v18 = vadd.f32 %v3440_v6, %v3438_v56  ;;  %v3461_v19 = vadd.f32 %v3460_v7, %v3458_v57 }
 0x25c   : > { %v3481_v32 = vadd.f32 %v3480_v16, %v3478_v0  ;;  %v3501_v51 = vadd.f32 %v3500_v8, %v3498_v1  ;;  %v3521_v27 = vadd.f32 %v3520_v11, %v3518_v2  ;;  %v3541_v44 = vadd.f32 %v3540_v12, %v3538_v3 }
 0x25d   : > { %v3402_v47 = vrot.slane %v3401_v15, 2  ;;  %v3422_v20 = vrot.slane %v3421_v17, 2  ;;  %v3442_v21 = vrot.slane %v3441_v18, 2  ;;  %v3462_v48 = vrot.slane %v3461_v19, 2 }
 0x25e   : > { %v3482_v49 = vrot.slane %v3481_v32, 2  ;;  %v3502_v50 = vrot.slane %v3501_v51, 2  ;;  %v3522_v10 = vrot.slane %v3521_v27, 2  ;;  %v3542_v9 = vrot.slane %v3541_v44, 2 }
 0x25f   : > { %v3403_v34 = vadd.f32 %v3402_v47, %v3401_v15  ;;  %v3423_v33 = vadd.f32 %v3422_v20, %v3421_v17  ;;  %v3443_v59 = vadd.f32 %v3442_v21, %v3441_v18  ;;  %v3463_v58 = vadd.f32 %v3462_v48, %v3461_v19 }
 0x260   : > { %v3483_v52 = vadd.f32 %v3482_v49, %v3481_v32  ;;  %v3503_v53 = vadd.f32 %v3502_v50, %v3501_v51  ;;  %v3523_v56 = vadd.f32 %v3522_v10, %v3521_v27  ;;  %v3543_v57 = vadd.f32 %v3542_v9, %v3541_v44 }
 0x261   : > { %v3404_v0 = vrot.slane %v3403_v34, 1  ;;  %v3424_v1 = vrot.slane %v3423_v33, 1  ;;  %v3444_v2 = vrot.slane %v3443_v59, 1  ;;  %v3464_v3 = vrot.slane %v3463_v58, 1 }
 0x262   : > { %v3484_v4 = vrot.slane %v3483_v52, 1  ;;  %v3504_v5 = vrot.slane %v3503_v53, 1  ;;  %v3524_v6 = vrot.slane %v3523_v56, 1  ;;  %v3544_v7 = vrot.slane %v3543_v57, 1 }
 0x263   : > { %v3405_v16 = vadd.f32 %v3404_v0, %v3403_v34  ;;  %v3425_v8 = vadd.f32 %v3424_v1, %v3423_v33  ;;  %v3445_v11 = vadd.f32 %v3444_v2, %v3443_v59  ;;  %v3465_v12 = vadd.f32 %v3464_v3, %v3463_v58 }
 0x264   : > { %v3485_v15 = vadd.f32 %v3484_v4, %v3483_v52  ;;  %v3505_v17 = vadd.f32 %v3504_v5, %v3503_v53  ;;  %v3525_v18 = vadd.f32 %v3524_v6, %v3523_v56  ;;  %v3545_v19 = vadd.f32 %v3544_v7, %v3543_v57 }
 0x265   : > { %v3432_v32 = vadd.f32 %v3425_v8, %v3405_v16  ;;  %v3556_v9 = vsub.f32 %v5934_v54, %v5998_v40  ;;  %v3576_v10 = vsub.f32 %v5936_v55, %v5998_v40  ;;  %v3596_v51 = vsub.f32 %v5950_v41, %v5998_v40 }
 0x266   : > { %v3616_v34 = vsub.f32 %v5952_v42, %v5998_v40  ;;  %v3636_v58 = vsub.f32 %v5966_v30, %v5998_v40  ;;  %v3656_v59 = vsub.f32 %v5968_v31, %v5998_v40  ;;  %v3676_v33 = vsub.f32 %v5982_v22, %v5998_v40 }
 0x267   : > { %v3452_v27 = vadd.f32 %v3445_v11, %v3432_v32  ;;  %v3558_v44 = vmul.f32 %v3556_v9, %v3556_v9  ;;  %v3578_v47 = vmul.f32 %v3576_v10, %v3576_v10  ;;  %v3598_v20 = vmul.f32 %v3596_v51, %v3596_v51 }
 0x268   : > { %v3618_v21 = vmul.f32 %v3616_v34, %v3616_v34  ;;  %v3638_v48 = vmul.f32 %v3636_v58, %v3636_v58  ;;  %v3658_v49 = vmul.f32 %v3656_v59, %v3656_v59  ;;  %v3678_v50 = vmul.f32 %v3676_v33, %v3676_v33 }
 0x269   : > { %v3472_v52 = vadd.f32 %v3465_v12, %v3452_v27  ;;  %v3560_v53 = vrot.slane %v3558_v44, 4  ;;  %v3580_v56 = vrot.slane %v3578_v47, 4  ;;  %v3600_v57 = vrot.slane %v3598_v20, 4 }
 0x26a   : > { %v3620_v0 = vrot.slane %v3618_v21, 4  ;;  %v3640_v1 = vrot.slane %v3638_v48, 4  ;;  %v3660_v2 = vrot.slane %v3658_v49, 4  ;;  %v3680_v3 = vrot.slane %v3678_v50, 4 }
 0x26b   : > { %v3492_v4 = vadd.f32 %v3485_v15, %v3472_v52  ;;  %v3561_v5 = vadd.f32 %v3560_v53, %v3558_v44  ;;  %v3581_v6 = vadd.f32 %v3580_v56, %v3578_v47  ;;  %v3601_v7 = vadd.f32 %v3600_v57, %v3598_v20 }
 0x26c   : > { %v3621_v16 = vadd.f32 %v3620_v0, %v3618_v21  ;;  %v3641_v8 = vadd.f32 %v3640_v1, %v3638_v48  ;;  %v3661_v11 = vadd.f32 %v3660_v2, %v3658_v49  ;;  %v3681_v32 = vadd.f32 %v3680_v3, %v3678_v50 }
 0x26d   : > { %v3512_v9 = vadd.f32 %v3505_v17, %v3492_v4  ;;  %v3562_v10 = vrot.slane %v3561_v5, 2  ;;  %v3582_v51 = vrot.slane %v3581_v6, 2  ;;  %v3602_v34 = vrot.slane %v3601_v7, 2 }
 0x26e   : > { %v3622_v12 = vrot.slane %v3621_v16, 2  ;;  %v3642_v58 = vrot.slane %v3641_v8, 2  ;;  %v3662_v59 = vrot.slane %v3661_v11, 2  ;;  %v3682_v33 = vrot.slane %v3681_v32, 2 }
 0x26f   : > { %v3532_v27 = vadd.f32 %v3525_v18, %v3512_v9  ;;  %v3563_v22 = vadd.f32 %v3562_v10, %v3561_v5  ;;  %v3583_v31 = vadd.f32 %v3582_v51, %v3581_v6  ;;  %v3603_v30 = vadd.f32 %v3602_v34, %v3601_v7 }
 0x270   : > { %v3623_v15 = vadd.f32 %v3622_v12, %v3621_v16  ;;  %v3643_v44 = vadd.f32 %v3642_v58, %v3641_v8  ;;  %v3663_v47 = vadd.f32 %v3662_v59, %v3661_v11  ;;  %v3683_v20 = vadd.f32 %v3682_v33, %v3681_v32 }
 0x271   : > { %v3552_v21 = vadd.f32 %v3545_v19, %v3532_v27  ;;  %v3564_v48 = vrot.slane %v3563_v22, 1  ;;  %v3584_v49 = vrot.slane %v3583_v31, 1  ;;  %v3604_v50 = vrot.slane %v3603_v30, 1 }
 0x272   : > { %v3624_v17 = vrot.slane %v3623_v15, 1  ;;  %v3644_v52 = vrot.slane %v3643_v44, 1  ;;  %v3664_v53 = vrot.slane %v3663_v47, 1  ;;  %v3684_v56 = vrot.slane %v3683_v20, 1 }
 0x273   : > { %v3565_v57 = vadd.f32 %v3564_v48, %v3563_v22  ;;  %v3585_v0 = vadd.f32 %v3584_v49, %v3583_v31  ;;  %v3605_v1 = vadd.f32 %v3604_v50, %v3603_v30  ;;  %v3696_v18 = vsub.f32 %v5984_v23, %v5998_v40 }
 0x274   : > { %v3625_v2 = vadd.f32 %v3624_v17, %v3623_v15  ;;  %v3645_v3 = vadd.f32 %v3644_v52, %v3643_v44  ;;  %v3665_v4 = vadd.f32 %v3664_v53, %v3663_v47  ;;  %v3685_v5 = vadd.f32 %v3684_v56, %v3683_v20 }
 0x275   : > { %v3572_v6 = vadd.f32 %v3565_v57, %v3552_v21  ;;  %v3698_v7 = vmul.f32 %v3696_v18, %v3696_v18  ;;  %v3397_v19 = vsub.f32 %v5876_v28, %v6000_v26  ;;  %v3417_v16 = vsub.f32 %v5878_v29, %v6000_v26 }
 0x276   : > { %v3437_v22 = vsub.f32 %v5892_v62, %v6000_v26  ;;  %v3457_v30 = vsub.f32 %v5894_v63, %v6000_v26  ;;  %v3477_v31 = vsub.f32 %v5908_v37, %v6000_v26  ;;  %v3497_v8 = vsub.f32 %v5910_v38, %v6000_v26 }
 0x277   : > { %v3592_v11 = vadd.f32 %v3585_v0, %v3572_v6  ;;  %v3700_v32 = vrot.slane %v3698_v7, 4  ;;  %v3399_v9 = vmul.f32 %v3397_v19, %v3397_v19  ;;  %v3419_v10 = vmul.f32 %v3417_v16, %v3417_v16 }
 0x278   : > { %v3439_v51 = vmul.f32 %v3437_v22, %v3437_v22  ;;  %v3459_v34 = vmul.f32 %v3457_v30, %v3457_v30  ;;  %v3479_v12 = vmul.f32 %v3477_v31, %v3477_v31  ;;  %v3499_v58 = vmul.f32 %v3497_v8, %v3497_v8 }
 0x279   : > { %v3612_v59 = vadd.f32 %v3605_v1, %v3592_v11  ;;  %v3701_v33 = vadd.f32 %v3700_v32, %v3698_v7  ;;  %v3406_v27 = vrot.slane %v3399_v9, 4  ;;  %v3426_v15 = vrot.slane %v3419_v10, 4 }
 0x27a   : > { %v3446_v44 = vrot.slane %v3439_v51, 4  ;;  %v3466_v47 = vrot.slane %v3459_v34, 4  ;;  %v3486_v20 = vrot.slane %v3479_v12, 4  ;;  %v3506_v21 = vrot.slane %v3499_v58, 4 }
 0x27b   : > { %v3632_v48 = vadd.f32 %v3625_v2, %v3612_v59  ;;  %v3702_v49 = vrot.slane %v3701_v33, 2  ;;  %v3407_v50 = vadd.f32 %v3406_v27, %v3399_v9  ;;  %v3427_v17 = vadd.f32 %v3426_v15, %v3419_v10 }
 0x27c   : > { %v3447_v52 = vadd.f32 %v3446_v44, %v3439_v51  ;;  %v3467_v53 = vadd.f32 %v3466_v47, %v3459_v34  ;;  %v3487_v56 = vadd.f32 %v3486_v20, %v3479_v12  ;;  %v3507_v57 = vadd.f32 %v3506_v21, %v3499_v58 }
 0x27d   : > { %v3652_v0 = vadd.f32 %v3645_v3, %v3632_v48  ;;  %v3703_v18 = vadd.f32 %v3702_v49, %v3701_v33  ;;  %v3408_v6 = vrot.slane %v3407_v50, 2  ;;  %v3428_v19 = vrot.slane %v3427_v17, 2 }
 0x27e   : > { %v3448_v1 = vrot.slane %v3447_v52, 2  ;;  %v3468_v7 = vrot.slane %v3467_v53, 2  ;;  %v3488_v16 = vrot.slane %v3487_v56, 2  ;;  %v3508_v22 = vrot.slane %v3507_v57, 2 }
 0x27f   : > { %v3672_v30 = vadd.f32 %v3665_v4, %v3652_v0  ;;  %v3704_v31 = vrot.slane %v3703_v18, 1  ;;  %v3409_v8 = vadd.f32 %v3408_v6, %v3407_v50  ;;  %v3429_v11 = vadd.f32 %v3428_v19, %v3427_v17 }
 0x280   : > { %v3449_v2 = vadd.f32 %v3448_v1, %v3447_v52  ;;  %v3469_v32 = vadd.f32 %v3468_v7, %v3467_v53  ;;  %v3489_v9 = vadd.f32 %v3488_v16, %v3487_v56  ;;  %v3509_v10 = vadd.f32 %v3508_v22, %v3507_v57 }
 0x281   : > { %v3692_v51 = vadd.f32 %v3685_v5, %v3672_v30  ;;  %v3705_v34 = vadd.f32 %v3704_v31, %v3703_v18  ;;  %v3410_v12 = vrot.slane %v3409_v8, 1  ;;  %v3430_v58 = vrot.slane %v3429_v11, 1 }
 0x282   : > { %v3450_v3 = vrot.slane %v3449_v2, 1  ;;  %v3470_v59 = vrot.slane %v3469_v32, 1  ;;  %v3490_v33 = vrot.slane %v3489_v9, 1  ;;  %v3517_v4 = vsub.f32 %v5924_v13, %v6000_v26 }
 0x283   : > { %v6046_v27 = vadd.f32 %v3705_v34, %v3692_v51  ;;  %v3411_v15 = vadd.f32 %v3410_v12, %v3409_v8  ;;  %v3431_v44 = vadd.f32 %v3430_v58, %v3429_v11  ;;  %v3510_v20 = vrot.slane %v3509_v10, 1 }
 0x284   : > { %v3451_v47 = vadd.f32 %v3450_v3, %v3449_v2  ;;  %v3471_v48 = vadd.f32 %v3470_v59, %v3469_v32  ;;  %v3519_v49 = vmul.f32 %v3517_v4, %v3517_v4  ;;  %v3537_v5 = vsub.f32 %v5926_v14, %v6000_v26 }
 0x285   : > { %v3433_v21 = vadd.f32 %v3431_v44, %v3411_v15  ;;  %v3557_v50 = vsub.f32 %v5940_v60, %v6000_v26  ;;  %v3577_v17 = vsub.f32 %v5942_v61, %v6000_v26  ;;  %v3597_v52 = vsub.f32 %v5956_v45, %v6000_v26 }
 0x286   : > { %v3617_v53 = vsub.f32 %v5958_v46, %v6000_v26  ;;  %v3491_v57 = vadd.f32 %v3490_v33, %v3489_v9  ;;  %v3526_v0 = vrot.slane %v3519_v49, 4  ;;  %v3539_v18 = vmul.f32 %v3537_v5, %v3537_v5 }
 0x287   : > { %v3453_v56 = vadd.f32 %v3451_v47, %v3433_v21  ;;  %v3559_v6 = vmul.f32 %v3557_v50, %v3557_v50  ;;  %v3579_v19 = vmul.f32 %v3577_v17, %v3577_v17  ;;  %v3599_v1 = vmul.f32 %v3597_v52, %v3597_v52 }
 0x288   : > { %v3619_v7 = vmul.f32 %v3617_v53, %v3617_v53  ;;  %v3511_v22 = vadd.f32 %v3510_v20, %v3509_v10  ;;  %v3527_v30 = vadd.f32 %v3526_v0, %v3519_v49  ;;  %v3546_v31 = vrot.slane %v3539_v18, 4 }
 0x289   : > { %v3473_v16 = vadd.f32 %v3471_v48, %v3453_v56  ;;  %v3566_v8 = vrot.slane %v3559_v6, 4  ;;  %v3586_v11 = vrot.slane %v3579_v19, 4  ;;  %v3606_v2 = vrot.slane %v3599_v1, 4 }
 0x28a   : > { %v3626_v32 = vrot.slane %v3619_v7, 4  ;;  %v3528_v34 = vrot.slane %v3527_v30, 2  ;;  %v3547_v12 = vadd.f32 %v3546_v31, %v3539_v18  ;;  %v3637_v9 = vsub.f32 %v5972_v35, %v6000_v26 }
 0x28b   : > { %v3493_v51 = vadd.f32 %v3491_v57, %v3473_v16  ;;  %v3567_v58 = vadd.f32 %v3566_v8, %v3559_v6  ;;  %v3587_v3 = vadd.f32 %v3586_v11, %v3579_v19  ;;  %v3607_v59 = vadd.f32 %v3606_v2, %v3599_v1 }
 0x28c   : > { %v3627_v33 = vadd.f32 %v3626_v32, %v3619_v7  ;;  %v3529_v44 = vadd.f32 %v3528_v34, %v3527_v30  ;;  %v3548_v4 = vrot.slane %v3547_v12, 2  ;;  %v3639_v10 = vmul.f32 %v3637_v9, %v3637_v9 }
 0x28d   : > { %v3513_v15 = vadd.f32 %v3511_v22, %v3493_v51  ;;  %v3568_v47 = vrot.slane %v3567_v58, 2  ;;  %v3588_v20 = vrot.slane %v3587_v3, 2  ;;  %v3608_v21 = vrot.slane %v3607_v59, 2 }
 0x28e   : > { %v3628_v48 = vrot.slane %v3627_v33, 2  ;;  %v3530_v49 = vrot.slane %v3529_v44, 1  ;;  %v3549_v5 = vadd.f32 %v3548_v4, %v3547_v12  ;;  %v3646_v50 = vrot.slane %v3639_v10, 4 }
 0x28f   : > { %v3657_v17 = vsub.f32 %v5974_v36, %v6000_v26  ;;  %v3569_v52 = vadd.f32 %v3568_v47, %v3567_v58  ;;  %v3589_v53 = vadd.f32 %v3588_v20, %v3587_v3  ;;  %v3609_v56 = vadd.f32 %v3608_v21, %v3607_v59 }
 0x290   : > { %v3531_v57 = vadd.f32 %v3530_v49, %v3529_v44  ;;  %v3550_v0 = vrot.slane %v3549_v5, 1  ;;  %v3647_v18 = vadd.f32 %v3646_v50, %v3639_v10  ;;  %v3629_v7 = vadd.f32 %v3628_v48, %v3627_v33 }
 0x291   : > { %v3659_v6 = vmul.f32 %v3657_v17, %v3657_v17  ;;  %v3570_v19 = vrot.slane %v3569_v52, 1  ;;  %v3590_v1 = vrot.slane %v3589_v53, 1  ;;  %v3610_v11 = vrot.slane %v3609_v56, 1 }
 0x292   : > { %v3533_v16 = vadd.f32 %v3531_v57, %v3513_v15  ;;  %v3551_v22 = vadd.f32 %v3550_v0, %v3549_v5  ;;  %v3648_v30 = vrot.slane %v3647_v18, 2  ;;  %v3677_v34 = vsub.f32 %v5988_v43, %v6000_v26 }
 0x293   : > { %v3666_v31 = vrot.slane %v3659_v6, 4  ;;  %v3571_v8 = vadd.f32 %v3570_v19, %v3569_v52  ;;  %v3630_v12 = vrot.slane %v3629_v7, 1  ;;  %v3697_v9 = vsub.f32 %v5990_v39, %v6000_v26 }
 0x294   : > { %v3553_v2 = vadd.f32 %v3551_v22, %v3533_v16  ;;  %v3649_v32 = vadd.f32 %v3648_v30, %v3647_v18  ;;  %v3591_v3 = vadd.f32 %v3590_v1, %v3589_v53  ;;  %v3679_v33 = vmul.f32 %v3677_v34, %v3677_v34 }
 0x295   : > { %v3667_v51 = vadd.f32 %v3666_v31, %v3659_v6  ;;  %v3611_v15 = vadd.f32 %v3610_v11, %v3609_v56  ;;  %v3699_v44 = vmul.f32 %v3697_v9, %v3697_v9  ;;  %v3631_v49 = vadd.f32 %v3630_v12, %v3629_v7 }
 0x296   : > { %v3573_v58 = vadd.f32 %v3571_v8, %v3553_v2  ;;  %v3650_v10 = vrot.slane %v3649_v32, 1  ;;  %v3686_v20 = vrot.slane %v3679_v33, 4  ;;  %v3714_v30 = vmul.f32 0.0078125, %v6046_v27 }
 0x297   : > { %v3668_v59 = vrot.slane %v3667_v51, 2  ;;  %v3706_v21 = vrot.slane %v3699_v44, 4  ;;  %v5065_v34 = vmov 1966171168   ;;  %v3727_v9 = vlaneseq }
 0x298   : > { %v3593_v4 = vadd.f32 %v3591_v3, %v3573_v58  ;;  %v3687_v50 = vadd.f32 %v3686_v20, %v3679_v33  ;;  %v3651_v57 = vadd.f32 %v3650_v10, %v3649_v32  ;;  %v3717_v11 = vadd.f32 1e-05, %v3714_v30 }
 0x299   : > { %v3669_v47 = vadd.f32 %v3668_v59, %v3667_v51  ;;  %v3707_v17 = vadd.f32 %v3706_v21, %v3699_v44  ;;  %v3725_v12 = vunpack.c.l.s4 %v5065_v34  ;;  %v3728_v3 = vshrl.u32 %v3727_v9, 7  ;;  %v6315_v34 = vld [vmem:[#allocation12_spill] sm:$0xff] }
 0x29a   : > { %v3613_v48 = vadd.f32 %v3611_v15, %v3593_v4  ;;  %v3688_v0 = vrot.slane %v3687_v50, 2  ;;  %4995 = vrsqrt.f32 %v3717_v11  ;;  %v3716_v4 = vld [vmem:[%s1091_s27] sm:$0x3] }
 0x29b   : > { %v3670_v5 = vrot.slane %v3669_v47, 1  ;;  %v3708_v18 = vrot.slane %v3707_v17, 2  ;;  %v3726_v58 = vunpack.c.0.s8 %v3725_v12  ;;  %v3748_v20 = vsub.s32 1, %v3728_v3 }
 0x29c   : > { %v3633_v52 = vadd.f32 %v3631_v49, %v3613_v48  ;;  %v3689_v19 = vadd.f32 %v3688_v0, %v3687_v50 }
 0x29d   : > { %v3671_v53 = vadd.f32 %v3670_v5, %v3669_v47  ;;  %v3709_v56 = vadd.f32 %v3708_v18, %v3707_v17  ;;  %v3729_v59 = vsub.s32 %v3726_v58, %v3728_v3  ;;  %v3744_v47 = vsub.s32 0, %v3728_v3  ;;  %v6309_v18 = vld [vmem:[#allocation6_spill] sm:$0xff] }
 0x29e   : > { %v3653_v6 = vadd.f32 %v3651_v57, %v3633_v52  ;;  %v3690_v16 = vrot.slane %v3689_v19, 1 }
 0x29f   : > { %v3710_v22 = vrot.slane %v3709_v56, 1 }
 0x2a0   : > { %v3673_v1 = vadd.f32 %v3671_v53, %v3653_v6  ;;  %v3691_v31 = vadd.f32 %v3690_v16, %v3689_v19 }
 0x2a1   : > { %v3711_v7 = vadd.f32 %v3710_v22, %v3709_v56  ;;  %v6313_v22 = vld [vmem:[#allocation10_spill] sm:$0xff] }
 0x2a2   : > { %v3693_v8 = vadd.f32 %v3691_v31, %v3673_v1 }
 0x2a4   : > { %v3713_v2 = vadd.f32 %v3711_v7, %v3693_v8  ;;  %v4996_v27 = vpop.eup %4995  ;;  %v6314_v8 = vld [vmem:[#allocation11_spill] sm:$0xff] }
 0x2a6   : > { %v3715_v51 = vmul.f32 0.0078125, %v3713_v2  ;;  %v3740_v2 = vld [vmem:[%s1096_s30] sm:$0x3] }
 0x2a8   : > { %v3718_v32 = vadd.f32 1e-05, %v3715_v51 }
 0x2aa   : > { %4997 = vrsqrt.f32 %v3718_v32 }
 0x2b4   : > { %v4998_v33 = vpop.eup %4997 }
 0x2b5   : > { %v3723_v15 = vcombine.low %v4996_v27, %v4998_v33 }
 0x2b7   : > { %v3730_v44 = vrot.slane %v3723_v15, %v3729_v59 }
 0x2b9   : > { %v3737_v10 = vrot.slane %v3730_v44, %v3729_v59 }
 0x2bb   : > { %v3739_v21 = vmul.f32 %v3737_v10, %v3716_v4 }
 0x2bd   : > { %v3745_v48 = vrot.slane %v3739_v21, %v3744_v47  ;;  %v3749_v49 = vrot.slane %v3739_v21, %v3748_v20 }
 0x2bf   : > { %v3752_v5 = vmul.f32 %v3745_v48, %v5998_v40  ;;  %v3753_v50 = vmul.f32 %v3749_v49, %v6000_v26  ;;  %v3784_v17 = vmul.f32 %v3745_v48, %v5870_v24  ;;  %v3785_v52 = vmul.f32 %v3749_v49, %v5876_v28  ;;  %v6310_v40 = vld [vmem:[#allocation7_spill] sm:$0xff]  ;;  %v6311_v24 = vld [vmem:[#allocation8_spill] sm:$0xff] }
 0x2c0   : > { %v3794_v57 = vmul.f32 %v3745_v48, %v5872_v25  ;;  %v3795_v0 = vmul.f32 %v3749_v49, %v5878_v29  ;;  %v3804_v6 = vmul.f32 %v3745_v48, %v6309_v18  ;;  %v3805_v53 = vmul.f32 %v3749_v49, %v5892_v62  ;;  %v6312_v25 = vld [vmem:[#allocation9_spill] sm:$0xff] }
 0x2c1   : > { %v3756_v19 = vcombine.low %v3752_v5, %v3753_v50  ;;  %v3814_v56 = vmul.f32 %v3745_v48, %v6310_v40  ;;  %v3815_v26 = vmul.f32 %v3749_v49, %v5894_v63  ;;  %v3824_v1 = vmul.f32 %v3745_v48, %v6311_v24 }
 0x2c2   : > { %v3825_v28 = vmul.f32 %v3749_v49, %v5908_v37  ;;  %v3834_v16 = vmul.f32 %v3745_v48, %v6312_v25  ;;  %v3835_v29 = vmul.f32 %v3749_v49, %v5910_v38  ;;  %v3844_v30 = vmul.f32 %v3745_v48, %v6313_v22 }
 0x2c3   : > { %v3763_v62 = vrot.slane %v3756_v19, %v3729_v59  ;;  %v3845_v31 = vmul.f32 %v3749_v49, %v5924_v13  ;;  %v3854_v7 = vmul.f32 %v3745_v48, %v6314_v8  ;;  %v3855_v11 = vmul.f32 %v3749_v49, %v5926_v14 }
 0x2c4   : > { %v6099_v63 = vmul.f32 %v3745_v48, %v5934_v54  ;;  %v6102_v51 = vmul.f32 %v3749_v49, %v5940_v60  ;;  %v6105_v37 = vmul.f32 %v3745_v48, %v5936_v55  ;;  %v6108_v38 = vmul.f32 %v3749_v49, %v5942_v61  ;;  %v6316_v61 = vld [vmem:[#allocation13_spill] sm:$0xff] }
 0x2c5   : > { %v3770_v32 = vrot.slane %v3763_v62, %v3729_v59  ;;  %v6111_v13 = vmul.f32 %v3745_v48, %v5950_v41  ;;  %v6114_v14 = vmul.f32 %v3749_v49, %v5956_v45  ;;  %v6117_v54 = vmul.f32 %v3745_v48, %v5952_v42  ;;  %v6317_v45 = vld [vmem:[#allocation14_spill] sm:$0xff] }
 0x2c6   : > { %v6120_v60 = vmul.f32 %v3749_v49, %v5958_v46  ;;  %v6123_v55 = vmul.f32 %v3745_v48, %v6315_v34  ;;  %v6126_v12 = vmul.f32 %v3749_v49, %v5972_v35  ;;  %v6129_v9 = vmul.f32 %v3745_v48, %v6316_v61 }
 0x2c7   : > { %v3772_v41 = vsub.f32 %v3740_v2, %v3770_v32  ;;  %v6132_v58 = vmul.f32 %v3749_v49, %v5974_v36  ;;  %v6135_v3 = vmul.f32 %v3745_v48, %v6317_v45  ;;  %v6138_v42 = vmul.f32 %v3749_v49, %v5988_v43 }
 0x2c8   : > { %v6141_v46 = vmul.f32 %v3745_v48, %v5984_v23  ;;  %v6144_v27 = vmul.f32 %v3749_v49, %v5990_v39 }
 0x2c9   : > { %v6147_v35 = vrot.slane %v3772_v41, %v3744_v47  ;;  %v6149_v59 = vrot.slane %v3772_v41, %v3748_v20 }
 0x2cb   : > { %v3786_v36 = vadd.f32 %v3784_v17, %v6147_v35  ;;  %v3787_v33 = vadd.f32 %v3785_v52, %v6149_v59  ;;  %v3796_v15 = vadd.f32 %v3794_v57, %v6147_v35  ;;  %v3797_v43 = vadd.f32 %v3795_v0, %v6149_v59 }
 0x2cc   : > { %v3806_v44 = vadd.f32 %v3804_v6, %v6147_v35  ;;  %v3807_v23 = vadd.f32 %v3805_v53, %v6149_v59  ;;  %v3816_v39 = vadd.f32 %v3814_v56, %v6147_v35  ;;  %v3817_v4 = vadd.f32 %v3815_v26, %v6149_v59 }
 0x2cd   : > { %v3788_v10 = vmax.f32 %v3786_v36, 0.0  ;;  %v3789_v47 = vmax.f32 %v3787_v33, 0.0  ;;  %v3798_v20 = vmax.f32 %v3796_v15, 0.0  ;;  %v3799_v21 = vmax.f32 %v3797_v43, 0.0 }
 0x2ce   : > { %v3808_v48 = vmax.f32 %v3806_v44, 0.0  ;;  %v3809_v49 = vmax.f32 %v3807_v23, 0.0  ;;  %v3818_v5 = vmax.f32 %v3816_v39, 0.0  ;;  %v3819_v50 = vmax.f32 %v3817_v4, 0.0 }
 0x2cf   : > { %3790 = vst [vmem:[%s6159_s6] sm:$0xff] %v3788_v10  ;;  %3791 = vst [vmem:[%s6159_s6 + $0x8] sm:$0xff] %v3789_v47  ;;  %v3826_v17 = vadd.f32 %v3824_v1, %v6147_v35  ;;  %v3827_v52 = vadd.f32 %v3825_v28, %v6149_v59  ;;  %v3836_v57 = vadd.f32 %v3834_v16, %v6147_v35 }
 0x2d0   : > { %4564 = vst [vmem:[%s6159_s6 + $0x10] sm:$0xff] %v3798_v20  ;;  %4565 = vst [vmem:[%s6159_s6 + $0x18] sm:$0xff] %v3799_v21  ;;  %v3837_v0 = vadd.f32 %v3835_v29, %v6149_v59  ;;  %v3846_v18 = vadd.f32 %v3844_v30, %v6147_v35  ;;  %v3847_v6 = vadd.f32 %v3845_v31, %v6149_v59 }
 0x2d1   : > { %4568 = vst [vmem:[%s6159_s6 + $0x20] sm:$0xff] %v3808_v48  ;;  %4569 = vst [vmem:[%s6159_s6 + $0x28] sm:$0xff] %v3809_v49  ;;  %v3856_v53 = vadd.f32 %v3854_v7, %v6147_v35  ;;  %v3857_v19 = vadd.f32 %v3855_v11, %v6149_v59  ;;  %v3828_v40 = vmax.f32 %v3826_v17, 0.0  ;;  %v3829_v56 = vmax.f32 %v3827_v52, 0.0 }
 0x2d2   : > { %4572 = vst [vmem:[%s6159_s6 + $0x30] sm:$0xff] %v3818_v5  ;;  %4573 = vst [vmem:[%s6159_s6 + $0x38] sm:$0xff] %v3819_v50  ;;  %v3838_v26 = vmax.f32 %v3836_v57, 0.0  ;;  %v3839_v24 = vmax.f32 %v3837_v0, 0.0  ;;  %v3848_v1 = vmax.f32 %v3846_v18, 0.0  ;;  %v3849_v28 = vmax.f32 %v3847_v6, 0.0 }
 0x2d3   : > { %v3858_v25 = vmax.f32 %v3856_v53, 0.0  ;;  %v3859_v16 = vmax.f32 %v3857_v19, 0.0  ;;  %4576 = vst [vmem:[%s6159_s6 + $0x40] sm:$0xff] %v3828_v40  ;;  %4577 = vst [vmem:[%s6159_s6 + $0x48] sm:$0xff] %v3829_v56  ;;  %v3866_v29 = vadd.f32 %v6099_v63, %v6147_v35  ;;  %v3867_v22 = vadd.f32 %v6102_v51, %v6149_v59 }
 0x2d4   : > { %4580 = vst [vmem:[%s6159_s6 + $0x50] sm:$0xff] %v3838_v26  ;;  %4581 = vst [vmem:[%s6159_s6 + $0x58] sm:$0xff] %v3839_v24  ;;  %v3876_v30 = vadd.f32 %v6105_v37, %v6147_v35  ;;  %v3877_v62 = vadd.f32 %v6108_v38, %v6149_v59  ;;  %v3886_v31 = vadd.f32 %v6111_v13, %v6147_v35 }
 0x2d5   : > { %4584 = vst [vmem:[%s6159_s6 + $0x60] sm:$0xff] %v3848_v1  ;;  %4585 = vst [vmem:[%s6159_s6 + $0x68] sm:$0xff] %v3849_v28  ;;  %v3887_v8 = vadd.f32 %v6114_v14, %v6149_v59  ;;  %v3896_v7 = vadd.f32 %v6117_v54, %v6147_v35  ;;  %v3897_v11 = vadd.f32 %v6120_v60, %v6149_v59  ;;  %v3868_v2 = vmax.f32 %v3866_v29, 0.0 }
 0x2d6   : > { %4588 = vst [vmem:[%s6159_s6 + $0x70] sm:$0xff] %v3858_v25  ;;  %4589 = vst [vmem:[%s6159_s6 + $0x78] sm:$0xff] %v3859_v16  ;;  %v3869_v63 = vmax.f32 %v3867_v22, 0.0  ;;  %v3878_v51 = vmax.f32 %v3876_v30, 0.0  ;;  %v3879_v37 = vmax.f32 %v3877_v62, 0.0  ;;  %v3888_v38 = vmax.f32 %v3886_v31, 0.0 }
 0x2d7   : > { %v3889_v32 = vmax.f32 %v3887_v8, 0.0  ;;  %v3898_v13 = vmax.f32 %v3896_v7, 0.0  ;;  %v3899_v14 = vmax.f32 %v3897_v11, 0.0  ;;  %4592 = vst [vmem:[%s6159_s6 + $0x80] sm:$0xff] %v3868_v2  ;;  %v3906_v54 = vadd.f32 %v6123_v55, %v6147_v35 }
 0x2d8   : > { %4593 = vst [vmem:[%s6159_s6 + $0x88] sm:$0xff] %v3869_v63  ;;  %4596 = vst [vmem:[%s6159_s6 + $0x90] sm:$0xff] %v3878_v51  ;;  %v3907_v60 = vadd.f32 %v6126_v12, %v6149_v59  ;;  %v3916_v34 = vadd.f32 %v6129_v9, %v6147_v35  ;;  %v3917_v61 = vadd.f32 %v6132_v58, %v6149_v59 }
 0x2d9   : > { %4597 = vst [vmem:[%s6159_s6 + $0x98] sm:$0xff] %v3879_v37  ;;  %4600 = vst [vmem:[%s6159_s6 + $0xa0] sm:$0xff] %v3888_v38  ;;  %v3926_v41 = vadd.f32 %v6135_v3, %v6147_v35  ;;  %v3927_v55 = vadd.f32 %v6138_v42, %v6149_v59  ;;  %v3936_v12 = vadd.f32 %v6141_v46, %v6147_v35  ;;  %v3908_v58 = vmax.f32 %v3906_v54, 0.0 }
 0x2da   : > { %4601 = vst [vmem:[%s6159_s6 + $0xa8] sm:$0xff] %v3889_v32  ;;  %4604 = vst [vmem:[%s6159_s6 + $0xb0] sm:$0xff] %v3898_v13  ;;  %v3937_v9 = vadd.f32 %v6144_v27, %v6149_v59  ;;  %v3909_v45 = vmax.f32 %v3907_v60, 0.0  ;;  %v3918_v3 = vmax.f32 %v3916_v34, 0.0  ;;  %v3919_v42 = vmax.f32 %v3917_v61, 0.0 }
 0x2db   : > { %4605 = vst [vmem:[%s6159_s6 + $0xb8] sm:$0xff] %v3899_v14  ;;  %v3928_v46 = vmax.f32 %v3926_v41, 0.0  ;;  %v3929_v27 = vmax.f32 %v3927_v55, 0.0  ;;  %v3938_v35 = vmax.f32 %v3936_v12, 0.0  ;;  %4608 = vst [vmem:[%s6159_s6 + $0xc0] sm:$0xff] %v3908_v58 }
 0x2dc   : > { %v3939_v59 = vmax.f32 %v3937_v9, 0.0  ;;  %4609 = vst [vmem:[%s6159_s6 + $0xc8] sm:$0xff] %v3909_v45  ;;  %4612 = vst [vmem:[%s6159_s6 + $0xd0] sm:$0xff] %v3918_v3 }
 0x2dd   : > { %4613 = vst [vmem:[%s6159_s6 + $0xd8] sm:$0xff] %v3919_v42  ;;  %4616 = vst [vmem:[%s6159_s6 + $0xe0] sm:$0xff] %v3928_v46 }
 0x2de   : > { %4617 = vst [vmem:[%s6159_s6 + $0xe8] sm:$0xff] %v3929_v27  ;;  %4620 = vst [vmem:[%s6159_s6 + $0xf0] sm:$0xff] %v3938_v35 }
 0x2df   : > { %4621 = vst [vmem:[%s6159_s6 + $0xf8] sm:$0xff] %v3939_v59 }
 0x2e0   : > { %5013 = shalt.err (!%p5010_p7)
}
 0x2e1   : > { %s5014_s23 = scalar_lea.hbm %s6230_s11, 4096  ;;  %s5018_s29 = scalar_lea.hbm %s6288_s4, 8192 }
 0x2e2   : > { %p5015_p10 = scmp.ne.s32.totalorder %s6230_s11, %s5014_s23  ;;  %p5019_p13 = scmp.lt.u32.totalorder %s6230_s11, %s6288_s4 }
 0x2e3   : > { %p5020_p0 = scmp.lt.u32.totalorder %s5018_s29, %s5014_s23  ;;  %p5022_p2 = scmp.lt.u32.totalorder %s5014_s23, %s6230_s11 }
 0x2e4   : > { %p5016_p11 = pnand %p5015_p10, %p5134_p6 }
 0x2e5   : > { %p5021_p1 = por %p5020_p0, %p5019_p13 }
 0x2e6   : > { %p5017_p12 = pneg %p5016_p11 }
 0x2e7   : > { %p5023_p3 = por %p5022_p2, %p5021_p1 }
 0x2e9   : > { %p5024_p4 = pnand %p5023_p3, %p5017_p12 }
 0x2eb   : > { %5027 = shalt.err (!%p5024_p4)
}
 0x2ec   : > { %s5067_s6 = smov 256   ;;  %s5068_s7 = smov 512  }
 0x2ed   : > { %s5069_s19 = smov 16  }
 0x2ee   : > { %4631 = dma.vmem_to_hbm [thread:$0]  (%p5134_p6), %s6232_s9, 4096, %s6230_s11, %s3943_s12, %s5067_s6, %s5068_s7, %s5069_s19  }
 0x2ef PF: > { %s3971_s10 = sand.u32 1, %s5050_s15   ;;  %p4634_p5 = pnand %p4044_p9, %p5138_p8 }
 0x2f0   : > { %s3972_s13 = scalar_lea.sflag [#allocation4], %s3971_s10 }
 0x2f1   : > { %5045 = dma.done.wait (!%p4634_p5), %s3972_s13, 4096  }
 0x2f2   : > { %5047 = vsyncadd (!%p4634_p5), %s3972_s13, 4294963200  ;;  %p14_p7 = scmp.ge.s32.totalorder %s5120_s21, 4   ;;  %s6318_s15 = smov %s5054_s16 }
 0x2f3   : > { %s6319_s16 = smov %s5058_s17  ;;  %s6320_s17 = smov %s5132_s24 }
 0x2f4   : > { %s6321_s18 = smov %s5120_s21  ;;  %16 = sbr.rel (!%p14_p7) target bundleno = 3 (0x3), region = 150 }
 0x2fb   :  { %3977 = vsyncpa [#allocation4], 1 }
 0x2fc   :  { %3979 = vsyncpa [#allocation4 + $0x1], 1 }

</bundles_post_ra>
